<compile_context>
chip_gen: v6e
topology: v6e:2x2x1
jax: 0.10.0
libtpu: 0.0.40
codegen_flags: <defaults>
</compile_context>

<pallas_src>
import numpy as np

import jax
import jax.numpy as jnp
from jax import lax
from jax.experimental import pallas as pl
from jax.experimental.pallas import tpu as pltpu

NEG_SLOPE = 0.01     # LeakyReLU negative_slope of the module
EPS_DENOM = 1e-30    # guards the node-side approx reciprocal for zero-degree nodes


def _leaky_relu(x):
    return jnp.where(x >= 0, x, NEG_SLOPE * x)


# ----------------------------------------------------------------------------
# Fused kernel: fc -> 3x inflow -> seed attention -> 2x (outflow + propagate)
# ----------------------------------------------------------------------------
def attnio_fused_kernel(idx2_ref, feat_ref, feat_rel_ref, seed_ref, dctx_ref,
                        fcw_ref, wqc_ref, whe_ref, whd_ref, owinit_ref,
                        owqc_ref, seg_ref, expand_ref, rep_ref,
                        node_ref, edge_ref):
    """Single invocation (no grid); everything resident in VMEM / vregs.

    idx2_ref    : [2E, 1]  int32, rows 0..E-1 = src node ids, E..2E-1 = dst ids
    feat_ref    : [N, Din] entity embedding rows
    feat_rel_ref: [E, Din] relation embedding rows
    seed_ref    : [N, 1]   seed-set mask
    dctx_ref    : [1, Din] dialogue context
    fcw_ref     : [Din, D] self.fc weight (pre-transposed)
    wqc_ref     : [D, H*D] self.w_q concatenated along heads (lane-dense)
    whe_ref     : [H*D, D] self.w_h_entity (torch layout)
    whd_ref     : [Din, D] self.w_h_dialogue
    owinit_ref  : [Din, D] self.out_w_init
    owqc_ref    : [D, H*D] self.out_w_q concatenated along heads
    seg_ref     : [H*D, H] per-head segment-sum matrix (block one-hots)
    expand_ref  : [H, H*D] per-head column-expansion matrix (= seg.T)
    rep_ref     : [D, H*D] head-tiling matrix (kron(ones(1,H), eye(D)))
    node_ref    : [N, NODE_W]  lane-dense slab: feats0|feats1|feats2|a0|a1|a2|pad
    edge_ref    : [E, 128]     lane-dense slab: tp1|tp2|pad
    """
    f32 = jnp.float32
    bf16 = jnp.bfloat16

    N = feat_ref.shape[0]
    E = feat_rel_ref.shape[0]
    D = fcw_ref.shape[1]
    H = seg_ref.shape[1]

    def mm(a, b):
        return jnp.dot(a, b, preferred_element_type=f32)

    def gmm(inc_, vals):
        # one-hot(bf16) @ values; values cast to bf16 only at the MXU boundary,
        # accumulate in f32 (0/1 incidence entries are exact in bf16).
        return jnp.dot(inc_, vals.astype(bf16), preferred_element_type=f32)

    def scatter_sum(inc_, vals):
        # inc [E,N], vals [E,K] -> [N,K]; contracts the shared edge axis, so no
        # transposed incidence matrix is ever materialized.
        return lax.dot_general(inc_, vals.astype(bf16),
                               (((0,), (0,)), ((), ())),
                               preferred_element_type=f32)

    # ---- incidence built in-kernel from the stacked endpoint indices: no
    # O(E*N) f32 HBM DMA, bf16 transient only (E multiple of 16 keeps the
    # src/dst sublane split tile-aligned). ----
    col = lax.broadcasted_iota(jnp.int32, (2 * E, N), 1)
    inc = (col == idx2_ref[...]).astype(bf16)      # [2E, N]
    SRC = inc[:E]                                  # [E, N]
    DST = inc[E:]                                  # [E, N]

    seg = seg_ref[...]
    expand = expand_ref[...]
    rep = rep_ref[...]
    wqc = wqc_ref[...]
    whe = whe_ref[...]
    owqc = owqc_ref[...]

    # self.fc (no bias)
    ent = mm(feat_ref[...], fcw_ref[...])          # [N, D]
    rel = mm(feat_rel_ref[...], fcw_ref[...])      # [E, D]

    # dialogue-context term, hoisted (broadcast once, reused each inflow step)
    dlg = mm(dctx_ref[...], whd_ref[...])          # [1, D]
    dlg_b = jnp.broadcast_to(dlg, ent.shape).astype(f32)

    # ----- INFLOW: 3 steps -----
    feats = []
    cur = ent
    for _ in range(3):
        g = gmm(inc, cur)                          # [2E, D] fused src+dst gather
        ent_src, ent_dst = g[:E], g[E:]
        msg_base = ent_src + rel                   # [E, D]  u_add_e message
        msg_tiled = mm(msg_base, rep)              # [E, H*D] head tiling (MXU)
        er_dst_all = mm(ent_dst, wqc)              # [E, H*D] per-head w_q proj
        logits = _leaky_relu(mm(msg_tiled * er_dst_all, seg))   # [E, H]
        # global (per-head) max shift: softmax-invariant, prevents exp overflow
        logits = logits - jnp.max(logits, axis=0, keepdims=True)
        expv = jnp.exp(logits)

        # edge_softmax(norm_by='dst'): node-side approx reciprocal, then gather
        denom = scatter_sum(DST, expv)             # [N, H]
        inv = pl.reciprocal(denom + EPS_DENOM, approx=True)
        attn = expv * gmm(DST, inv)                # [E, H]

        # message = (ft_ent[u] + ft_rel[e]) * attention, scatter-sum onto dst
        attn_rep = mm(attn, expand)                # [E, H*D]
        ft_all = scatter_sum(DST, msg_tiled * attn_rep)          # [N, H*D]
        cur = mm(ft_all, whe) + dlg_b              # [N, D]
        feats.append(cur)

    # ----- seed attention a_0 -----
    dc2 = mm(dctx_ref[...], owinit_ref[...])       # [1, D]
    s_logits = jnp.sum(feats[0] * dc2, axis=-1, keepdims=True)   # [N, 1]
    s_logits = s_logits + 10000.0 * seed_ref[...] - 10000.0
    s_logits = s_logits - jnp.max(s_logits, axis=0, keepdims=True)
    e_exp = jnp.exp(s_logits)
    a = e_exp / jnp.sum(e_exp, axis=0, keepdims=True)            # [N, 1]

    # ----- OUTFLOW + propagation: 2 steps -----
    a_cols = [a]
    tp_cols = []
    for i in range(1, 3):
        entf = feats[i]
        # fused gather: [entf | a_{i-1}] through the stacked incidence at once
        vals = jnp.concatenate([entf, a], axis=1)  # [N, D+1]
        g = gmm(inc, vals)                         # [2E, D+1]
        ent_src = g[:E, :D]
        a_src = g[:E, D:D + 1]
        ent_dst = g[E:, :D]

        re = jnp.sum(rel * ent_src, axis=-1, keepdims=True)      # [E, 1]
        el_src_all = mm(ent_src, owqc)             # [E, H*D]
        logits = mm(mm(ent_dst, rep) * el_src_all, seg) + re     # [E, H]
        logits = _leaky_relu(logits)
        logits = logits - jnp.max(logits, axis=0, keepdims=True)
        expv = jnp.exp(logits)

        # edge_softmax(norm_by='src'): node-side reciprocal, then gather
        denom = scatter_sum(SRC, expv)             # [N, H]
        inv = pl.reciprocal(denom + EPS_DENOM, approx=True)
        attn = expv * gmm(SRC, inv)                # [E, H]
        tp = jnp.sum(attn, axis=-1, keepdims=True) * (1.0 / H)   # [E, 1]
        tp_cols.append(tp)

        # update_all(u_mul_e(a_{i-1}, tp_i), sum)
        a = scatter_sum(DST, a_src * tp)           # [N, 1]
        a_cols.append(a)

    # ----- lane-dense output packing (single unmasked store per slab) -----
    node_pieces = feats + a_cols
    node_pad = node_ref.shape[1] - (3 * D + 3)
    if node_pad > 0:
        node_pieces = node_pieces + [jnp.zeros((N, node_pad), f32)]
    node_ref[...] = jnp.concatenate(node_pieces, axis=1)

    edge_pieces = tp_cols
    edge_pad = edge_ref.shape[1] - 2
    if edge_pad > 0:
        edge_pieces = edge_pieces + [jnp.zeros((E, edge_pad), f32)]
    edge_ref[...] = jnp.concatenate(edge_pieces, axis=1)


# ----------------------------------------------------------------------------
# Forward pass wrapper (host glue: embedding lookups, weight packing)
# ----------------------------------------------------------------------------
def _round_up(x, m):
    return ((x + m - 1) // m) * m


def attnio_forward(params, node_ids, edge_types, src_idx, dst_idx,
                   seed_mask, dialogue_context):
    f32 = jnp.float32
    N = node_ids.shape[0]
    E = src_idx.shape[0]
    Din = params["fc_w_t"].shape[0]
    D = params["fc_w_t"].shape[1]
    H = params["w_q"].shape[0]

    # Embedding lookups (glue)
    feat = params["entity_emb"][node_ids]              # [N, Din]
    feat_rel = params["relation_emb"][edge_types]      # [E, Din]

    # Stacked endpoint indices (src rows then dst rows); incidence is built
    # inside the kernel, so only 2E int32 words cross HBM for connectivity.
    idx2 = jnp.concatenate([src_idx, dst_idx]).astype(jnp.int32)[:, None]

    # Head-batched weight layouts: column block h of wq_cat is w_q[h]
    wq_cat = jnp.transpose(params["w_q"], (1, 0, 2)).reshape(D, H * D)
    owq_cat = jnp.transpose(params["out_w_q"], (1, 0, 2)).reshape(D, H * D)
    whe_flat = params["w_h_entity"]                    # [H*D, D] (torch layout)

    # Per-head segment-sum / expansion / head-tiling matrices (constant)
    seg = jnp.repeat(jnp.eye(H, dtype=f32), D, axis=0)  # [H*D, H]
    expand = seg.T                                       # [H, H*D]
    rep = jnp.tile(jnp.eye(D, dtype=f32), (1, H))        # [D, H*D]

    NODE_W = _round_up(3 * D + 3, 128)                   # lane-dense node slab
    EDGE_W = 128                                         # lane-dense edge slab

    args = (idx2, feat, feat_rel, seed_mask, dialogue_context,
            params["fc_w_t"], wq_cat, whe_flat, params["w_h_dialogue"],
            params["out_w_init"], owq_cat, seg, expand, rep)

    # Scoped-VMEM sizing + advisory cost estimate
    in_bytes = sum(int(np.prod(a.shape)) * a.dtype.itemsize for a in args)
    out_bytes = (N * NODE_W + E * EDGE_W) * 4
    transient = (2 * (2 * E * N) * 2 + (2 * E * N) * 4      # bf16 incidence (+slack)
                 + 8 * E * H * D * 4                        # per-edge [E,H*D] temps
                 + 6 * N * H * D * 4 + 4 * N * D * 4)       # node-side temps
    vmem_limit = int(min(64 << 20,
                         max(8 << 20, 2 * (in_bytes + out_bytes + transient))))

    flops = 2 * (N + E) * Din * D
    flops += 3 * (2 * (2 * E) * N * D + 4 * E * D * H * D + 2 * E * H * D * H
                  + 4 * E * N * H + 2 * E * H * H * D + 2 * E * N * H * D
                  + 2 * N * H * D * D)
    flops += 2 * (2 * (2 * E) * N * (D + 1) + 4 * E * D * H * D
                  + 2 * E * H * D * H + 4 * E * N * H + 2 * E * N)
    transcendentals = 5 * E * H + N + 5 * N * H

    vmem = pl.BlockSpec(memory_space=pltpu.MemorySpace.VMEM)
    node_slab, edge_slab = pl.pallas_call(
        attnio_fused_kernel,
        out_shape=(jax.ShapeDtypeStruct((N, NODE_W), f32),
                   jax.ShapeDtypeStruct((E, EDGE_W), f32)),
        in_specs=[vmem] * len(args),
        out_specs=(vmem, vmem),
        compiler_params=pltpu.CompilerParams(vmem_limit_bytes=vmem_limit),
        cost_estimate=pl.CostEstimate(flops=int(flops),
                                      transcendentals=int(transcendentals),
                                      bytes_accessed=int(in_bytes + out_bytes)),
    )(*args)

    entity_features = [node_slab[:, i * D:(i + 1) * D] for i in range(3)]
    a_list = [node_slab[:, 3 * D + i:3 * D + i + 1] for i in range(3)]
    transition_probs = [edge_slab[:, i:i + 1] for i in range(2)]
    return entity_features, a_list, transition_probs


# ----------------------------------------------------------------------------
# Pure-JAX reference (gather / segment-sum formulation) for validation
# ----------------------------------------------------------------------------
def reference_forward(params, node_ids, edge_types, src_idx, dst_idx,
                      seed_mask, dialogue_context):
    with jax.default_matmul_precision("highest"):
        N = node_ids.shape[0]
        H = params["w_q"].shape[0]
        feat = params["entity_emb"][node_ids]
        feat_rel = params["relation_emb"][edge_types]
        ent = feat @ params["fc_w_t"]
        rel = feat_rel @ params["fc_w_t"]
        D = ent.shape[1]
        whe_flat = params["w_h_entity"]  # [H*D, D]

        def inflow(cur):
            er = jnp.einsum("nd,hde->hne", cur, params["w_q"])   # [H,N,D]
            base = cur[src_idx] + rel                            # [E,D]
            logits = jnp.einsum("ed,hed->he", base, er[:, dst_idx, :])  # [H,E]
            logits = jnp.where(logits >= 0, logits, NEG_SLOPE * logits)
            expv = jnp.exp(logits)
            denom = jnp.zeros((H, N)).at[:, dst_idx].add(expv)
            attn = expv / denom[:, dst_idx]
            msg = base[None] * attn[..., None]                   # [H,E,D]
            ft = jnp.zeros((H, N, D)).at[:, dst_idx, :].add(msg)
            rst = jnp.transpose(ft, (1, 0, 2)).reshape(N, -1)
            return rst @ whe_flat + dialogue_context @ params["w_h_dialogue"]

        feats = []
        cur = ent
        for _ in range(3):
            cur = inflow(cur)
            feats.append(cur)

        dc2 = dialogue_context @ params["out_w_init"]            # [1,D]
        logits = (feats[0] @ dc2.T)[:, 0]
        logits = logits + 10000.0 * seed_mask[:, 0] - 10000.0
        a = jax.nn.softmax(logits)
        a_list = [a]
        tps = []
        for i in range(1, 3):
            entf = feats[i]
            el = jnp.einsum("nd,hde->hne", entf, params["out_w_q"])       # [H,N,D]
            logits_e = jnp.einsum("ed,hed->eh", entf[dst_idx], el[:, src_idx, :])
            logits_e = logits_e + jnp.sum(rel * entf[src_idx], axis=-1,
                                          keepdims=True)                  # [E,H]
            logits_e = jnp.where(logits_e >= 0, logits_e, NEG_SLOPE * logits_e)
            expv = jnp.exp(logits_e)
            denom = jnp.zeros((N, H)).at[src_idx].add(expv)
            attn = expv / denom[src_idx]
            tp = jnp.sum(attn, axis=1) / H
            tps.append(tp)
            a = jnp.zeros((N,)).at[dst_idx].add(a_list[-1][src_idx] * tp)
            a_list.append(a)
        return feats, a_list, tps


# ----------------------------------------------------------------------------
if __name__ == "__main__":
    key = jax.random.PRNGKey(0)
    N, E, H = 16, 32, 4
    IN_FEATS, OUT_FEATS = 32, 32          # H*OUT_FEATS = 128 (lane-aligned)
    NUM_ENT, NUM_REL = 16, 8
    STD_W, STD_E = 0.05, 0.1              # deterministic small-scale synthetic init

    ks = jax.random.split(key, 12)
    params = {
        "entity_emb":   STD_E * jax.random.normal(ks[0], (NUM_ENT, IN_FEATS), jnp.float32),
        "relation_emb": STD_E * jax.random.normal(ks[1], (NUM_REL, IN_FEATS), jnp.float32),
        # fc.weight is (out, in) in torch; stored pre-transposed as (in, out)
        "fc_w_t":       STD_W * jax.random.normal(ks[2], (IN_FEATS, OUT_FEATS), jnp.float32),
        "w_q":          STD_W * jax.random.normal(ks[3], (H, OUT_FEATS, OUT_FEATS), jnp.float32),
        # w_h_entity kept in torch layout (H*D, D)
        "w_h_entity":   STD_W * jax.random.normal(ks[4], (H * OUT_FEATS, OUT_FEATS), jnp.float32),
        "w_h_dialogue": STD_W * jax.random.normal(ks[5], (IN_FEATS, OUT_FEATS), jnp.float32),
        "out_w_init":   STD_W * jax.random.normal(ks[6], (IN_FEATS, OUT_FEATS), jnp.float32),
        "out_w_q":      STD_W * jax.random.normal(ks[7], (H, OUT_FEATS, OUT_FEATS), jnp.float32),
    }

    node_ids = jnp.arange(N, dtype=jnp.int32) % NUM_ENT          # graph.ndata['nodeId']
    edge_types = jax.random.randint(ks[8], (E,), 0, NUM_REL)     # graph.edata['edge_type']
    src_idx = jax.random.randint(ks[9], (E,), 0, N)
    dst_idx = jax.random.randint(ks[10], (E,), 0, N)
    seed_set = jnp.array([0, 3, 7], dtype=jnp.int32)
    seed_mask = jnp.zeros((N, 1), jnp.float32).at[seed_set, 0].set(1.0)
    dialogue_context = STD_E * jax.random.normal(ks[11], (1, IN_FEATS), jnp.float32)

    fwd = jax.jit(attnio_forward)
    ent_feats, a_list, tps = fwd(params, node_ids, edge_types, src_idx, dst_idx,
                                 seed_mask, dialogue_context)
    jax.block_until_ready((ent_feats, a_list, tps))

    # Validate against the pure-JAX reference. Tolerances cover the bf16 MXU
    # incidence gathers / default matmul precision and the approx reciprocal
    # used for the edge-softmax normalization inside the kernel.
    ref_feats, ref_a, ref_tps = reference_forward(
        params, node_ids, edge_types, src_idx, dst_idx, seed_mask, dialogue_context)
    for p, r in zip(ent_feats, ref_feats):
        np.testing.assert_allclose(np.asarray(p), np.asarray(r), rtol=2e-2, atol=2e-3)
    for p, r in zip(a_list, ref_a):
        np.testing.assert_allclose(np.asarray(p)[:, 0], np.asarray(r), rtol=2e-2, atol=2e-3)
    for p, r in zip(tps, ref_tps):
        np.testing.assert_allclose(np.asarray(p)[:, 0], np.asarray(r), rtol=2e-2, atol=2e-3)

    print("KERNEL_OK")
</pallas_src>

<mosaic_0001>
module attributes {stable_mosaic.version = 11 : i64} {
  func.func @attnio_fused_kernel(%arg0: memref<64x1xi32, #tpu.memory_space<vmem>>, %arg1: memref<16x32xf32, #tpu.memory_space<vmem>>, %arg2: memref<32x32xf32, #tpu.memory_space<vmem>>, %arg3: memref<16x1xf32, #tpu.memory_space<vmem>>, %arg4: memref<1x32xf32, #tpu.memory_space<vmem>>, %arg5: memref<32x32xf32, #tpu.memory_space<vmem>>, %arg6: memref<32x128xf32, #tpu.memory_space<vmem>>, %arg7: memref<128x32xf32, #tpu.memory_space<vmem>>, %arg8: memref<32x32xf32, #tpu.memory_space<vmem>>, %arg9: memref<32x32xf32, #tpu.memory_space<vmem>>, %arg10: memref<32x128xf32, #tpu.memory_space<vmem>>, %arg11: memref<128x4xf32, #tpu.memory_space<vmem>>, %arg12: memref<4x128xf32, #tpu.memory_space<vmem>>, %arg13: memref<32x128xf32, #tpu.memory_space<vmem>>, %arg14: memref<16x128xf32, #tpu.memory_space<vmem>>, %arg15: memref<32x128xf32, #tpu.memory_space<vmem>>) attributes {dimension_semantics = [], scalar_prefetch = 0 : i64, scratch_operands = 0 : i64, tpu.core_type = #tpu.core_type<tc>} {
    %0 = tpu.iota {dimensions = array<i32: 1>} : vector<64x16xi32>
    %c0 = arith.constant 0 : index
    %c0_0 = arith.constant 0 : index
    %1 = vector.load %arg0[%c0, %c0_0] : memref<64x1xi32, #tpu.memory_space<vmem>>, vector<64x1xi32>
    %2 = vector.broadcast %1 : vector<64x1xi32> to vector<64x16xi32>
    %3 = arith.cmpi eq, %0, %2 : vector<64x16xi32>
    %4 = arith.extui %3 : vector<64x16xi1> to vector<64x16xi32>
    %5 = arith.sitofp %4 : vector<64x16xi32> to vector<64x16xf32>
    %6 = arith.truncf %5 : vector<64x16xf32> to vector<64x16xbf16>
    %7 = vector.extract_strided_slice %6 {offsets = [0, 0], sizes = [32, 16], strides = [1, 1]} : vector<64x16xbf16> to vector<32x16xbf16>
    %8 = vector.extract_strided_slice %6 {offsets = [32, 0], sizes = [32, 16], strides = [1, 1]} : vector<64x16xbf16> to vector<32x16xbf16>
    %c0_1 = arith.constant 0 : index
    %c0_2 = arith.constant 0 : index
    %9 = vector.load %arg11[%c0_1, %c0_2] : memref<128x4xf32, #tpu.memory_space<vmem>>, vector<128x4xf32>
    %c0_3 = arith.constant 0 : index
    %c0_4 = arith.constant 0 : index
    %10 = vector.load %arg12[%c0_3, %c0_4] : memref<4x128xf32, #tpu.memory_space<vmem>>, vector<4x128xf32>
    %c0_5 = arith.constant 0 : index
    %c0_6 = arith.constant 0 : index
    %11 = vector.load %arg13[%c0_5, %c0_6] : memref<32x128xf32, #tpu.memory_space<vmem>>, vector<32x128xf32>
    %c0_7 = arith.constant 0 : index
    %c0_8 = arith.constant 0 : index
    %12 = vector.load %arg6[%c0_7, %c0_8] : memref<32x128xf32, #tpu.memory_space<vmem>>, vector<32x128xf32>
    %c0_9 = arith.constant 0 : index
    %c0_10 = arith.constant 0 : index
    %13 = vector.load %arg7[%c0_9, %c0_10] : memref<128x32xf32, #tpu.memory_space<vmem>>, vector<128x32xf32>
    %c0_11 = arith.constant 0 : index
    %c0_12 = arith.constant 0 : index
    %14 = vector.load %arg10[%c0_11, %c0_12] : memref<32x128xf32, #tpu.memory_space<vmem>>, vector<32x128xf32>
    %c0_13 = arith.constant 0 : index
    %c0_14 = arith.constant 0 : index
    %15 = vector.load %arg1[%c0_13, %c0_14] : memref<16x32xf32, #tpu.memory_space<vmem>>, vector<16x32xf32>
    %c0_15 = arith.constant 0 : index
    %c0_16 = arith.constant 0 : index
    %16 = vector.load %arg5[%c0_15, %c0_16] : memref<32x32xf32, #tpu.memory_space<vmem>>, vector<32x32xf32>
    %cst = arith.constant dense<0.000000e+00> : vector<16x32xf32>
    %17 = tpu.matmul %15, %16, %cst {dimension_numbers = #tpu.dot_dimension_numbers<[1], [0], [0], [1], [0, 0, 1, 1], [], []>} : vector<16x32xf32>, vector<32x32xf32>, vector<16x32xf32> -> vector<16x32xf32>
    %c0_17 = arith.constant 0 : index
    %c0_18 = arith.constant 0 : index
    %18 = vector.load %arg2[%c0_17, %c0_18] : memref<32x32xf32, #tpu.memory_space<vmem>>, vector<32x32xf32>
    %c0_19 = arith.constant 0 : index
    %c0_20 = arith.constant 0 : index
    %19 = vector.load %arg5[%c0_19, %c0_20] : memref<32x32xf32, #tpu.memory_space<vmem>>, vector<32x32xf32>
    %cst_21 = arith.constant dense<0.000000e+00> : vector<32x32xf32>
    %20 = tpu.matmul %18, %19, %cst_21 {dimension_numbers = #tpu.dot_dimension_numbers<[1], [0], [0], [1], [0, 0, 1, 1], [], []>} : vector<32x32xf32>, vector<32x32xf32>, vector<32x32xf32> -> vector<32x32xf32>
    %c0_22 = arith.constant 0 : index
    %c0_23 = arith.constant 0 : index
    %21 = vector.load %arg4[%c0_22, %c0_23] : memref<1x32xf32, #tpu.memory_space<vmem>>, vector<1x32xf32>
    %c0_24 = arith.constant 0 : index
    %c0_25 = arith.constant 0 : index
    %22 = vector.load %arg8[%c0_24, %c0_25] : memref<32x32xf32, #tpu.memory_space<vmem>>, vector<32x32xf32>
    %cst_26 = arith.constant dense<0.000000e+00> : vector<1x32xf32>
    %23 = tpu.matmul %21, %22, %cst_26 {dimension_numbers = #tpu.dot_dimension_numbers<[1], [0], [0], [1], [0, 0, 1, 1], [], []>} : vector<1x32xf32>, vector<32x32xf32>, vector<1x32xf32> -> vector<1x32xf32>
    %24 = vector.shape_cast %23 : vector<1x32xf32> to vector<1x32xf32>
    %25 = vector.broadcast %24 : vector<1x32xf32> to vector<16x32xf32>
    %26 = arith.truncf %17 : vector<16x32xf32> to vector<16x32xbf16>
    %cst_27 = arith.constant dense<0.000000e+00> : vector<64x32xf32>
    %27 = tpu.matmul %6, %26, %cst_27 {dimension_numbers = #tpu.dot_dimension_numbers<[1], [0], [0], [1], [0, 0, 1, 1], [], []>} : vector<64x16xbf16>, vector<16x32xbf16>, vector<64x32xf32> -> vector<64x32xf32>
    %28 = vector.extract_strided_slice %27 {offsets = [0, 0], sizes = [32, 32], strides = [1, 1]} : vector<64x32xf32> to vector<32x32xf32>
    %29 = vector.extract_strided_slice %27 {offsets = [32, 0], sizes = [32, 32], strides = [1, 1]} : vector<64x32xf32> to vector<32x32xf32>
    %30 = arith.addf %28, %20 : vector<32x32xf32>
    %cst_28 = arith.constant dense<0.000000e+00> : vector<32x128xf32>
    %31 = tpu.matmul %30, %11, %cst_28 {dimension_numbers = #tpu.dot_dimension_numbers<[1], [0], [0], [1], [0, 0, 1, 1], [], []>} : vector<32x32xf32>, vector<32x128xf32>, vector<32x128xf32> -> vector<32x128xf32>
    %cst_29 = arith.constant dense<0.000000e+00> : vector<32x128xf32>
    %32 = tpu.matmul %29, %12, %cst_29 {dimension_numbers = #tpu.dot_dimension_numbers<[1], [0], [0], [1], [0, 0, 1, 1], [], []>} : vector<32x32xf32>, vector<32x128xf32>, vector<32x128xf32> -> vector<32x128xf32>
    %33 = arith.mulf %31, %32 : vector<32x128xf32>
    %cst_30 = arith.constant dense<0.000000e+00> : vector<32x4xf32>
    %34 = tpu.matmul %33, %9, %cst_30 {dimension_numbers = #tpu.dot_dimension_numbers<[1], [0], [0], [1], [0, 0, 1, 1], [], []>} : vector<32x128xf32>, vector<128x4xf32>, vector<32x4xf32> -> vector<32x4xf32>
    %cst_31 = arith.constant 0.000000e+00 : f32
    %35 = vector.broadcast %cst_31 : f32 to vector<32x4xf32>
    %36 = arith.cmpf oge, %34, %35 : vector<32x4xf32>
    %cst_32 = arith.constant 0.00999999977 : f32
    %37 = vector.broadcast %cst_32 : f32 to vector<32x4xf32>
    %38 = arith.mulf %37, %34 : vector<32x4xf32>
    %39 = arith.select %36, %34, %38 : vector<32x4xi1>, vector<32x4xf32>
    %cst_33 = arith.constant dense<0xFF800000> : vector<4xf32>
    %40 = vector.multi_reduction <maximumf>, %39, %cst_33 [0] : vector<32x4xf32> to vector<4xf32>
    %41 = vector.shape_cast %40 : vector<4xf32> to vector<1x4xf32>
    %42 = vector.broadcast %41 : vector<1x4xf32> to vector<32x4xf32>
    %43 = arith.subf %39, %42 : vector<32x4xf32>
    %44 = math.exp %43 : vector<32x4xf32>
    %45 = arith.truncf %44 : vector<32x4xf32> to vector<32x4xbf16>
    %cst_34 = arith.constant dense<0.000000e+00> : vector<16x4xf32>
    %46 = tpu.matmul %8, %45, %cst_34 {dimension_numbers = #tpu.dot_dimension_numbers<[0], [0], [1], [1], [0, 1, 1, 1], [], []>} : vector<32x16xbf16>, vector<32x4xbf16>, vector<16x4xf32> -> vector<16x4xf32>
    %cst_35 = arith.constant 1.000000e-30 : f32
    %47 = vector.broadcast %cst_35 : f32 to vector<16x4xf32>
    %48 = arith.addf %46, %47 : vector<16x4xf32>
    %49 = tpu.reciprocal %48 {approx = true} : vector<16x4xf32> -> vector<16x4xf32>
    %50 = arith.truncf %49 : vector<16x4xf32> to vector<16x4xbf16>
    %cst_36 = arith.constant dense<0.000000e+00> : vector<32x4xf32>
    %51 = tpu.matmul %8, %50, %cst_36 {dimension_numbers = #tpu.dot_dimension_numbers<[1], [0], [0], [1], [0, 0, 1, 1], [], []>} : vector<32x16xbf16>, vector<16x4xbf16>, vector<32x4xf32> -> vector<32x4xf32>
    %52 = arith.mulf %44, %51 : vector<32x4xf32>
    %cst_37 = arith.constant dense<0.000000e+00> : vector<32x128xf32>
    %53 = tpu.matmul %52, %10, %cst_37 {dimension_numbers = #tpu.dot_dimension_numbers<[1], [0], [0], [1], [0, 0, 1, 1], [], []>} : vector<32x4xf32>, vector<4x128xf32>, vector<32x128xf32> -> vector<32x128xf32>
    %54 = arith.mulf %31, %53 : vector<32x128xf32>
    %55 = arith.truncf %54 : vector<32x128xf32> to vector<32x128xbf16>
    %cst_38 = arith.constant dense<0.000000e+00> : vector<16x128xf32>
    %56 = tpu.matmul %8, %55, %cst_38 {dimension_numbers = #tpu.dot_dimension_numbers<[0], [0], [1], [1], [0, 1, 1, 1], [], []>} : vector<32x16xbf16>, vector<32x128xbf16>, vector<16x128xf32> -> vector<16x128xf32>
    %cst_39 = arith.constant dense<0.000000e+00> : vector<16x32xf32>
    %57 = tpu.matmul %56, %13, %cst_39 {dimension_numbers = #tpu.dot_dimension_numbers<[1], [0], [0], [1], [0, 0, 1, 1], [], []>} : vector<16x128xf32>, vector<128x32xf32>, vector<16x32xf32> -> vector<16x32xf32>
    %58 = arith.addf %57, %25 : vector<16x32xf32>
    %59 = arith.truncf %58 : vector<16x32xf32> to vector<16x32xbf16>
    %cst_40 = arith.constant dense<0.000000e+00> : vector<64x32xf32>
    %60 = tpu.matmul %6, %59, %cst_40 {dimension_numbers = #tpu.dot_dimension_numbers<[1], [0], [0], [1], [0, 0, 1, 1], [], []>} : vector<64x16xbf16>, vector<16x32xbf16>, vector<64x32xf32> -> vector<64x32xf32>
    %61 = vector.extract_strided_slice %60 {offsets = [0, 0], sizes = [32, 32], strides = [1, 1]} : vector<64x32xf32> to vector<32x32xf32>
    %62 = vector.extract_strided_slice %60 {offsets = [32, 0], sizes = [32, 32], strides = [1, 1]} : vector<64x32xf32> to vector<32x32xf32>
    %63 = arith.addf %61, %20 : vector<32x32xf32>
    %cst_41 = arith.constant dense<0.000000e+00> : vector<32x128xf32>
    %64 = tpu.matmul %63, %11, %cst_41 {dimension_numbers = #tpu.dot_dimension_numbers<[1], [0], [0], [1], [0, 0, 1, 1], [], []>} : vector<32x32xf32>, vector<32x128xf32>, vector<32x128xf32> -> vector<32x128xf32>
    %cst_42 = arith.constant dense<0.000000e+00> : vector<32x128xf32>
    %65 = tpu.matmul %62, %12, %cst_42 {dimension_numbers = #tpu.dot_dimension_numbers<[1], [0], [0], [1], [0, 0, 1, 1], [], []>} : vector<32x32xf32>, vector<32x128xf32>, vector<32x128xf32> -> vector<32x128xf32>
    %66 = arith.mulf %64, %65 : vector<32x128xf32>
    %cst_43 = arith.constant dense<0.000000e+00> : vector<32x4xf32>
    %67 = tpu.matmul %66, %9, %cst_43 {dimension_numbers = #tpu.dot_dimension_numbers<[1], [0], [0], [1], [0, 0, 1, 1], [], []>} : vector<32x128xf32>, vector<128x4xf32>, vector<32x4xf32> -> vector<32x4xf32>
    %cst_44 = arith.constant 0.000000e+00 : f32
    %68 = vector.broadcast %cst_44 : f32 to vector<32x4xf32>
    %69 = arith.cmpf oge, %67, %68 : vector<32x4xf32>
    %cst_45 = arith.constant 0.00999999977 : f32
    %70 = vector.broadcast %cst_45 : f32 to vector<32x4xf32>
    %71 = arith.mulf %70, %67 : vector<32x4xf32>
    %72 = arith.select %69, %67, %71 : vector<32x4xi1>, vector<32x4xf32>
    %cst_46 = arith.constant dense<0xFF800000> : vector<4xf32>
    %73 = vector.multi_reduction <maximumf>, %72, %cst_46 [0] : vector<32x4xf32> to vector<4xf32>
    %74 = vector.shape_cast %73 : vector<4xf32> to vector<1x4xf32>
    %75 = vector.broadcast %74 : vector<1x4xf32> to vector<32x4xf32>
    %76 = arith.subf %72, %75 : vector<32x4xf32>
    %77 = math.exp %76 : vector<32x4xf32>
    %78 = arith.truncf %77 : vector<32x4xf32> to vector<32x4xbf16>
    %cst_47 = arith.constant dense<0.000000e+00> : vector<16x4xf32>
    %79 = tpu.matmul %8, %78, %cst_47 {dimension_numbers = #tpu.dot_dimension_numbers<[0], [0], [1], [1], [0, 1, 1, 1], [], []>} : vector<32x16xbf16>, vector<32x4xbf16>, vector<16x4xf32> -> vector<16x4xf32>
    %cst_48 = arith.constant 1.000000e-30 : f32
    %80 = vector.broadcast %cst_48 : f32 to vector<16x4xf32>
    %81 = arith.addf %79, %80 : vector<16x4xf32>
    %82 = tpu.reciprocal %81 {approx = true} : vector<16x4xf32> -> vector<16x4xf32>
    %83 = arith.truncf %82 : vector<16x4xf32> to vector<16x4xbf16>
    %cst_49 = arith.constant dense<0.000000e+00> : vector<32x4xf32>
    %84 = tpu.matmul %8, %83, %cst_49 {dimension_numbers = #tpu.dot_dimension_numbers<[1], [0], [0], [1], [0, 0, 1, 1], [], []>} : vector<32x16xbf16>, vector<16x4xbf16>, vector<32x4xf32> -> vector<32x4xf32>
    %85 = arith.mulf %77, %84 : vector<32x4xf32>
    %cst_50 = arith.constant dense<0.000000e+00> : vector<32x128xf32>
    %86 = tpu.matmul %85, %10, %cst_50 {dimension_numbers = #tpu.dot_dimension_numbers<[1], [0], [0], [1], [0, 0, 1, 1], [], []>} : vector<32x4xf32>, vector<4x128xf32>, vector<32x128xf32> -> vector<32x128xf32>
    %87 = arith.mulf %64, %86 : vector<32x128xf32>
    %88 = arith.truncf %87 : vector<32x128xf32> to vector<32x128xbf16>
    %cst_51 = arith.constant dense<0.000000e+00> : vector<16x128xf32>
    %89 = tpu.matmul %8, %88, %cst_51 {dimension_numbers = #tpu.dot_dimension_numbers<[0], [0], [1], [1], [0, 1, 1, 1], [], []>} : vector<32x16xbf16>, vector<32x128xbf16>, vector<16x128xf32> -> vector<16x128xf32>
    %cst_52 = arith.constant dense<0.000000e+00> : vector<16x32xf32>
    %90 = tpu.matmul %89, %13, %cst_52 {dimension_numbers = #tpu.dot_dimension_numbers<[1], [0], [0], [1], [0, 0, 1, 1], [], []>} : vector<16x128xf32>, vector<128x32xf32>, vector<16x32xf32> -> vector<16x32xf32>
    %91 = arith.addf %90, %25 : vector<16x32xf32>
    %92 = arith.truncf %91 : vector<16x32xf32> to vector<16x32xbf16>
    %cst_53 = arith.constant dense<0.000000e+00> : vector<64x32xf32>
    %93 = tpu.matmul %6, %92, %cst_53 {dimension_numbers = #tpu.dot_dimension_numbers<[1], [0], [0], [1], [0, 0, 1, 1], [], []>} : vector<64x16xbf16>, vector<16x32xbf16>, vector<64x32xf32> -> vector<64x32xf32>
    %94 = vector.extract_strided_slice %93 {offsets = [0, 0], sizes = [32, 32], strides = [1, 1]} : vector<64x32xf32> to vector<32x32xf32>
    %95 = vector.extract_strided_slice %93 {offsets = [32, 0], sizes = [32, 32], strides = [1, 1]} : vector<64x32xf32> to vector<32x32xf32>
    %96 = arith.addf %94, %20 : vector<32x32xf32>
    %cst_54 = arith.constant dense<0.000000e+00> : vector<32x128xf32>
    %97 = tpu.matmul %96, %11, %cst_54 {dimension_numbers = #tpu.dot_dimension_numbers<[1], [0], [0], [1], [0, 0, 1, 1], [], []>} : vector<32x32xf32>, vector<32x128xf32>, vector<32x128xf32> -> vector<32x128xf32>
    %cst_55 = arith.constant dense<0.000000e+00> : vector<32x128xf32>
    %98 = tpu.matmul %95, %12, %cst_55 {dimension_numbers = #tpu.dot_dimension_numbers<[1], [0], [0], [1], [0, 0, 1, 1], [], []>} : vector<32x32xf32>, vector<32x128xf32>, vector<32x128xf32> -> vector<32x128xf32>
    %99 = arith.mulf %97, %98 : vector<32x128xf32>
    %cst_56 = arith.constant dense<0.000000e+00> : vector<32x4xf32>
    %100 = tpu.matmul %99, %9, %cst_56 {dimension_numbers = #tpu.dot_dimension_numbers<[1], [0], [0], [1], [0, 0, 1, 1], [], []>} : vector<32x128xf32>, vector<128x4xf32>, vector<32x4xf32> -> vector<32x4xf32>
    %cst_57 = arith.constant 0.000000e+00 : f32
    %101 = vector.broadcast %cst_57 : f32 to vector<32x4xf32>
    %102 = arith.cmpf oge, %100, %101 : vector<32x4xf32>
    %cst_58 = arith.constant 0.00999999977 : f32
    %103 = vector.broadcast %cst_58 : f32 to vector<32x4xf32>
    %104 = arith.mulf %103, %100 : vector<32x4xf32>
    %105 = arith.select %102, %100, %104 : vector<32x4xi1>, vector<32x4xf32>
    %cst_59 = arith.constant dense<0xFF800000> : vector<4xf32>
    %106 = vector.multi_reduction <maximumf>, %105, %cst_59 [0] : vector<32x4xf32> to vector<4xf32>
    %107 = vector.shape_cast %106 : vector<4xf32> to vector<1x4xf32>
    %108 = vector.broadcast %107 : vector<1x4xf32> to vector<32x4xf32>
    %109 = arith.subf %105, %108 : vector<32x4xf32>
    %110 = math.exp %109 : vector<32x4xf32>
    %111 = arith.truncf %110 : vector<32x4xf32> to vector<32x4xbf16>
    %cst_60 = arith.constant dense<0.000000e+00> : vector<16x4xf32>
    %112 = tpu.matmul %8, %111, %cst_60 {dimension_numbers = #tpu.dot_dimension_numbers<[0], [0], [1], [1], [0, 1, 1, 1], [], []>} : vector<32x16xbf16>, vector<32x4xbf16>, vector<16x4xf32> -> vector<16x4xf32>
    %cst_61 = arith.constant 1.000000e-30 : f32
    %113 = vector.broadcast %cst_61 : f32 to vector<16x4xf32>
    %114 = arith.addf %112, %113 : vector<16x4xf32>
    %115 = tpu.reciprocal %114 {approx = true} : vector<16x4xf32> -> vector<16x4xf32>
    %116 = arith.truncf %115 : vector<16x4xf32> to vector<16x4xbf16>
    %cst_62 = arith.constant dense<0.000000e+00> : vector<32x4xf32>
    %117 = tpu.matmul %8, %116, %cst_62 {dimension_numbers = #tpu.dot_dimension_numbers<[1], [0], [0], [1], [0, 0, 1, 1], [], []>} : vector<32x16xbf16>, vector<16x4xbf16>, vector<32x4xf32> -> vector<32x4xf32>
    %118 = arith.mulf %110, %117 : vector<32x4xf32>
    %cst_63 = arith.constant dense<0.000000e+00> : vector<32x128xf32>
    %119 = tpu.matmul %118, %10, %cst_63 {dimension_numbers = #tpu.dot_dimension_numbers<[1], [0], [0], [1], [0, 0, 1, 1], [], []>} : vector<32x4xf32>, vector<4x128xf32>, vector<32x128xf32> -> vector<32x128xf32>
    %120 = arith.mulf %97, %119 : vector<32x128xf32>
    %121 = arith.truncf %120 : vector<32x128xf32> to vector<32x128xbf16>
    %cst_64 = arith.constant dense<0.000000e+00> : vector<16x128xf32>
    %122 = tpu.matmul %8, %121, %cst_64 {dimension_numbers = #tpu.dot_dimension_numbers<[0], [0], [1], [1], [0, 1, 1, 1], [], []>} : vector<32x16xbf16>, vector<32x128xbf16>, vector<16x128xf32> -> vector<16x128xf32>
    %cst_65 = arith.constant dense<0.000000e+00> : vector<16x32xf32>
    %123 = tpu.matmul %122, %13, %cst_65 {dimension_numbers = #tpu.dot_dimension_numbers<[1], [0], [0], [1], [0, 0, 1, 1], [], []>} : vector<16x128xf32>, vector<128x32xf32>, vector<16x32xf32> -> vector<16x32xf32>
    %124 = arith.addf %123, %25 : vector<16x32xf32>
    %c0_66 = arith.constant 0 : index
    %c0_67 = arith.constant 0 : index
    %125 = vector.load %arg4[%c0_66, %c0_67] : memref<1x32xf32, #tpu.memory_space<vmem>>, vector<1x32xf32>
    %c0_68 = arith.constant 0 : index
    %c0_69 = arith.constant 0 : index
    %126 = vector.load %arg9[%c0_68, %c0_69] : memref<32x32xf32, #tpu.memory_space<vmem>>, vector<32x32xf32>
    %cst_70 = arith.constant dense<0.000000e+00> : vector<1x32xf32>
    %127 = tpu.matmul %125, %126, %cst_70 {dimension_numbers = #tpu.dot_dimension_numbers<[1], [0], [0], [1], [0, 0, 1, 1], [], []>} : vector<1x32xf32>, vector<32x32xf32>, vector<1x32xf32> -> vector<1x32xf32>
    %128 = vector.broadcast %127 : vector<1x32xf32> to vector<16x32xf32>
    %129 = arith.mulf %58, %128 : vector<16x32xf32>
    %cst_71 = arith.constant dense<0.000000e+00> : vector<16xf32>
    %130 = vector.multi_reduction <add>, %129, %cst_71 [1] : vector<16x32xf32> to vector<16xf32>
    %131 = vector.shape_cast %130 : vector<16xf32> to vector<16x1xf32>
    %c0_72 = arith.constant 0 : index
    %c0_73 = arith.constant 0 : index
    %132 = vector.load %arg3[%c0_72, %c0_73] : memref<16x1xf32, #tpu.memory_space<vmem>>, vector<16x1xf32>
    %cst_74 = arith.constant 1.000000e+04 : f32
    %133 = vector.broadcast %cst_74 : f32 to vector<16x1xf32>
    %134 = arith.mulf %133, %132 : vector<16x1xf32>
    %135 = arith.addf %131, %134 : vector<16x1xf32>
    %cst_75 = arith.constant 1.000000e+04 : f32
    %136 = vector.broadcast %cst_75 : f32 to vector<16x1xf32>
    %137 = arith.subf %135, %136 : vector<16x1xf32>
    %cst_76 = arith.constant dense<0xFF800000> : vector<1xf32>
    %138 = vector.multi_reduction <maximumf>, %137, %cst_76 [0] : vector<16x1xf32> to vector<1xf32>
    %139 = vector.shape_cast %138 : vector<1xf32> to vector<1x1xf32>
    %140 = vector.broadcast %139 : vector<1x1xf32> to vector<16x1xf32>
    %141 = arith.subf %137, %140 : vector<16x1xf32>
    %142 = math.exp %141 : vector<16x1xf32>
    %cst_77 = arith.constant dense<0.000000e+00> : vector<1xf32>
    %143 = vector.multi_reduction <add>, %142, %cst_77 [0] : vector<16x1xf32> to vector<1xf32>
    %144 = vector.shape_cast %143 : vector<1xf32> to vector<1x1xf32>
    %145 = vector.broadcast %144 : vector<1x1xf32> to vector<16x1xf32>
    %146 = arith.divf %142, %145 : vector<16x1xf32>
    %147 = tpu.concatenate %91, %146 in 1 : vector<16x32xf32>, vector<16x1xf32> -> vector<16x33xf32>
    %148 = arith.truncf %147 : vector<16x33xf32> to vector<16x33xbf16>
    %cst_78 = arith.constant dense<0.000000e+00> : vector<64x33xf32>
    %149 = tpu.matmul %6, %148, %cst_78 {dimension_numbers = #tpu.dot_dimension_numbers<[1], [0], [0], [1], [0, 0, 1, 1], [], []>} : vector<64x16xbf16>, vector<16x33xbf16>, vector<64x33xf32> -> vector<64x33xf32>
    %150 = vector.extract_strided_slice %149 {offsets = [0, 0], sizes = [32, 32], strides = [1, 1]} : vector<64x33xf32> to vector<32x32xf32>
    %151 = vector.extract_strided_slice %149 {offsets = [0, 32], sizes = [32, 1], strides = [1, 1]} : vector<64x33xf32> to vector<32x1xf32>
    %152 = vector.extract_strided_slice %149 {offsets = [32, 0], sizes = [32, 32], strides = [1, 1]} : vector<64x33xf32> to vector<32x32xf32>
    %153 = arith.mulf %20, %150 : vector<32x32xf32>
    %cst_79 = arith.constant dense<0.000000e+00> : vector<32xf32>
    %154 = vector.multi_reduction <add>, %153, %cst_79 [1] : vector<32x32xf32> to vector<32xf32>
    %155 = vector.shape_cast %154 : vector<32xf32> to vector<32x1xf32>
    %cst_80 = arith.constant dense<0.000000e+00> : vector<32x128xf32>
    %156 = tpu.matmul %150, %14, %cst_80 {dimension_numbers = #tpu.dot_dimension_numbers<[1], [0], [0], [1], [0, 0, 1, 1], [], []>} : vector<32x32xf32>, vector<32x128xf32>, vector<32x128xf32> -> vector<32x128xf32>
    %cst_81 = arith.constant dense<0.000000e+00> : vector<32x128xf32>
    %157 = tpu.matmul %152, %11, %cst_81 {dimension_numbers = #tpu.dot_dimension_numbers<[1], [0], [0], [1], [0, 0, 1, 1], [], []>} : vector<32x32xf32>, vector<32x128xf32>, vector<32x128xf32> -> vector<32x128xf32>
    %158 = arith.mulf %157, %156 : vector<32x128xf32>
    %cst_82 = arith.constant dense<0.000000e+00> : vector<32x4xf32>
    %159 = tpu.matmul %158, %9, %cst_82 {dimension_numbers = #tpu.dot_dimension_numbers<[1], [0], [0], [1], [0, 0, 1, 1], [], []>} : vector<32x128xf32>, vector<128x4xf32>, vector<32x4xf32> -> vector<32x4xf32>
    %160 = vector.broadcast %155 : vector<32x1xf32> to vector<32x4xf32>
    %161 = arith.addf %159, %160 : vector<32x4xf32>
    %cst_83 = arith.constant 0.000000e+00 : f32
    %162 = vector.broadcast %cst_83 : f32 to vector<32x4xf32>
    %163 = arith.cmpf oge, %161, %162 : vector<32x4xf32>
    %cst_84 = arith.constant 0.00999999977 : f32
    %164 = vector.broadcast %cst_84 : f32 to vector<32x4xf32>
    %165 = arith.mulf %164, %161 : vector<32x4xf32>
    %166 = arith.select %163, %161, %165 : vector<32x4xi1>, vector<32x4xf32>
    %cst_85 = arith.constant dense<0xFF800000> : vector<4xf32>
    %167 = vector.multi_reduction <maximumf>, %166, %cst_85 [0] : vector<32x4xf32> to vector<4xf32>
    %168 = vector.shape_cast %167 : vector<4xf32> to vector<1x4xf32>
    %169 = vector.broadcast %168 : vector<1x4xf32> to vector<32x4xf32>
    %170 = arith.subf %166, %169 : vector<32x4xf32>
    %171 = math.exp %170 : vector<32x4xf32>
    %172 = arith.truncf %171 : vector<32x4xf32> to vector<32x4xbf16>
    %cst_86 = arith.constant dense<0.000000e+00> : vector<16x4xf32>
    %173 = tpu.matmul %7, %172, %cst_86 {dimension_numbers = #tpu.dot_dimension_numbers<[0], [0], [1], [1], [0, 1, 1, 1], [], []>} : vector<32x16xbf16>, vector<32x4xbf16>, vector<16x4xf32> -> vector<16x4xf32>
    %cst_87 = arith.constant 1.000000e-30 : f32
    %174 = vector.broadcast %cst_87 : f32 to vector<16x4xf32>
    %175 = arith.addf %173, %174 : vector<16x4xf32>
    %176 = tpu.reciprocal %175 {approx = true} : vector<16x4xf32> -> vector<16x4xf32>
    %177 = arith.truncf %176 : vector<16x4xf32> to vector<16x4xbf16>
    %cst_88 = arith.constant dense<0.000000e+00> : vector<32x4xf32>
    %178 = tpu.matmul %7, %177, %cst_88 {dimension_numbers = #tpu.dot_dimension_numbers<[1], [0], [0], [1], [0, 0, 1, 1], [], []>} : vector<32x16xbf16>, vector<16x4xbf16>, vector<32x4xf32> -> vector<32x4xf32>
    %179 = arith.mulf %171, %178 : vector<32x4xf32>
    %cst_89 = arith.constant dense<0.000000e+00> : vector<32xf32>
    %180 = vector.multi_reduction <add>, %179, %cst_89 [1] : vector<32x4xf32> to vector<32xf32>
    %181 = vector.shape_cast %180 : vector<32xf32> to vector<32x1xf32>
    %cst_90 = arith.constant 2.500000e-01 : f32
    %182 = vector.broadcast %cst_90 : f32 to vector<32x1xf32>
    %183 = arith.mulf %181, %182 : vector<32x1xf32>
    %184 = arith.mulf %151, %183 : vector<32x1xf32>
    %185 = arith.truncf %184 : vector<32x1xf32> to vector<32x1xbf16>
    %cst_91 = arith.constant dense<0.000000e+00> : vector<16x1xf32>
    %186 = tpu.matmul %8, %185, %cst_91 {dimension_numbers = #tpu.dot_dimension_numbers<[0], [0], [1], [1], [0, 1, 1, 1], [], []>} : vector<32x16xbf16>, vector<32x1xbf16>, vector<16x1xf32> -> vector<16x1xf32>
    %187 = tpu.concatenate %124, %186 in 1 : vector<16x32xf32>, vector<16x1xf32> -> vector<16x33xf32>
    %188 = arith.truncf %187 : vector<16x33xf32> to vector<16x33xbf16>
    %cst_92 = arith.constant dense<0.000000e+00> : vector<64x33xf32>
    %189 = tpu.matmul %6, %188, %cst_92 {dimension_numbers = #tpu.dot_dimension_numbers<[1], [0], [0], [1], [0, 0, 1, 1], [], []>} : vector<64x16xbf16>, vector<16x33xbf16>, vector<64x33xf32> -> vector<64x33xf32>
    %190 = vector.extract_strided_slice %189 {offsets = [0, 0], sizes = [32, 32], strides = [1, 1]} : vector<64x33xf32> to vector<32x32xf32>
    %191 = vector.extract_strided_slice %189 {offsets = [0, 32], sizes = [32, 1], strides = [1, 1]} : vector<64x33xf32> to vector<32x1xf32>
    %192 = vector.extract_strided_slice %189 {offsets = [32, 0], sizes = [32, 32], strides = [1, 1]} : vector<64x33xf32> to vector<32x32xf32>
    %193 = arith.mulf %20, %190 : vector<32x32xf32>
    %cst_93 = arith.constant dense<0.000000e+00> : vector<32xf32>
    %194 = vector.multi_reduction <add>, %193, %cst_93 [1] : vector<32x32xf32> to vector<32xf32>
    %195 = vector.shape_cast %194 : vector<32xf32> to vector<32x1xf32>
    %cst_94 = arith.constant dense<0.000000e+00> : vector<32x128xf32>
    %196 = tpu.matmul %190, %14, %cst_94 {dimension_numbers = #tpu.dot_dimension_numbers<[1], [0], [0], [1], [0, 0, 1, 1], [], []>} : vector<32x32xf32>, vector<32x128xf32>, vector<32x128xf32> -> vector<32x128xf32>
    %cst_95 = arith.constant dense<0.000000e+00> : vector<32x128xf32>
    %197 = tpu.matmul %192, %11, %cst_95 {dimension_numbers = #tpu.dot_dimension_numbers<[1], [0], [0], [1], [0, 0, 1, 1], [], []>} : vector<32x32xf32>, vector<32x128xf32>, vector<32x128xf32> -> vector<32x128xf32>
    %198 = arith.mulf %197, %196 : vector<32x128xf32>
    %cst_96 = arith.constant dense<0.000000e+00> : vector<32x4xf32>
    %199 = tpu.matmul %198, %9, %cst_96 {dimension_numbers = #tpu.dot_dimension_numbers<[1], [0], [0], [1], [0, 0, 1, 1], [], []>} : vector<32x128xf32>, vector<128x4xf32>, vector<32x4xf32> -> vector<32x4xf32>
    %200 = vector.broadcast %195 : vector<32x1xf32> to vector<32x4xf32>
    %201 = arith.addf %199, %200 : vector<32x4xf32>
    %cst_97 = arith.constant 0.000000e+00 : f32
    %202 = vector.broadcast %cst_97 : f32 to vector<32x4xf32>
    %203 = arith.cmpf oge, %201, %202 : vector<32x4xf32>
    %cst_98 = arith.constant 0.00999999977 : f32
    %204 = vector.broadcast %cst_98 : f32 to vector<32x4xf32>
    %205 = arith.mulf %204, %201 : vector<32x4xf32>
    %206 = arith.select %203, %201, %205 : vector<32x4xi1>, vector<32x4xf32>
    %cst_99 = arith.constant dense<0xFF800000> : vector<4xf32>
    %207 = vector.multi_reduction <maximumf>, %206, %cst_99 [0] : vector<32x4xf32> to vector<4xf32>
    %208 = vector.shape_cast %207 : vector<4xf32> to vector<1x4xf32>
    %209 = vector.broadcast %208 : vector<1x4xf32> to vector<32x4xf32>
    %210 = arith.subf %206, %209 : vector<32x4xf32>
    %211 = math.exp %210 : vector<32x4xf32>
    %212 = arith.truncf %211 : vector<32x4xf32> to vector<32x4xbf16>
    %cst_100 = arith.constant dense<0.000000e+00> : vector<16x4xf32>
    %213 = tpu.matmul %7, %212, %cst_100 {dimension_numbers = #tpu.dot_dimension_numbers<[0], [0], [1], [1], [0, 1, 1, 1], [], []>} : vector<32x16xbf16>, vector<32x4xbf16>, vector<16x4xf32> -> vector<16x4xf32>
    %cst_101 = arith.constant 1.000000e-30 : f32
    %214 = vector.broadcast %cst_101 : f32 to vector<16x4xf32>
    %215 = arith.addf %213, %214 : vector<16x4xf32>
    %216 = tpu.reciprocal %215 {approx = true} : vector<16x4xf32> -> vector<16x4xf32>
    %217 = arith.truncf %216 : vector<16x4xf32> to vector<16x4xbf16>
    %cst_102 = arith.constant dense<0.000000e+00> : vector<32x4xf32>
    %218 = tpu.matmul %7, %217, %cst_102 {dimension_numbers = #tpu.dot_dimension_numbers<[1], [0], [0], [1], [0, 0, 1, 1], [], []>} : vector<32x16xbf16>, vector<16x4xbf16>, vector<32x4xf32> -> vector<32x4xf32>
    %219 = arith.mulf %211, %218 : vector<32x4xf32>
    %cst_103 = arith.constant dense<0.000000e+00> : vector<32xf32>
    %220 = vector.multi_reduction <add>, %219, %cst_103 [1] : vector<32x4xf32> to vector<32xf32>
    %221 = vector.shape_cast %220 : vector<32xf32> to vector<32x1xf32>
    %cst_104 = arith.constant 2.500000e-01 : f32
    %222 = vector.broadcast %cst_104 : f32 to vector<32x1xf32>
    %223 = arith.mulf %221, %222 : vector<32x1xf32>
    %224 = arith.mulf %191, %223 : vector<32x1xf32>
    %225 = arith.truncf %224 : vector<32x1xf32> to vector<32x1xbf16>
    %cst_105 = arith.constant dense<0.000000e+00> : vector<16x1xf32>
    %226 = tpu.matmul %8, %225, %cst_105 {dimension_numbers = #tpu.dot_dimension_numbers<[0], [0], [1], [1], [0, 1, 1, 1], [], []>} : vector<32x16xbf16>, vector<32x1xbf16>, vector<16x1xf32> -> vector<16x1xf32>
    %cst_106 = arith.constant 0.000000e+00 : f32
    %227 = vector.broadcast %cst_106 : f32 to vector<16x29xf32>
    %228 = tpu.concatenate %58, %91, %124, %146, %186, %226, %227 in 1 : vector<16x32xf32>, vector<16x32xf32>, vector<16x32xf32>, vector<16x1xf32>, vector<16x1xf32>, vector<16x1xf32>, vector<16x29xf32> -> vector<16x128xf32>
    %c0_107 = arith.constant 0 : index
    %c0_108 = arith.constant 0 : index
    %229 = vector.load %arg14[%c0_107, %c0_108] : memref<16x128xf32, #tpu.memory_space<vmem>>, vector<16x128xf32>
    tpu.vector_store %arg14[%c0_107, %c0_108], %228 {strides = array<i32>} : memref<16x128xf32, #tpu.memory_space<vmem>>, vector<16x128xf32>,
    %cst_109 = arith.constant 0.000000e+00 : f32
    %230 = vector.broadcast %cst_109 : f32 to vector<32x126xf32>
    %231 = tpu.concatenate %183, %223, %230 in 1 : vector<32x1xf32>, vector<32x1xf32>, vector<32x126xf32> -> vector<32x128xf32>
    %c0_110 = arith.constant 0 : index
    %c0_111 = arith.constant 0 : index
    %232 = vector.load %arg15[%c0_110, %c0_111] : memref<32x128xf32, #tpu.memory_space<vmem>>, vector<32x128xf32>
    tpu.vector_store %arg15[%c0_110, %c0_111], %231 {strides = array<i32>} : memref<32x128xf32, #tpu.memory_space<vmem>>, vector<32x128xf32>,
    return
  }
}

</mosaic_0001>

<bundles_post_ra>
// kernel: tile.9
= control target key start
LH: loop header
LB: loop body
LE: loop exit
PB: predicated region body
PF: predicated region fallthrough
CT: control target
= control target key end

     0   :  { %vm163_vm0 = vcmask 1047556   ;;  %s399_s10 = smov 96   ;;  %vm165_vm1 = vcmask 261120   ;;  %s401_s21 = smov 32   ;;  %vm202_vm2 = vcmask 1048320   ;;  %vm245_vm3 = vcmask 785920   ;;  %s580_s0 = inlined_call_operand.vmem [shape: f32[32,4,32], index: 0, kind: input, shape index: {}]   ;;  %s581_s1 = inlined_call_operand.vmem [shape: f32[32,128], index: 1, kind: output, shape index: {}]  }
   0x1   :  { %v377_v0 = vld [vmem:[%s580_s0 + $0x1c] sm:$0xf]  ;;  %v378_v1 = vld [vmem:[%s580_s0 + $0x18] sm:$0xf]  ;;  %v379_v2 = vld [vmem:[%s580_s0 + $0x14] sm:$0xf] }
   0x2   :  { %129 = vst [vmem:[#allocation0 + $0x38] sm:$0xf] %v377_v0  ;;  %134 = vst [vmem:[#allocation0 + $0x30] sm:$0xf] %v378_v1  ;;  %v380_v3 = vld [vmem:[%s580_s0 + $0x10] sm:$0xf] }
   0x3   :  { %139 = vst [vmem:[#allocation0 + $0x28] sm:$0xf] %v379_v2  ;;  %v381_v4 = vld [vmem:[%s580_s0 + $0xc] sm:$0xf]  ;;  %v382_v5 = vld [vmem:[%s580_s0 + $0x8] sm:$0xf] }
   0x4   :  { %144 = vst [vmem:[#allocation0 + $0x20] sm:$0xf] %v380_v3  ;;  %149 = vst [vmem:[#allocation0 + $0x18] sm:$0xf] %v381_v4  ;;  %v383_v6 = vld [vmem:[%s580_s0 + $0x4] sm:$0xf] }
   0x5   :  { %154 = vst [vmem:[#allocation0 + $0x10] sm:$0xf] %v382_v5  ;;  %v159_v7 = vld [vmem:[%s580_s0] sm:$0xf]  ;;  %158 = vst [vmem:[#allocation0 + $0x8] sm:$0xf] %v383_v6 }
   0x6   :  { %160 = vst [vmem:[#allocation0] sm:$0xf] %v159_v7  ;;  %v361_v8 = vld [vmem:[%s580_s0 + $0x5c] sm:$0xf]  ;;  %v362_v9 = vld [vmem:[%s580_s0 + $0x58] sm:$0xf] }
   0x7   :  { %v363_v10 = vld [vmem:[%s580_s0 + $0x54] sm:$0xf]  ;;  %49 = vst [vmem:[#allocation0 + $0xb8] sm:$0xf] %v361_v8  ;;  %54 = vst [vmem:[#allocation0 + $0xb0] sm:$0xf] %v362_v9 }
   0x8   :  { %59 = vst [vmem:[#allocation0 + $0xa8] sm:$0xf] %v363_v10  ;;  %v364_v11 = vld [vmem:[%s580_s0 + $0x50] sm:$0xf]  ;;  %v365_v12 = vld [vmem:[%s580_s0 + $0x4c] sm:$0xf] }
   0x9   :  { %v366_v13 = vld [vmem:[%s580_s0 + $0x48] sm:$0xf]  ;;  %64 = vst [vmem:[#allocation0 + $0xa0] sm:$0xf] %v364_v11  ;;  %69 = vst [vmem:[#allocation0 + $0x98] sm:$0xf] %v365_v12 }
   0xa   :  { %74 = vst [vmem:[#allocation0 + $0x90] sm:$0xf] %v366_v13  ;;  %v367_v14 = vld [vmem:[%s580_s0 + $0x44] sm:$0xf]  ;;  %v368_v15 = vld [vmem:[%s580_s0 + $0x40] sm:$0xf] }
   0xb   :  { %v369_v16 = vld [vmem:[%s580_s0 + $0x3c] sm:$0xf]  ;;  %79 = vst [vmem:[#allocation0 + $0x88] sm:$0xf] %v367_v14  ;;  %84 = vst [vmem:[#allocation0 + $0x80] sm:$0xf] %v368_v15 }
   0xc   :  { %89 = vst [vmem:[#allocation0 + $0x78] sm:$0xf] %v369_v16  ;;  %v370_v17 = vld [vmem:[%s580_s0 + $0x38] sm:$0xf]  ;;  %v371_v18 = vld [vmem:[%s580_s0 + $0x34] sm:$0xf] }
   0xd   :  { %v372_v19 = vld [vmem:[%s580_s0 + $0x30] sm:$0xf]  ;;  %94 = vst [vmem:[#allocation0 + $0x70] sm:$0xf] %v370_v17  ;;  %99 = vst [vmem:[#allocation0 + $0x68] sm:$0xf] %v371_v18 }
   0xe   :  { %104 = vst [vmem:[#allocation0 + $0x60] sm:$0xf] %v372_v19  ;;  %v373_v20 = vld [vmem:[%s580_s0 + $0x2c] sm:$0xf]  ;;  %v374_v21 = vld [vmem:[%s580_s0 + $0x28] sm:$0xf] }
   0xf   :  { %v375_v22 = vld [vmem:[%s580_s0 + $0x24] sm:$0xf]  ;;  %109 = vst [vmem:[#allocation0 + $0x58] sm:$0xf] %v373_v20  ;;  %114 = vst [vmem:[#allocation0 + $0x50] sm:$0xf] %v374_v21 }
  0x10   :  { %119 = vst [vmem:[#allocation0 + $0x48] sm:$0xf] %v375_v22  ;;  %v376_v23 = vld [vmem:[%s580_s0 + $0x20] sm:$0xf]  ;;  %v353_v24 = vld [vmem:[%s580_s0 + $0x7c] sm:$0xf] }
  0x11   :  { %v354_v25 = vld [vmem:[%s580_s0 + $0x78] sm:$0xf]  ;;  %124 = vst [vmem:[#allocation0 + $0x40] sm:$0xf] %v376_v23  ;;  %9 = vst [vmem:[#allocation0 + $0xf8] sm:$0xf] %v353_v24 }
  0x12   :  { %v197_v26 = vld [vmem:[#allocation0 + $0x3] ss:$8 sm:$0xf0]   ;;  %14 = vst [vmem:[#allocation0 + $0xf0] sm:$0xf] %v354_v25  ;;  %vm288_vm4 = vcmask 523520  }
  0x13   :  { %v355_v27 = vld [vmem:[%s580_s0 + $0x74] sm:$0xf]  ;;  %v195_v28 = vld [vmem:[#allocation0 + $0x3] ss:$8 sm:$0xf]  }
  0x14   :  { %19 = vst [vmem:[#allocation0 + $0xe8] sm:$0xf] %v355_v27  ;;  %v356_v29 = vld [vmem:[%s580_s0 + $0x70] sm:$0xf]  ;;  %v199_v30 = vsel %vm163_vm0, %v197_v26, %v195_v28  ;;  %v357_v31 = vld [vmem:[%s580_s0 + $0x6c] sm:$0xf] }
  0x15   :  { %24 = vst [vmem:[#allocation0 + $0xe0] sm:$0xf] %v356_v29  ;;  %v358_v32 = vld [vmem:[%s580_s0 + $0x68] sm:$0xf]  ;;  %v359_v33 = vld [vmem:[%s580_s0 + $0x64] sm:$0xf]  ;;  %200 = vrot.lane.b32.xlu0 %v199_v30, %s399_s10 }
  0x16   :  { %v218_v34 = vld [vmem:[#allocation0 + $0x83] ss:$8 sm:$0xf0]   ;;  %29 = vst [vmem:[#allocation0 + $0xd8] sm:$0xf] %v357_v31 }
  0x17   :  { %34 = vst [vmem:[#allocation0 + $0xd0] sm:$0xf] %v358_v32  ;;  %39 = vst [vmem:[#allocation0 + $0xc8] sm:$0xf] %v359_v33  ;;  %v360_v35 = vld [vmem:[%s580_s0 + $0x60] sm:$0xf] }
  0x18   :  { %v216_v36 = vld [vmem:[#allocation0 + $0x83] ss:$8 sm:$0xf]   ;;  %44 = vst [vmem:[#allocation0 + $0xc0] sm:$0xf] %v360_v35  ;;  %s400_s0 = smov 64  }
  0x19   :  { %v220_v37 = vsel %vm163_vm0, %v218_v34, %v216_v36  ;;  %v207_v38 = vld [vmem:[#allocation0 + $0x43] ss:$8 sm:$0xf0]   ;;  %v238_v39 = vld [vmem:[#allocation0 + $0x2] ss:$8 sm:$0xf]  }
  0x1a   :  { %221 = vrot.lane.b32.xlu1 %v220_v37, %s399_s10  ;;  %v205_v40 = vld [vmem:[#allocation0 + $0x43] ss:$8 sm:$0xf]   ;;  %v240_v41 = vld [vmem:[#allocation0 + $0x2] ss:$8 sm:$0xf0]  }
  0x1b   :  { %v209_v42 = vsel %vm163_vm0, %v207_v38, %v205_v40  ;;  %v250_v44 = vld [vmem:[#allocation0 + $0x42] ss:$8 sm:$0xf0]   ;;  %v242_v45 = vsel %vm163_vm0, %v240_v41, %v238_v39  ;;  %v281_v52 = vld [vmem:[#allocation0 + $0x1] ss:$8 sm:$0xf]  }
  0x1c   :  { %210 = vrot.lane.b32.xlu0 %v209_v42, %s399_s10  ;;  %v229_v43 = vld [vmem:[#allocation0 + $0xc3] ss:$8 sm:$0xf0]   ;;  %v248_v46 = vld [vmem:[#allocation0 + $0x42] ss:$8 sm:$0xf]  }
  0x1d   :  { %v259_v47 = vld [vmem:[#allocation0 + $0x82] ss:$8 sm:$0xf]   ;;  %v252_v53 = vsel %vm163_vm0, %v250_v44, %v248_v46  ;;  %v283_v55 = vld [vmem:[#allocation0 + $0x1] ss:$8 sm:$0xf0]  }
  0x1e   :  { %v261_v49 = vld [vmem:[#allocation0 + $0x82] ss:$8 sm:$0xf0]   ;;  %v161_v56 = vld [vmem:[#allocation0] ss:$8 sm:$0xf]   ;;  %v285_v4 = vsel %vm163_vm0, %v283_v55, %v281_v52 }
  0x1f   :  { %v227_v48 = vld [vmem:[#allocation0 + $0xc3] ss:$8 sm:$0xf]   ;;  %v272_v51 = vld [vmem:[#allocation0 + $0xc2] ss:$8 sm:$0xf0]   ;;  %v263_v54 = vsel %vm163_vm0, %v261_v49, %v259_v47 }
  0x20   :  { %v231_v50 = vsel %vm163_vm0, %v229_v43, %v227_v48  ;;  %243 = vrot.lane.b32.xlu0 %v242_v45, %s400_s0  ;;  %v270_v57 = vld [vmem:[#allocation0 + $0xc2] ss:$8 sm:$0xf]   ;;  %v162_v58 = vld [vmem:[#allocation0] ss:$8 sm:$0xf0]  }
  0x21   :  { %232 = vrot.lane.b32.xlu1 %v231_v50, %s399_s10  ;;  %v164_v59 = vsel %vm163_vm0, %v162_v58, %v161_v56  ;;  %v177_v60 = vld [vmem:[#allocation0 + $0x80] ss:$8 sm:$0xf]   ;;  %v291_v62 = vld [vmem:[#allocation0 + $0x41] ss:$8 sm:$0xf]   ;;  %v274_v3 = vsel %vm163_vm0, %v272_v51, %v270_v57 }
  0x22   :  { %v179_v61 = vld [vmem:[#allocation0 + $0x80] ss:$8 sm:$0xf0]   ;;  %v293_v63 = vld [vmem:[#allocation0 + $0x41] ss:$8 sm:$0xf0]  }
  0x23   :  { %166 = vst.msk [vmem:[%s581_s1] sm:$0xff] %vm165_vm1, %v164_v59   ;;  %v181_v0 = vsel %vm163_vm0, %v179_v61, %v177_v60  ;;  %v168_v1 = vld [vmem:[#allocation0 + $0x40] ss:$8 sm:$0xf]   ;;  %v295_v11 = vsel %vm163_vm0, %v293_v63, %v291_v62 }
  0x24   :  { %264 = vrot.lane.b32.xlu0 %v263_v54, %s400_s0  ;;  %v170_v2 = vld [vmem:[#allocation0 + $0x40] ss:$8 sm:$0xf0]   ;;  %385 = vst.msk [vmem:[%s581_s1 + $0x10] sm:$0xff] %vm165_vm1, %v181_v0  }
  0x25   :  { %253 = vrot.lane.b32.xlu1 %v252_v53, %s400_s0  ;;  %v172_v5 = vsel %vm163_vm0, %v170_v2, %v168_v1  ;;  %v186_v6 = vld [vmem:[#allocation0 + $0xc0] ss:$8 sm:$0xf]   ;;  %v302_v8 = vld [vmem:[#allocation0 + $0x81] ss:$8 sm:$0xf]  }
  0x26   :  { %v188_v7 = vld [vmem:[#allocation0 + $0xc0] ss:$8 sm:$0xf0]   ;;  %v304_v9 = vld [vmem:[#allocation0 + $0x81] ss:$8 sm:$0xf0]  }
  0x27   :  { %384 = vst.msk [vmem:[%s581_s1 + $0x8] sm:$0xff] %vm165_vm1, %v172_v5   ;;  %v190_v10 = vsel %vm163_vm0, %v188_v7, %v186_v6  ;;  %v306_v12 = vsel %vm163_vm0, %v304_v9, %v302_v8  ;;  %v313_v13 = vld [vmem:[#allocation0 + $0xc1] ss:$8 sm:$0xf]  }
  0x28   :  { %386 = vst.msk [vmem:[%s581_s1 + $0x18] sm:$0xff] %vm165_vm1, %v190_v10   ;;  %286 = vrot.lane.b32.xlu0 %v285_v4, %s401_s21  ;;  %v315_v14 = vld [vmem:[#allocation0 + $0xc1] ss:$8 sm:$0xf0]  }
  0x29   :  { %275 = vrot.lane.b32.xlu1 %v274_v3, %s400_s0  ;;  %v317_v15 = vsel %vm163_vm0, %v315_v14, %v313_v13 }
  0x2c   :  { %307 = vrot.lane.b32.xlu0 %v306_v12, %s401_s21 }
  0x2d   :  { %296 = vrot.lane.b32.xlu1 %v295_v11, %s401_s21 }
  0x31   :  { %318 = vrot.lane.b32.xlu1 %v317_v15, %s401_s21 }
  0x87   :  { %v201_v16 = vpop.permute.xlu0 %200  }
  0x88   :  { %203 = vst.msk [vmem:[%s581_s1] sm:$0xff] %vm202_vm2, %v201_v16  }
  0x8c   :  { %v222_v17 = vpop.permute.xlu1 %221  }
  0x8d   :  { %388 = vst.msk [vmem:[%s581_s1 + $0x10] sm:$0xff] %vm202_vm2, %v222_v17  }
  0x8e   :  { %v211_v18 = vpop.permute.xlu0 %210  }
  0x8f   :  { %387 = vst.msk [vmem:[%s581_s1 + $0x8] sm:$0xff] %vm202_vm2, %v211_v18  }
  0x92   :  { %v244_v20 = vpop.permute.xlu0 %243  }
  0x93   :  { %v233_v19 = vpop.permute.xlu1 %232   ;;  %246 = vst.msk [vmem:[%s581_s1] sm:$0xff] %vm245_vm3, %v244_v20  }
  0x94   :  { %389 = vst.msk [vmem:[%s581_s1 + $0x18] sm:$0xff] %vm202_vm2, %v233_v19  }
  0x96   :  { %v265_v22 = vpop.permute.xlu0 %264  }
  0x97   :  { %v254_v21 = vpop.permute.xlu1 %253   ;;  %391 = vst.msk [vmem:[%s581_s1 + $0x10] sm:$0xff] %vm245_vm3, %v265_v22  }
  0x98   :  { %390 = vst.msk [vmem:[%s581_s1 + $0x8] sm:$0xff] %vm245_vm3, %v254_v21  }
  0x9a   :  { %v287_v24 = vpop.permute.xlu0 %286  }
  0x9b   :  { %v276_v23 = vpop.permute.xlu1 %275   ;;  %289 = vst.msk [vmem:[%s581_s1] sm:$0xff] %vm288_vm4, %v287_v24  }
  0x9c   :  { %392 = vst.msk [vmem:[%s581_s1 + $0x18] sm:$0xff] %vm245_vm3, %v276_v23  }
  0x9e   :  { %v308_v26 = vpop.permute.xlu0 %307  }
  0x9f   :  { %v297_v25 = vpop.permute.xlu1 %296   ;;  %394 = vst.msk [vmem:[%s581_s1 + $0x10] sm:$0xff] %vm288_vm4, %v308_v26  }
  0xa0   :  { %393 = vst.msk [vmem:[%s581_s1 + $0x8] sm:$0xff] %vm288_vm4, %v297_v25  }
  0xa3   :  { %v319_v27 = vpop.permute.xlu1 %318  }
  0xa4   :  { %395 = vst.msk [vmem:[%s581_s1 + $0x18] sm:$0xff] %vm288_vm4, %v319_v27  }

// kernel: attnio_forward.1
= control target key start
LH: loop header
LB: loop body
LE: loop exit
PB: predicated region body
PF: predicated region fallthrough
CT: control target
= control target key end

     0   :  { %vm163_vm0 = vcmask 261120   ;;  %v5208_v2 = vmov 0   ;;  %v6591_v13 = vmov 0.0   ;;  %v6589_v21 = vlaneseq  ;;  %s6573_s5 = inlined_call_operand.vmem [shape: f32[32,32], index: 5, kind: input, shape index: {}]   ;;  %s6574_s1 = inlined_call_operand.vmem [shape: f32[16,32], index: 1, kind: input, shape index: {}]   ;;  %s6575_s0 = inlined_call_operand.vmem [shape: s32[64,1], index: 0, kind: input, shape index: {}]   ;;  %s6576_s2 = inlined_call_operand.vmem [shape: f32[32,32], index: 2, kind: input, shape index: {}]   ;;  %s6577_s8 = inlined_call_operand.vmem [shape: f32[32,32], index: 8, kind: input, shape index: {}]   ;;  %s6578_s4 = inlined_call_operand.vmem [shape: f32[1,32], index: 4, kind: input, shape index: {}]   ;;  %s6579_s13 = inlined_call_operand.vmem [shape: f32[32,128], index: 13, kind: input, shape index: {}]   ;;  %s6580_s6 = inlined_call_operand.vmem [shape: f32[32,128], index: 6, kind: input, shape index: {}]   ;;  %s6581_s11 = inlined_call_operand.vmem [shape: f32[128,4], index: 11, kind: input, shape index: {}]   ;;  %s6582_s12 = inlined_call_operand.vmem [shape: f32[4,128], index: 12, kind: input, shape index: {}]   ;;  %s6583_s7 = inlined_call_operand.vmem [shape: f32[128,32], index: 7, kind: input, shape index: {}]   ;;  %s6584_s9 = inlined_call_operand.vmem [shape: f32[32,32], index: 9, kind: input, shape index: {}]   ;;  %s6585_s3 = inlined_call_operand.vmem [shape: f32[16,1], index: 3, kind: input, shape index: {}]   ;;  %s6586_s10 = inlined_call_operand.vmem [shape: f32[32,128], index: 10, kind: input, shape index: {}]   ;;  %s6587_s15 = inlined_call_operand.vmem [shape: f32[32,128], index: 15, kind: output, shape index: {1}]   ;;  %s6588_s14 = inlined_call_operand.vmem [shape: f32[16,128], index: 14, kind: output, shape index: {0}]  }
   0x1   :  { %v162_v0 = vld [vmem:[%s6573_s5 + $0x18] sm:$0xff]  ;;  %v161_v1 = vld [vmem:[%s6573_s5 + $0x10] sm:$0xff]  ;;  %5101 = vset.pattern.permute.xlu1 %v5208_v2  ;;  %5100 = vset.pattern.permute.xlu0 %v5208_v2  ;;  %v157_v3 = vld [vmem:[%s6574_s1] sm:$0xff]  ;;  %vm429_vm5 = vcmask 130048   ;;  %vm5210_vm10 = vmmov 0   ;;  %vm806_vm14 = vcmask 31744  }
   0x2   :  { %4426 = vmatprep.subr.mxu0 %v162_v0  ;;  %4437 = vmatprep.subr.mxu1 %v162_v0  ;;  %v160_v4 = vld [vmem:[%s6573_s5 + $0x8] sm:$0xff]  ;;  %v54_v5 = vld [vmem:[%s6575_s0 + $0x10] sm:$0xff]  ;;  %v52_v6 = vld [vmem:[%s6575_s0] sm:$0xff]  ;;  %v51_v22 = vand.u32 127, %v6589_v21 }
   0x3   :  { %4427 = vmatpush3.msra.mxu0 %v162_v0  ;;  %4434 = vmatprep.mubr.msk.f32.mxu0 %vm163_vm0, %v157_v3  ;;  %v159_v7 = vld [vmem:[%s6573_s5] sm:$0xff]  ;;  %v55_v8 = vld [vmem:[%s6575_s0 + $0x18] sm:$0xff]  ;;  %v53_v9 = vld [vmem:[%s6575_s0 + $0x8] sm:$0xff]  ;;  %s5215_s5 = smov 98  }
   0x4   :  { %4428 = vmatprep.subr.mxu0 %v161_v1  ;;  %67 = vperm.xlu1 %5101, %v54_v5   ;;  %v158_v10 = vld [vmem:[%s6574_s1 + $0x8] sm:$0xff]  ;;  %v56_v12 = vld [vmem:[%s6575_s0 + $0x20] sm:$0xff]  ;;  %v59_v16 = vld [vmem:[%s6575_s0 + $0x38] sm:$0xff] }
   0x5   :  { %4429 = vmatpush3.msra.mxu0 %v161_v1  ;;  %61 = vperm.xlu0 %5100, %v52_v6   ;;  %v57_v11 = vld [vmem:[%s6575_s0 + $0x28] sm:$0xff]  ;;  %v245_v14 = vld [vmem:[%s6576_s2] sm:$0xff]  ;;  %v58_v17 = vld [vmem:[%s6575_s0 + $0x30] sm:$0xff] }
   0x6   :  { %4430 = vmatprep.subr.mxu0 %v160_v4  ;;  %4438 = vmatpush3.msra.mxu1 %v162_v0  ;;  %v246_v15 = vld [vmem:[%s6576_s2 + $0x8] sm:$0xff]  ;;  %v247_v18 = vld [vmem:[%s6576_s2 + $0x10] sm:$0xff]  ;;  %v248_v19 = vld [vmem:[%s6576_s2 + $0x18] sm:$0xff]  ;;  %s5213_s2 = smov 64  }
   0x7   :  { %4431 = vmatpush3.msra.mxu0 %v160_v4  ;;  %4439 = vmatprep.subr.mxu1 %v161_v1  ;;  %v350_v20 = vld [vmem:[%s6577_s8 + $0x18] sm:$0xff]  ;;  %v349_v41 = vld [vmem:[%s6577_s8 + $0x10] sm:$0xff]  ;;  %v348_v44 = vld [vmem:[%s6577_s8 + $0x8] sm:$0xff] }
   0x8   :  { %4432 = vmatprep.subr.mxu0 %v159_v7  ;;  %70 = vperm.xlu1 %5101, %v55_v8   ;;  %v347_v45 = vld [vmem:[%s6577_s8] sm:$0xff]  ;;  %v5408_v50 = vld [vmem:[%s6579_s13 + $0x18] sm:$0xff]  ;;  %v5415_v51 = vld [vmem:[%s6579_s13 + $0x10] sm:$0xff] }
   0x9   :  { %4433 = vmatpush3.msra.mxu0 %v159_v7  ;;  %64 = vperm.xlu0 %5100, %v53_v9   ;;  %v346_v46 = vld [vmem:[%s6578_s4] sm:$0x1]  ;;  %v5422_v52 = vld [vmem:[%s6579_s13 + $0x8] sm:$0xff]  ;;  %v5436_v54 = vld [vmem:[%s6580_s6 + $0x18] sm:$0xff] }
   0xa   :  { %4435 = vmatmul.mubr.msk.f32.vlgmr.msra.gmra.mxu0 %vm163_vm0, %v158_v10  ;;  %4440 = vmatpush3.msra.mxu1 %v161_v1  ;;  %v5429_v53 = vld [vmem:[%s6579_s13] sm:$0xff]  ;;  %v5442_v55 = vld [vmem:[%s6581_s11 + $0x78] sm:$0xff]  ;;  %v5447_v56 = vld [vmem:[%s6581_s11 + $0x70] sm:$0xff] }
   0xb   :  { %4441 = vmatprep.subr.mxu1 %v160_v4  ;;  %4451 = vmatprep.subr.mxu0 %v6591_v13  ;;  %v5454_v57 = vld [vmem:[%s6581_s11 + $0x68] sm:$0xff]  ;;  %v5461_v58 = vld [vmem:[%s6581_s11 + $0x60] sm:$0xff]  ;;  %v5468_v59 = vld [vmem:[%s6581_s11 + $0x58] sm:$0xff] }
   0xc   :  { %76 = vperm.xlu1 %5101, %v57_v11   ;;  %4442 = vmatpush3.msra.mxu1 %v160_v4  ;;  %v5475_v60 = vld [vmem:[%s6581_s11 + $0x50] sm:$0xff]  ;;  %v5482_v61 = vld [vmem:[%s6581_s11 + $0x48] sm:$0xff]  ;;  %v5489_v62 = vld [vmem:[%s6581_s11 + $0x40] sm:$0xff] }
   0xd   :  { %73 = vperm.xlu0 %5100, %v56_v12   ;;  %4443 = vmatprep.subr.mxu1 %v159_v7  ;;  %v5496_v63 = vld [vmem:[%s6581_s11 + $0x38] sm:$0xff] }
   0xe   :  { %4444 = vmatpush3.msra.mxu1 %v159_v7  ;;  %4445 = vmatprep.mubr.msk.f32.mxu1 %vm163_vm0, %v245_v14 }
   0xf   :  { %4446 = vmatmul.mubr.msk.f32.vlgmr.msra.gmra.mxu1 %vm163_vm0, %v246_v15  ;;  %4452 = vmatpush3.msra.mxu0 %v350_v20  ;;  %v5519_v15 = vld [vmem:[%s6580_s6 + $0x10] sm:$0xff]  ;;  %v5535_v20 = vld [vmem:[%s6580_s6] sm:$0xff] }
  0x10   :  { %82 = vperm.xlu1 %5101, %v59_v16   ;;  %4448 = vmatprep.mubr.msk.f32.mxu1 %vm163_vm0, %v247_v18 }
  0x11   :  { %79 = vperm.xlu0 %5100, %v58_v17   ;;  %4453 = vmatprep.subr.mxu0 %v6591_v13  ;;  %v5527_v17 = vld [vmem:[%s6580_s6 + $0x8] sm:$0xff] }
  0x12   :  { %4454 = vmatpush3.msra.mxu0 %v349_v41  ;;  %4459 = vmatprep.mubr.msk.f32.mxu0 %vm5210_vm10, %v6591_v13 }
  0x13   :  { %4449 = vmatmul.mubr.msk.f32.gmra.mxu1 %vm163_vm0, %v248_v19  ;;  %4455 = vmatprep.subr.mxu0 %v6591_v13 }
  0x14   :  { %4456 = vmatpush3.msra.mxu0 %v348_v44 }
  0x15   :  { %4457 = vmatprep.subr.mxu0 %v6591_v13 }
  0x16   :  { %4458 = vmatpush3.msra.mxu0 %v347_v45 }
  0x17   :  { %4460 = vmatmul.mubr.msk.f32.vlgmr.msra.gmra.mxu0 %vm163_vm0, %v346_v46  ;;  %4472 = vmatprep.subr.mxu0 %v5408_v50 }
  0x18   :  { %4473 = vmatpush3.msra.mxu0 %v5408_v50 }
  0x19   :  { %4474 = vmatprep.subr.mxu0 %v5415_v51 }
  0x1a   :  { %4475 = vmatpush3.msra.mxu0 %v5415_v51 }
  0x1b   :  { %4476 = vmatprep.subr.mxu0 %v5422_v52 }
  0x1c   :  { %4477 = vmatpush3.msra.mxu0 %v5422_v52 }
  0x1d   :  { %4478 = vmatprep.subr.mxu0 %v5429_v53 }
  0x1e   :  { %4479 = vmatpush3.msra.mxu0 %v5429_v53 }
  0x1f   :  { %4486 = vmatprep.subr.mxu0 %v5436_v54 }
  0x7f   :  { %v68_v23 = vpop.permute.xlu1 %67 }
  0x80   :  { %vm86_vm1 = vcmp.eq.s32.totalorder %v51_v22, %v68_v23  ;;  %v62_v24 = vpop.permute.xlu0 %61  ;;  %v5552_v23 = vld [vmem:[%s6581_s11 + $0x30] sm:$0xff] }
  0x81   :  { %vm84_vm2 = vcmp.eq.s32.totalorder %v51_v22, %v62_v24  ;;  %v3972_v25 = vsel %vm86_vm1, 1.0, %v6591_v13  ;;  %v5559_v24 = vld [vmem:[%s6581_s11 + $0x28] sm:$0xff]  ;;  %vm962_vm1 = vcmask 1043456  }
  0x82   :  { %v3970_v27 = vsel %vm84_vm2, 1.0, %v6591_v13 }
  0x83   :  { %v71_v26 = vpop.permute.xlu1 %70 }
  0x84   :  { %vm87_vm3 = vcmp.eq.s32.totalorder %v51_v22, %v71_v26  ;;  %v65_v28 = vpop.permute.xlu0 %64  ;;  %v5573_v26 = vld [vmem:[%s6581_s11 + $0x18] sm:$0xff] }
  0x85   :  { %v3973_v29 = vsel %vm87_vm3, 1.0, %v6591_v13  ;;  %vm85_vm4 = vcmp.eq.s32.totalorder %v51_v22, %v65_v28  ;;  %v5587_v28 = vld [vmem:[%s6581_s11 + $0x8] sm:$0xff] }
  0x86   :  { %v5365_v30 = vpack.c.bf16 %v3973_v29, %v3972_v25  ;;  %v3971_v31 = vsel %vm85_vm4, 1.0, %v6591_v13  ;;  %v5566_v25 = vld [vmem:[%s6581_s11 + $0x20] sm:$0xff] }
  0x87   :  { %v5368_v32 = vpack.c.bf16 %v3971_v31, %v3970_v27  ;;  %v77_v33 = vpop.permute.xlu1 %76  ;;  %v5580_v27 = vld [vmem:[%s6581_s11 + $0x10] sm:$0xff]  ;;  %v5594_v29 = vld [vmem:[%s6581_s11] sm:$0xff] }
  0x88   :  { %vm89_vm6 = vcmp.eq.s32.totalorder %v51_v22, %v77_v33  ;;  %v74_v34 = vpop.permute.xlu0 %73 }
  0x89   :  { %v3975_v35 = vsel %vm89_vm6, 1.0, %v6591_v13  ;;  %vm88_vm7 = vcmp.eq.s32.totalorder %v51_v22, %v74_v34  ;;  %4464 = vmatprep.mubr.msk.bf16.mxu1 %vm429_vm5, %v5368_v32 }
  0x8a   :  { %v3974_v36 = vsel %vm88_vm7, 1.0, %v6591_v13 }
  0x8b   :  { %v5374_v37 = vpack.c.bf16 %v3975_v35, %v3974_v36  ;;  %v83_v38 = vpop.permute.xlu1 %82 }
  0x8c   :  { %vm91_vm8 = vcmp.eq.s32.totalorder %v51_v22, %v83_v38  ;;  %v80_v39 = vpop.permute.xlu0 %79 }
  0x8d   :  { %v3977_v40 = vsel %vm91_vm8, 1.0, %v6591_v13  ;;  %vm90_vm9 = vcmp.eq.s32.totalorder %v51_v22, %v80_v39  ;;  %834 = vxpose.xlu0.c.b16.start [1/2] (short) (narrow) %v5374_v37, 16 }
  0x8e   :  { %v3976_v42 = vsel %vm90_vm9, 1.0, %v6591_v13 }
  0x8f   :  { %v5382_v43 = vpack.c.bf16 %v3977_v40, %v3976_v42 }
  0x91   :  { %835 = vxpose.xlu0.c.b16.end [2/2] (short) (narrow) %v5382_v43, 16 }
  0xca   :  { %v4436_v47 = vpop.f32.mrf.mxu0 }
  0xcc   :  { %v236_v48 = vpop.f32.mrf.mxu0 }
  0xcd   :  { %v428_v49 = vpack.c.bf16 %v4436_v47, %v236_v48 }
  0xcf   :  { %4462 = vmatprep.subr.bf16.mxu1 %v428_v49  ;;  %v5504_v2 = vpop.f32.mrf.mxu1 }
  0xd0   :  { %4463 = vmatpush3.bf16.msra.mxu1 %v428_v49 }
  0xd1   :  { %4500 = vmatprep.subr.mxu1 %v5442_v55  ;;  %v5506_v3 = vpop.f32.mrf.mxu1 }
  0xd3   :  { %4465 = vmatmul.mubr.msk.bf16.vlgmr.msra.gmra.mxu1 %vm429_vm5, %v5365_v30  ;;  %v5508_v4 = vpop.f32.mrf.mxu1 }
  0xd4   :  { %4468 = vmatprep.mubr.msk.bf16.mxu1 %vm429_vm5, %v5374_v37  ;;  %4501 = vmatpush3.msra.mxu1 %v5442_v55 }
  0xd5   :  { %4502 = vmatprep.subr.mxu1 %v5447_v56  ;;  %v5510_v5 = vpop.f32.mrf.mxu1 }
  0xd6   :  { %4503 = vmatpush3.msra.mxu1 %v5447_v56 }
  0xd7   :  { %4504 = vmatprep.subr.mxu1 %v5454_v57  ;;  %v5502_v0 = vpop.f32.mrf.mxu0 }
  0xd8   :  { %4505 = vmatpush3.msra.mxu1 %v5454_v57 }
  0xd9   :  { %4506 = vmatprep.subr.mxu1 %v5461_v58  ;;  %v4461_v1 = vpop.f32.mrf.mxu0 }
  0xda   :  { %4507 = vmatpush3.msra.mxu1 %v5461_v58 }
  0xdb   :  { %4469 = vmatmul.mubr.msk.bf16.gmra.mxu1 %vm429_vm5, %v5382_v43  ;;  %4508 = vmatprep.subr.mxu1 %v5468_v59 }
  0xdc   :  { %4509 = vmatpush3.msra.mxu1 %v5468_v59 }
  0xdd   :  { %4510 = vmatprep.subr.mxu1 %v5475_v60 }
  0xde   :  { %4511 = vmatpush3.msra.mxu1 %v5475_v60 }
  0xdf   :  { %4512 = vmatprep.subr.mxu1 %v5482_v61 }
  0xe0   :  { %4513 = vmatpush3.msra.mxu1 %v5482_v61 }
  0xe1   :  { %4514 = vmatprep.subr.mxu1 %v5489_v62 }
  0xe2   :  { %4515 = vmatpush3.msra.mxu1 %v5489_v62 }
  0xe3   :  { %4516 = vmatprep.subr.mxu1 %v5496_v63 }
  0xe4   :  { %4517 = vmatpush3.msra.mxu1 %v5496_v63 }
  0xe5   :  { %4518 = vmatprep.subr.mxu1 %v5552_v23 }
  0xe6   :  { %4519 = vmatpush3.msra.mxu1 %v5552_v23 }
  0xe7   :  { %4520 = vmatprep.subr.mxu1 %v5559_v24 }
  0xe8   :  { %4521 = vmatpush3.msra.mxu1 %v5559_v24 }
  0xe9   :  { %4522 = vmatprep.subr.mxu1 %v5566_v25 }
  0xea   :  { %4523 = vmatpush3.msra.mxu1 %v5566_v25 }
  0xeb   :  { %4524 = vmatprep.subr.mxu1 %v5573_v26 }
  0xec   :  { %4525 = vmatpush3.msra.mxu1 %v5573_v26 }
  0xed   :  { %4526 = vmatprep.subr.mxu1 %v5580_v27 }
  0xee   :  { %4527 = vmatpush3.msra.mxu1 %v5580_v27 }
  0xef   :  { %4528 = vmatprep.subr.mxu1 %v5587_v28 }
  0xf0   :  { %4529 = vmatpush3.msra.mxu1 %v5587_v28 }
  0xf1   :  { %4530 = vmatprep.subr.mxu1 %v5594_v29 }
  0xf2   :  { %4531 = vmatpush3.msra.mxu1 %v5594_v29 }
  0xf3   :  { %4560 = vmatprep.subr.bf16.mxu1 %v6591_v13 }
 0x193   :  { %v4466_v6 = vpop.f32.mrf.mxu1 }
 0x194   :  { %v509_v12 = vadd.f32 %v4466_v6, %v5510_v5 }
 0x195   :  { %v476_v7 = vpop.f32.mrf.mxu1 }
 0x196   :  { %v507_v8 = vadd.f32 %v476_v7, %v5506_v3 }
 0x197   :  { %v4467_v9 = vpop.f32.mrf.mxu1 }
 0x198   :  { %4480 = vmatprep.mubr.msk.f32.mxu0 %vm163_vm0, %v507_v8  ;;  %v510_v18 = vadd.f32 %v4467_v9, %v5508_v4 }
 0x199   :  { %v479_v10 = vpop.f32.mrf.mxu1 }
 0x19a   :  { %v508_v11 = vadd.f32 %v5504_v2, %v479_v10 }
 0x19b   :  { %v4470_v14 = vpop.f32.mrf.mxu1 }
 0x19c   :  { %4481 = vmatmul.mubr.msk.f32.vlgmr.msra.gmra.mxu0 %vm163_vm0, %v508_v11 }
 0x19d   :  { %v492_v16 = vpop.f32.mrf.mxu1  ;;  %4483 = vmatprep.mubr.msk.f32.mxu0 %vm163_vm0, %v509_v12  ;;  %4487 = vmatpush3.msra.mxu0 %v5436_v54 }
 0x19e   :  { %4488 = vmatprep.subr.mxu0 %v5519_v15 }
 0x19f   :  { %v4471_v19 = vpop.f32.mrf.mxu1  ;;  %4489 = vmatpush3.msra.mxu0 %v5519_v15 }
 0x1a0   :  { %4484 = vmatmul.mubr.msk.f32.gmra.mxu0 %vm163_vm0, %v510_v18  ;;  %4490 = vmatprep.subr.mxu0 %v5527_v17 }
 0x1a1   :  { %4491 = vmatpush3.msra.mxu0 %v5527_v17  ;;  %4494 = vmatprep.mubr.msk.f32.mxu0 %vm163_vm0, %v492_v16  ;;  %v495_v22 = vpop.f32.mrf.mxu1 }
 0x1a2   :  { %4492 = vmatprep.subr.mxu0 %v5535_v20 }
 0x1a3   :  { %4493 = vmatpush3.msra.mxu0 %v5535_v20 }
 0x1a4   :  { %4495 = vmatmul.mubr.msk.f32.vlgmr.msra.gmra.mxu0 %vm163_vm0, %v495_v22  ;;  %4538 = vmatprep.subr.bf16.mxu0 %v6591_v13 }
 0x1a5   :  { %4497 = vmatprep.mubr.msk.f32.mxu0 %vm163_vm0, %v4470_v14 }
 0x1a8   :  { %4498 = vmatmul.mubr.msk.f32.gmra.mxu0 %vm163_vm0, %v4471_v19 }
 0x1a9   :  { %4542 = vmatprep.mubr.msk.bf16.mxu0 %vm5210_vm10, %v6591_v13 }
 0x25c   :  { %v5599_v31 = vpop.f32.mrf.mxu0 }
 0x25e   :  { %v5601_v33 = vpop.f32.mrf.mxu0 }
 0x260   :  { %v5603_v34 = vpop.f32.mrf.mxu0 }
 0x262   :  { %v5605_v35 = vpop.f32.mrf.mxu0 }
 0x264   :  { %v4496_v36 = vpop.f32.mrf.mxu0 }
 0x265   :  { %v706_v40 = vmul.f32 %v4496_v36, %v5599_v31 }
 0x266   :  { %v686_v38 = vpop.f32.mrf.mxu0 }
 0x267   :  { %v705_v39 = vmul.f32 %v686_v38, %v5601_v33 }
 0x268   :  { %v4499_v41 = vpop.f32.mrf.mxu0 }
 0x269   :  { %4532 = vmatprep.mubr.f32.mxu1 %v705_v39  ;;  %v708_v45 = vmul.f32 %v4499_v41, %v5603_v34 }
 0x26a   :  { %v696_v42 = vpop.f32.mrf.mxu0  ;;  %4533 = vmatmul.mubr.f32.vlgmr.msra.gmra.mxu1 %v706_v40 }
 0x26b   :  { %v707_v44 = vmul.f32 %v696_v42, %v5605_v35 }
 0x26d   :  { %4535 = vmatprep.mubr.f32.mxu1 %v707_v44 }
 0x26e   :  { %4536 = vmatmul.mubr.f32.gmra.mxu1 %v708_v45 }
 0x26f   :  { %4564 = vmatprep.mubr.msk.bf16.mxu1 %vm5210_vm10, %v6591_v13 }
 0x32a   :  { %v4534_v46 = vpop.f32.mrf.mxu1 }
 0x32b   :  { %v799_v48 = vmul.f32 0.01, %v4534_v46  ;;  %vm795_vm12 = vcmp.ge.f32.partialorder %v4534_v46, 0.0 }
 0x32c   :  { %v775_v47 = vpop.f32.mrf.mxu1 }
 0x32d   :  { %vm794_vm11 = vcmp.ge.f32.partialorder %v775_v47, 0.0  ;;  %v798_v49 = vmul.f32 0.01, %v775_v47  ;;  %v803_v9 = vsel %vm795_vm12, %v4534_v46, %v799_v48  ;;  %vm2683_vm12 = vcmask 7168  }
 0x32e   :  { %v4537_v1 = vpop.f32.mrf.mxu1  ;;  %v808_v16 = vsel %vm806_vm14, %v803_v9, -inf }
 0x32f   :  { %v802_v6 = vsel %vm794_vm11, %v775_v47, %v798_v49  ;;  %vm797_vm13 = vcmp.ge.f32.partialorder %v4537_v1, 0.0  ;;  %v801_v7 = vmul.f32 0.01, %v4537_v1 }
 0x330   :  { %v785_v8 = vpop.f32.mrf.mxu1  ;;  %v807_v12 = vsel %vm806_vm14, %v802_v6, -inf }
 0x331   :  { %v805_v10 = vsel %vm797_vm13, %v4537_v1, %v801_v7  ;;  %vm796_vm15 = vcmp.ge.f32.partialorder %v785_v8, 0.0  ;;  %v800_v11 = vmul.f32 0.01, %v785_v8  ;;  %v811_v22 = vmax.f32 %v807_v12, %v808_v16 }
 0x332   :  { %v810_v18 = vsel %vm806_vm14, %v805_v10, -inf }
 0x333   :  { %v804_v14 = vsel %vm796_vm15, %v785_v8, %v800_v11 }
 0x334   :  { %v809_v19 = vsel %vm806_vm14, %v804_v14, -inf }
 0x335   :  { %v812_v36 = vmax.f32 %v809_v19, %v810_v18 }
 0x337   :  { %v813_v38 = vmax.f32 %v811_v22, %v812_v36 }
 0x339   :  { %v814_v39 = vrot.slane %v813_v38, 4 }
 0x33b   :  { %v815_v40 = vmax.f32 %v813_v38, %v814_v39 }
 0x33d   :  { %v816_v41 = vrot.slane %v815_v40, 2 }
 0x33f   :  { %v817_v42 = vmax.f32 %v815_v40, %v816_v41 }
 0x341   :  { %v818_v44 = vrot.slane %v817_v42, 1 }
 0x343   :  { %v819_v45 = vmax.f32 %v817_v42, %v818_v44 }
 0x345   :  { %v820_v46 = vsub.f32 %v802_v6, %v819_v45  ;;  %v821_v47 = vsub.f32 %v803_v9, %v819_v45  ;;  %v822_v48 = vsub.f32 %v804_v14, %v819_v45  ;;  %v823_v49 = vsub.f32 %v805_v10, %v819_v45  ;;  %v5618_v9 = vpop.trf.xlu0  ;;  %v5629_v45 = vld [vmem:[%s6582_s12] sm:$0xf] }
 0x347   :  { %v824_v1 = vmul.f32 1.442695, %v820_v46  ;;  %v828_v7 = vmul.f32 1.442695, %v822_v48  ;;  %v826_v8 = vmul.f32 1.442695, %v821_v47 }
 0x348   :  { %v830_v11 = vmul.f32 1.442695, %v823_v49 }
 0x349   :  { %5112 = vpow2.f32 %v828_v7 }
 0x34a   :  { %5114 = vpow2.f32 %v830_v11 }
 0x34b   :  { %5116 = vpow2.f32 %v824_v1 }
 0x34c   :  { %5118 = vpow2.f32 %v826_v8 }
 0x356   :  { %v5113_v12 = vpop.eup %5112 }
 0x357   :  { %v5115_v16 = vpop.eup %5114 }
 0x358   :  { %v5117_v18 = vpop.eup %5116  ;;  %v833_v19 = vpack.c.bf16 %v5115_v16, %v5113_v12 }
 0x359   :  { %v5119_v22 = vpop.eup %5118 }
 0x35a   :  { %4539 = vmatpush3.bf16.msra.mxu0 %v833_v19  ;;  %v832_v6 = vpack.c.bf16 %v5119_v22, %v5117_v18  ;;  %v5642_v19 = vld [vmem:[%s6583_s7 + $0x78] sm:$0xff] }
 0x35b   :  { %4540 = vmatprep.subr.bf16.mxu0 %v6591_v13 }
 0x35e   :  { %4541 = vmatpush3.bf16.msra.mxu0 %v832_v6  ;;  %v5675_v6 = vld [vmem:[%s6583_s7 + $0x50] sm:$0xff] }
 0x361   :  { %4543 = vmatmul.mubr.msk.bf16.vlgmr.msra.gmra.mxu0 %vm163_vm0, %v5618_v9 }
 0x362   :  { %4548 = vmatprep.mubr.msk.bf16.mxu0 %vm429_vm5, %v5374_v37 }
 0x421   :  { %v887_v10 = vpop.f32.mrf.mxu0 }
 0x422   :  { %v888_v14 = vadd.f32 1e-30, %v887_v10  ;;  %v5682_v10 = vld [vmem:[%s6583_s7 + $0x48] sm:$0xff] }
 0x423   :  { %v4544_v36 = vpop.f32.mrf.mxu0 }
 0x424   :  { %5120 = vrcp.f32 %v888_v14  ;;  %v5689_v14 = vld [vmem:[%s6583_s7 + $0x40] sm:$0xff]  ;;  %v5696_v36 = vld [vmem:[%s6583_s7 + $0x38] sm:$0xff] }
 0x425   :  { %v890_v38 = vpop.f32.mrf.mxu0  ;;  %6614 = vst [vmem:[#allocation2_spill] sm:$0xff] %v5696_v36 }
 0x426   :  { %v891_v39 = vadd.f32 1e-30, %v890_v38  ;;  %v5703_v38 = vld [vmem:[%s6583_s7 + $0x30] sm:$0xff] }
 0x427   :  { %v4545_v40 = vpop.f32.mrf.mxu0  ;;  %6615 = vst [vmem:[#allocation3_spill] sm:$0xff] %v5703_v38 }
 0x428   :  { %5122 = vrcp.f32 %v891_v39  ;;  %v5710_v39 = vld [vmem:[%s6583_s7 + $0x28] sm:$0xff]  ;;  %v5717_v40 = vld [vmem:[%s6583_s7 + $0x20] sm:$0xff] }
 0x429   :  { %6616 = vst [vmem:[#allocation4_spill] sm:$0xff] %v5710_v39  ;;  %6617 = vst [vmem:[#allocation5_spill] sm:$0xff] %v5717_v40 }
 0x431   :  { %v5121_v41 = vpop.eup %5120 }
 0x435   :  { %v5123_v42 = vpop.eup %5122 }
 0x436   :  { %v896_v44 = vpack.c.bf16 %v5123_v42, %v5121_v41  ;;  %v5724_v41 = vld [vmem:[%s6583_s7 + $0x18] sm:$0xff]  ;;  %v5731_v42 = vld [vmem:[%s6583_s7 + $0x10] sm:$0xff] }
 0x437   :  { %6618 = vst [vmem:[#allocation6_spill] sm:$0xff] %v5724_v41  ;;  %6619 = vst [vmem:[#allocation7_spill] sm:$0xff] %v5731_v42 }
 0x438   :  { %4546 = vmatprep.subr.bf16.mxu0 %v896_v44 }
 0x439   :  { %4547 = vmatpush3.bf16.msra.mxu0 %v896_v44 }
 0x43a   :  { %4552 = vmatprep.subr.msk.mxu0 %vm962_vm1, %v5629_v45 }
 0x43c   :  { %4549 = vmatmul.mubr.msk.bf16.vlgmr.msra.gmra.mxu0 %vm429_vm5, %v5382_v43 }
 0x43d   :  { %4553 = vmatpush3.msk.msra.mxu0 %vm962_vm1, %v5629_v45 }
 0x43e   :  { %4568 = vmatprep.subr.mxu0 %v5642_v19 }
 0x4fc   :  { %v4550_v46 = vpop.f32.mrf.mxu0 }
 0x4fd   :  { %v948_v8 = vmul.f32 %v5113_v12, %v4550_v46  ;;  %v5654_v12 = vld [vmem:[%s6583_s7 + $0x68] sm:$0xff] }
 0x4fe   :  { %v931_v47 = vpop.f32.mrf.mxu0 }
 0x4ff   :  { %v946_v48 = vmul.f32 %v5117_v18, %v931_v47  ;;  %v5647_v18 = vld [vmem:[%s6583_s7 + $0x70] sm:$0xff] }
 0x500   :  { %v4551_v49 = vpop.f32.mrf.mxu0 }
 0x501   :  { %4554 = vmatprep.mubr.msk.f32.mxu0 %vm806_vm14, %v946_v48  ;;  %v949_v11 = vmul.f32 %v5115_v16, %v4551_v49  ;;  %v5661_v16 = vld [vmem:[%s6583_s7 + $0x60] sm:$0xff] }
 0x502   :  { %v934_v1 = vpop.f32.mrf.mxu0 }
 0x503   :  { %v947_v7 = vmul.f32 %v5119_v22, %v934_v1  ;;  %v5668_v22 = vld [vmem:[%s6583_s7 + $0x58] sm:$0xff] }
 0x505   :  { %4555 = vmatmul.mubr.msk.f32.vlgmr.msra.gmra.mxu0 %vm806_vm14, %v947_v7 }
 0x506   :  { %4557 = vmatprep.mubr.msk.f32.mxu0 %vm806_vm14, %v948_v8  ;;  %4569 = vmatpush3.msra.mxu0 %v5642_v19 }
 0x507   :  { %4570 = vmatprep.subr.mxu0 %v5647_v18 }
 0x508   :  { %4571 = vmatpush3.msra.mxu0 %v5647_v18 }
 0x509   :  { %4558 = vmatmul.mubr.msk.f32.gmra.mxu0 %vm806_vm14, %v949_v11  ;;  %4572 = vmatprep.subr.mxu0 %v5654_v12 }
 0x50a   :  { %4573 = vmatpush3.msra.mxu0 %v5654_v12 }
 0x50b   :  { %4574 = vmatprep.subr.mxu0 %v5661_v16 }
 0x50c   :  { %4575 = vmatpush3.msra.mxu0 %v5661_v16 }
 0x50d   :  { %4576 = vmatprep.subr.mxu0 %v5668_v22 }
 0x50e   :  { %4577 = vmatpush3.msra.mxu0 %v5668_v22 }
 0x50f   :  { %4578 = vmatprep.subr.mxu0 %v5675_v6 }
 0x510   :  { %4579 = vmatpush3.msra.mxu0 %v5675_v6 }
 0x511   :  { %4580 = vmatprep.subr.mxu0 %v5682_v10 }
 0x512   :  { %4581 = vmatpush3.msra.mxu0 %v5682_v10 }
 0x513   :  { %4582 = vmatprep.subr.mxu0 %v5689_v14 }
 0x514   :  { %4583 = vmatpush3.msra.mxu0 %v5689_v14 }
 0x515   :  { %4584 = vmatprep.subr.mxu0 %v5696_v36 }
 0x516   :  { %4585 = vmatpush3.msra.mxu0 %v5696_v36 }
 0x517   :  { %4586 = vmatprep.subr.mxu0 %v5703_v38 }
 0x518   :  { %4587 = vmatpush3.msra.mxu0 %v5703_v38 }
 0x519   :  { %4588 = vmatprep.subr.mxu0 %v5710_v39 }
 0x51a   :  { %4589 = vmatpush3.msra.mxu0 %v5710_v39 }
 0x51b   :  { %4590 = vmatprep.subr.mxu0 %v5717_v40 }
 0x51c   :  { %4591 = vmatpush3.msra.mxu0 %v5717_v40 }
 0x51d   :  { %4592 = vmatprep.subr.mxu0 %v5724_v41 }
 0x51e   :  { %4593 = vmatpush3.msra.mxu0 %v5724_v41 }
 0x51f   :  { %4594 = vmatprep.subr.mxu0 %v5731_v42 }
 0x520   :  { %4595 = vmatpush3.msra.mxu0 %v5731_v42 }
 0x5c5   :  { %v4556_v44 = vpop.f32.mrf.mxu0 }
 0x5c6   :  { %v1052_v11 = vmul.f32 %v4556_v44, %v5599_v31  ;;  %v5756_v31 = vld [vmem:[%s6583_s7] sm:$0xff] }
 0x5c7   :  { %v1032_v46 = vpop.f32.mrf.mxu0  ;;  %6621 = vst [vmem:[#allocation9_spill] sm:$0xff] %v5756_v31 }
 0x5c8   :  { %v1051_v7 = vmul.f32 %v1032_v46, %v5601_v33  ;;  %v6622_v46 = vlaneseq }
 0x5c9   :  { %v4559_v47 = vpop.f32.mrf.mxu0 }
 0x5ca   :  { %v1054_v49 = vmul.f32 %v4559_v47, %v5603_v34  ;;  %v1055_v21 = vpack.c.bf16 %v1052_v11, %v1051_v7  ;;  %v5749_v34 = vld [vmem:[%s6583_s7 + $0x8] sm:$0xff]  ;;  %v5794_v47 = vshrl.u32 %v6622_v46, 7 }
 0x5cb   :  { %v1042_v48 = vpop.f32.mrf.mxu0  ;;  %6620 = vst [vmem:[#allocation8_spill] sm:$0xff] %v5749_v34  ;;  %4596 = vmatprep.subr.mxu0 %v5749_v34 }
 0x5cc   :  { %v1053_v1 = vmul.f32 %v1042_v48, %v5605_v35  ;;  %4597 = vmatpush3.msra.mxu0 %v5749_v34  ;;  %6623 = vst [vmem:[#allocation10_spill] sm:$0xff] %v5794_v47  ;;  %v6590_v48 = vsub.s32 0, %v5794_v47 }
 0x5cd   :  { %4598 = vmatprep.subr.mxu0 %v5756_v31 }
 0x5ce   :  { %v1056_v8 = vpack.c.bf16 %v1054_v49, %v1053_v1  ;;  %4599 = vmatpush3.msra.mxu0 %v5756_v31  ;;  %v5800_v1 = vrot.slane %v5502_v0, %v6590_v48 }
 0x5cf   :  { %4641 = vmatprep.subr.mxu0 %v5442_v55 }
 0x5d0   :  { %4561 = vmatpush3.bf16.msra.mxu1 %v1056_v8 }
 0x5d1   :  { %4562 = vmatprep.subr.bf16.mxu1 %v6591_v13 }
 0x5d4   :  { %4563 = vmatpush3.bf16.msra.mxu1 %v1055_v21 }
 0x5d7   :  { %4565 = vmatmul.mubr.msk.bf16.vlgmr.msra.gmra.mxu1 %vm163_vm0, %v5618_v9 }
 0x5d8   :  { %4605 = vmatprep.mubr.msk.bf16.mxu1 %vm429_vm5, %v5368_v32 }
 0x697   :  { %v1091_v21 = vpop.f32.mrf.mxu1 }
 0x698   :  { %4600 = vmatprep.mubr.f32.mxu0 %v1091_v21 }
 0x699   :  { %v4566_v33 = vpop.f32.mrf.mxu1 }
 0x69b   :  { %v1094_v35 = vpop.f32.mrf.mxu1 }
 0x69c   :  { %4601 = vmatmul.mubr.f32.vlgmr.msra.gmra.mxu0 %v1094_v35 }
 0x69d   :  { %v4567_v44 = vpop.f32.mrf.mxu1  ;;  %4642 = vmatpush3.msra.mxu0 %v5442_v55 }
 0x69e   :  { %4643 = vmatprep.subr.mxu0 %v5447_v56 }
 0x69f   :  { %4644 = vmatpush3.msra.mxu0 %v5447_v56 }
 0x6a0   :  { %4645 = vmatprep.subr.mxu0 %v5454_v57 }
 0x6a1   :  { %4646 = vmatpush3.msra.mxu0 %v5454_v57 }
 0x6a2   :  { %4647 = vmatprep.subr.mxu0 %v5461_v58 }
 0x6a3   :  { %4648 = vmatpush3.msra.mxu0 %v5461_v58 }
 0x6a4   :  { %4649 = vmatprep.subr.mxu0 %v5468_v59 }
 0x6a5   :  { %4650 = vmatpush3.msra.mxu0 %v5468_v59 }
 0x6a6   :  { %4651 = vmatprep.subr.mxu0 %v5475_v60 }
 0x6a7   :  { %4652 = vmatpush3.msra.mxu0 %v5475_v60 }
 0x6a8   :  { %4653 = vmatprep.subr.mxu0 %v5482_v61 }
 0x6a9   :  { %4654 = vmatpush3.msra.mxu0 %v5482_v61 }
 0x6aa   :  { %4655 = vmatprep.subr.mxu0 %v5489_v62 }
 0x6ab   :  { %4656 = vmatpush3.msra.mxu0 %v5489_v62 }
 0x6ac   :  { %4657 = vmatprep.subr.mxu0 %v5496_v63 }
 0x6ad   :  { %4658 = vmatpush3.msra.mxu0 %v5496_v63 }
 0x6ae   :  { %4659 = vmatprep.subr.mxu0 %v5552_v23 }
 0x6af   :  { %4660 = vmatpush3.msra.mxu0 %v5552_v23 }
 0x6b0   :  { %4661 = vmatprep.subr.mxu0 %v5559_v24 }
 0x6b1   :  { %4662 = vmatpush3.msra.mxu0 %v5559_v24 }
 0x6b2   :  { %4663 = vmatprep.subr.mxu0 %v5566_v25 }
 0x6b3   :  { %4664 = vmatpush3.msra.mxu0 %v5566_v25 }
 0x6b4   :  { %4665 = vmatprep.subr.mxu0 %v5573_v26 }
 0x6b5   :  { %4666 = vmatpush3.msra.mxu0 %v5573_v26 }
 0x6b6   :  { %4667 = vmatprep.subr.mxu0 %v5580_v27 }
 0x6b7   :  { %4668 = vmatpush3.msra.mxu0 %v5580_v27 }
 0x6b8   :  { %4669 = vmatprep.subr.mxu0 %v5587_v28 }
 0x6b9   :  { %4670 = vmatpush3.msra.mxu0 %v5587_v28 }
 0x6ba   :  { %4671 = vmatprep.subr.mxu0 %v5594_v29 }
 0x6bb   :  { %4672 = vmatpush3.msra.mxu0 %v5594_v29 }
 0x6bc   :  { %4709 = vmatprep.subr.mxu0 %v5642_v19 }
 0x75c   :  { %v4602_v49 = vpop.f32.mrf.mxu0 }
 0x75d   :  { %v5803_v8 = vadd.f32 %v4602_v49, %v5800_v1 }
 0x75e   :  { %v1164_v7 = vpop.f32.mrf.mxu0 }
 0x75f   :  { %6624 = vst [vmem:[#allocation11_spill] sm:$0xff] %v5803_v8  ;;  %v5806_v11 = vadd.f32 %v1164_v7, %v5800_v1 }
 0x761   :  { %6625 = vst [vmem:[#allocation12_spill] sm:$0xff] %v5806_v11  ;;  %v1173_v21 = vpack.c.bf16 %v5803_v8, %v5806_v11 }
 0x763   :  { %4603 = vmatprep.subr.bf16.mxu1 %v1173_v21 }
 0x764   :  { %4604 = vmatpush3.bf16.msra.mxu1 %v1173_v21 }
 0x765   :  { %4613 = vmatprep.subr.mxu1 %v5408_v50 }
 0x767   :  { %4606 = vmatmul.mubr.msk.bf16.vlgmr.msra.gmra.mxu1 %vm429_vm5, %v5365_v30 }
 0x768   :  { %4609 = vmatprep.mubr.msk.bf16.mxu1 %vm429_vm5, %v5374_v37  ;;  %4614 = vmatpush3.msra.mxu1 %v5408_v50 }
 0x769   :  { %4615 = vmatprep.subr.mxu1 %v5415_v51 }
 0x76a   :  { %4616 = vmatpush3.msra.mxu1 %v5415_v51 }
 0x76b   :  { %4617 = vmatprep.subr.mxu1 %v5422_v52 }
 0x76c   :  { %4618 = vmatpush3.msra.mxu1 %v5422_v52 }
 0x76d   :  { %4619 = vmatprep.subr.mxu1 %v5429_v53 }
 0x76e   :  { %4620 = vmatpush3.msra.mxu1 %v5429_v53 }
 0x76f   :  { %4610 = vmatmul.mubr.msk.bf16.gmra.mxu1 %vm429_vm5, %v5382_v43  ;;  %4627 = vmatprep.subr.mxu1 %v5436_v54 }
 0x827   :  { %v4607_v0 = vpop.f32.mrf.mxu1 }
 0x828   :  { %v1241_v52 = vadd.f32 %v4607_v0, %v5510_v5 }
 0x829   :  { %v1208_v33 = vpop.f32.mrf.mxu1 }
 0x82a   :  { %v1239_v50 = vadd.f32 %v1208_v33, %v5506_v3 }
 0x82b   :  { %v4608_v35 = vpop.f32.mrf.mxu1 }
 0x82c   :  { %4621 = vmatprep.mubr.msk.f32.mxu1 %vm163_vm0, %v1239_v50  ;;  %v1242_v49 = vadd.f32 %v4608_v35, %v5508_v4 }
 0x82d   :  { %v1211_v51 = vpop.f32.mrf.mxu1 }
 0x82e   :  { %v1240_v44 = vadd.f32 %v5504_v2, %v1211_v51 }
 0x82f   :  { %v4611_v46 = vpop.f32.mrf.mxu1 }
 0x830   :  { %4622 = vmatmul.mubr.msk.f32.vlgmr.msra.gmra.mxu1 %vm163_vm0, %v1240_v44 }
 0x831   :  { %v1224_v53 = vpop.f32.mrf.mxu1  ;;  %4624 = vmatprep.mubr.msk.f32.mxu1 %vm163_vm0, %v1241_v52  ;;  %4628 = vmatpush3.msra.mxu1 %v5436_v54 }
 0x832   :  { %4629 = vmatprep.subr.mxu1 %v5519_v15 }
 0x833   :  { %v4612_v7 = vpop.f32.mrf.mxu1  ;;  %4630 = vmatpush3.msra.mxu1 %v5519_v15 }
 0x834   :  { %4625 = vmatmul.mubr.msk.f32.gmra.mxu1 %vm163_vm0, %v1242_v49  ;;  %4631 = vmatprep.subr.mxu1 %v5527_v17 }
 0x835   :  { %4632 = vmatpush3.msra.mxu1 %v5527_v17  ;;  %4635 = vmatprep.mubr.msk.f32.mxu1 %vm163_vm0, %v1224_v53  ;;  %v1227_v21 = vpop.f32.mrf.mxu1 }
 0x836   :  { %4633 = vmatprep.subr.mxu1 %v5535_v20 }
 0x837   :  { %4634 = vmatpush3.msra.mxu1 %v5535_v20 }
 0x838   :  { %4636 = vmatmul.mubr.msk.f32.vlgmr.msra.gmra.mxu1 %vm163_vm0, %v1227_v21  ;;  %4679 = vmatprep.subr.bf16.mxu1 %v6591_v13 }
 0x839   :  { %4638 = vmatprep.mubr.msk.f32.mxu1 %vm163_vm0, %v4611_v46 }
 0x83c   :  { %4639 = vmatmul.mubr.msk.f32.gmra.mxu1 %vm163_vm0, %v4612_v7 }
 0x83d   :  { %4683 = vmatprep.mubr.msk.bf16.mxu1 %vm5210_vm10, %v6591_v13 }
 0x8f0   :  { %v5847_v54 = vpop.f32.mrf.mxu1 }
 0x8f2   :  { %v5849_v15 = vpop.f32.mrf.mxu1 }
 0x8f4   :  { %v5851_v17 = vpop.f32.mrf.mxu1 }
 0x8f6   :  { %v5853_v0 = vpop.f32.mrf.mxu1 }
 0x8f8   :  { %v4637_v20 = vpop.f32.mrf.mxu1 }
 0x8f9   :  { %v1438_v35 = vmul.f32 %v4637_v20, %v5847_v54 }
 0x8fa   :  { %v1418_v33 = vpop.f32.mrf.mxu1 }
 0x8fb   :  { %v1437_v50 = vmul.f32 %v1418_v33, %v5849_v15 }
 0x8fc   :  { %v4640_v51 = vpop.f32.mrf.mxu1 }
 0x8fd   :  { %4673 = vmatprep.mubr.f32.mxu0 %v1437_v50  ;;  %v1440_v46 = vmul.f32 %v4640_v51, %v5851_v17 }
 0x8fe   :  { %v1428_v44 = vpop.f32.mrf.mxu1  ;;  %4674 = vmatmul.mubr.f32.vlgmr.msra.gmra.mxu0 %v1438_v35 }
 0x8ff   :  { %v1439_v52 = vmul.f32 %v1428_v44, %v5853_v0  ;;  %4710 = vmatpush3.msra.mxu0 %v5642_v19 }
 0x900   :  { %4711 = vmatprep.subr.mxu0 %v5647_v18 }
 0x901   :  { %4676 = vmatprep.mubr.f32.mxu0 %v1439_v52  ;;  %4712 = vmatpush3.msra.mxu0 %v5647_v18 }
 0x902   :  { %4677 = vmatmul.mubr.f32.gmra.mxu0 %v1440_v46  ;;  %4713 = vmatprep.subr.mxu0 %v5654_v12 }
 0x903   :  { %4714 = vmatpush3.msra.mxu0 %v5654_v12 }
 0x904   :  { %4715 = vmatprep.subr.mxu0 %v5661_v16 }
 0x905   :  { %4716 = vmatpush3.msra.mxu0 %v5661_v16 }
 0x906   :  { %4717 = vmatprep.subr.mxu0 %v5668_v22 }
 0x907   :  { %4718 = vmatpush3.msra.mxu0 %v5668_v22 }
 0x908   :  { %4719 = vmatprep.subr.mxu0 %v5675_v6 }
 0x909   :  { %4720 = vmatpush3.msra.mxu0 %v5675_v6 }
 0x90a   :  { %4721 = vmatprep.subr.mxu0 %v5682_v10 }
 0x90b   :  { %4722 = vmatpush3.msra.mxu0 %v5682_v10 }
 0x90c   :  { %4723 = vmatprep.subr.mxu0 %v5689_v14 }
 0x90d   :  { %4724 = vmatpush3.msra.mxu0 %v5689_v14 }
 0x90e   :  { %4725 = vmatprep.subr.mxu0 %v5696_v36 }
 0x90f   :  { %4726 = vmatpush3.msra.mxu0 %v5696_v36 }
 0x910   :  { %4727 = vmatprep.subr.mxu0 %v5703_v38 }
 0x911   :  { %4728 = vmatpush3.msra.mxu0 %v5703_v38 }
 0x912   :  { %4729 = vmatprep.subr.mxu0 %v5710_v39 }
 0x913   :  { %4730 = vmatpush3.msra.mxu0 %v5710_v39 }
 0x914   :  { %4731 = vmatprep.subr.mxu0 %v5717_v40 }
 0x915   :  { %4732 = vmatpush3.msra.mxu0 %v5717_v40 }
 0x916   :  { %4733 = vmatprep.subr.mxu0 %v5724_v41 }
 0x917   :  { %4734 = vmatpush3.msra.mxu0 %v5724_v41 }
 0x918   :  { %4735 = vmatprep.subr.mxu0 %v5731_v42 }
 0x919   :  { %4736 = vmatpush3.msra.mxu0 %v5731_v42 }
 0x91a   :  { %4737 = vmatprep.subr.mxu0 %v5749_v34 }
 0x91b   :  { %4738 = vmatpush3.msra.mxu0 %v5749_v34 }
 0x91c   :  { %4739 = vmatprep.subr.mxu0 %v5756_v31 }
 0x91d   :  { %4740 = vmatpush3.msra.mxu0 %v5756_v31 }
 0x91e   :  { %4782 = vmatprep.subr.mxu0 %v5442_v55 }
 0x9be   :  { %v4675_v53 = vpop.f32.mrf.mxu0 }
 0x9bf   :  { %v1531_v7 = vmul.f32 0.01, %v4675_v53  ;;  %vm1527_vm3 = vcmp.ge.f32.partialorder %v4675_v53, 0.0 }
 0x9c0   :  { %v1507_v49 = vpop.f32.mrf.mxu0 }
 0x9c1   :  { %vm1526_vm2 = vcmp.ge.f32.partialorder %v1507_v49, 0.0  ;;  %v1530_v21 = vmul.f32 0.01, %v1507_v49  ;;  %v1535_v51 = vsel %vm1527_vm3, %v4675_v53, %v1531_v7 }
 0x9c2   :  { %v4678_v20 = vpop.f32.mrf.mxu0  ;;  %v1539_v13 = vsel %vm806_vm14, %v1535_v51, -inf }
 0x9c3   :  { %v1534_v33 = vsel %vm1526_vm2, %v1507_v49, %v1530_v21  ;;  %vm1529_vm4 = vcmp.ge.f32.partialorder %v4678_v20, 0.0  ;;  %v1533_v50 = vmul.f32 0.01, %v4678_v20 }
 0x9c4   :  { %v1517_v35 = vpop.f32.mrf.mxu0  ;;  %v1538_v46 = vsel %vm806_vm14, %v1534_v33, -inf }
 0x9c5   :  { %v1537_v44 = vsel %vm1529_vm4, %v4678_v20, %v1533_v50  ;;  %vm1528_vm6 = vcmp.ge.f32.partialorder %v1517_v35, 0.0  ;;  %v1532_v52 = vmul.f32 0.01, %v1517_v35  ;;  %v1542_v47 = vmax.f32 %v1538_v46, %v1539_v13 }
 0x9c6   :  { %v1541_v11 = vsel %vm806_vm14, %v1537_v44, -inf }
 0x9c7   :  { %v1536_v48 = vsel %vm1528_vm6, %v1517_v35, %v1532_v52 }
 0x9c8   :  { %v1540_v8 = vsel %vm806_vm14, %v1536_v48, -inf }
 0x9c9   :  { %v1543_v31 = vmax.f32 %v1540_v8, %v1541_v11 }
 0x9cb   :  { %v1544_v34 = vmax.f32 %v1542_v47, %v1543_v31 }
 0x9cd   :  { %v1545_v49 = vrot.slane %v1544_v34, 4 }
 0x9cf   :  { %v1546_v21 = vmax.f32 %v1544_v34, %v1545_v49 }
 0x9d1   :  { %v1547_v42 = vrot.slane %v1546_v21, 2 }
 0x9d3   :  { %v1548_v41 = vmax.f32 %v1546_v21, %v1547_v42  ;;  %v6626_v42 = vmov 0.0  }
 0x9d5   :  { %v1549_v53 = vrot.slane %v1548_v41, 1 }
 0x9d7   :  { %v1550_v7 = vmax.f32 %v1548_v41, %v1549_v53 }
 0x9d9   :  { %v1551_v20 = vsub.f32 %v1534_v33, %v1550_v7  ;;  %v1552_v50 = vsub.f32 %v1535_v51, %v1550_v7  ;;  %v1553_v40 = vsub.f32 %v1536_v48, %v1550_v7  ;;  %v1554_v39 = vsub.f32 %v1537_v44, %v1550_v7 }
 0x9db   :  { %v1555_v35 = vmul.f32 1.442695, %v1551_v20  ;;  %v1559_v52 = vmul.f32 1.442695, %v1553_v40  ;;  %v1557_v38 = vmul.f32 1.442695, %v1552_v50 }
 0x9dc   :  { %v1561_v36 = vmul.f32 1.442695, %v1554_v39 }
 0x9dd   :  { %5124 = vpow2.f32 %v1559_v52 }
 0x9de   :  { %5126 = vpow2.f32 %v1561_v36 }
 0x9df   :  { %5128 = vpow2.f32 %v1555_v35 }
 0x9e0   :  { %5130 = vpow2.f32 %v1557_v38 }
 0x9ea   :  { %v5125_v13 = vpop.eup %5124 }
 0x9eb   :  { %v5127_v31 = vpop.eup %5126 }
 0x9ec   :  { %v5129_v47 = vpop.eup %5128  ;;  %v1564_v34 = vpack.c.bf16 %v5127_v31, %v5125_v13 }
 0x9ed   :  { %v5131_v8 = vpop.eup %5130 }
 0x9ee   :  { %4680 = vmatpush3.bf16.msra.mxu1 %v1564_v34  ;;  %v1563_v41 = vpack.c.bf16 %v5131_v8, %v5129_v47 }
 0x9ef   :  { %4681 = vmatprep.subr.bf16.mxu1 %v6626_v42 }
 0x9f2   :  { %4682 = vmatpush3.bf16.msra.mxu1 %v1563_v41 }
 0x9f5   :  { %4684 = vmatmul.mubr.msk.bf16.vlgmr.msra.gmra.mxu1 %vm163_vm0, %v5618_v9 }
 0x9f6   :  { %4689 = vmatprep.mubr.msk.bf16.mxu1 %vm429_vm5, %v5374_v37 }
 0xab5   :  { %v1599_v39 = vpop.f32.mrf.mxu1 }
 0xab6   :  { %v1600_v36 = vadd.f32 1e-30, %v1599_v39 }
 0xab7   :  { %v4685_v40 = vpop.f32.mrf.mxu1 }
 0xab8   :  { %5132 = vrcp.f32 %v1600_v36 }
 0xab9   :  { %v1602_v38 = vpop.f32.mrf.mxu1 }
 0xaba   :  { %v1603_v48 = vadd.f32 1e-30, %v1602_v38 }
 0xabb   :  { %v4686_v11 = vpop.f32.mrf.mxu1 }
 0xabc   :  { %5134 = vrcp.f32 %v1603_v48 }
 0xac5   :  { %v5133_v33 = vpop.eup %5132 }
 0xac9   :  { %v5135_v51 = vpop.eup %5134 }
 0xaca   :  { %v1608_v44 = vpack.c.bf16 %v5135_v51, %v5133_v33  ;;  %v5183_v33 = vld [vmem:[%s6580_s6 + $0x10] sm:$0xff] }
 0xacc   :  { %4687 = vmatprep.subr.bf16.mxu1 %v1608_v44 }
 0xacd   :  { %4688 = vmatpush3.bf16.msra.mxu1 %v1608_v44  ;;  %v5184_v44 = vld [vmem:[%s6580_s6 + $0x8] sm:$0xff] }
 0xace   :  { %4693 = vmatprep.subr.msk.mxu1 %vm962_vm1, %v5629_v45 }
 0xad0   :  { %4690 = vmatmul.mubr.msk.bf16.vlgmr.msra.gmra.mxu1 %vm429_vm5, %v5382_v43 }
 0xad1   :  { %4694 = vmatpush3.msk.msra.mxu1 %vm962_vm1, %v5629_v45 }
 0xad2   :  { %4701 = vmatprep.subr.bf16.mxu1 %v6626_v42 }
 0xb90   :  { %v4691_v46 = vpop.f32.mrf.mxu1 }
 0xb91   :  { %v1660_v50 = vmul.f32 %v5125_v13, %v4691_v46  ;;  %v5185_v46 = vld [vmem:[%s6580_s6] sm:$0xff] }
 0xb92   :  { %v1643_v49 = vpop.f32.mrf.mxu1 }
 0xb93   :  { %v1658_v21 = vmul.f32 %v5129_v47, %v1643_v49 }
 0xb94   :  { %v4692_v53 = vpop.f32.mrf.mxu1 }
 0xb95   :  { %4695 = vmatprep.mubr.msk.f32.mxu1 %vm806_vm14, %v1658_v21  ;;  %v1661_v35 = vmul.f32 %v5127_v31, %v4692_v53 }
 0xb96   :  { %v1646_v7 = vpop.f32.mrf.mxu1 }
 0xb97   :  { %v1659_v20 = vmul.f32 %v5131_v8, %v1646_v7 }
 0xb99   :  { %4696 = vmatmul.mubr.msk.f32.vlgmr.msra.gmra.mxu1 %vm806_vm14, %v1659_v20 }
 0xb9a   :  { %4698 = vmatprep.mubr.msk.f32.mxu1 %vm806_vm14, %v1660_v50 }
 0xb9d   :  { %4699 = vmatmul.mubr.msk.f32.gmra.mxu1 %vm806_vm14, %v1661_v35 }
 0xb9e   :  { %4705 = vmatprep.mubr.msk.bf16.mxu1 %vm5210_vm10, %v6626_v42 }
 0xc59   :  { %v4697_v45 = vpop.f32.mrf.mxu1 }
 0xc5a   :  { %v1760_v36 = vmul.f32 %v4697_v45, %v5847_v54 }
 0xc5b   :  { %v1740_v52 = vpop.f32.mrf.mxu1 }
 0xc5c   :  { %v1759_v13 = vmul.f32 %v1740_v52, %v5849_v15 }
 0xc5d   :  { %v4700_v34 = vpop.f32.mrf.mxu1 }
 0xc5e   :  { %v1762_v41 = vmul.f32 %v4700_v34, %v5851_v17  ;;  %v1763_v31 = vpack.c.bf16 %v1760_v36, %v1759_v13  ;;  %v6069_v13 = vld [vmem:[%s6581_s11 + $0x78] sm:$0xff] }
 0xc5f   :  { %v1750_v47 = vpop.f32.mrf.mxu1 }
 0xc60   :  { %v1761_v39 = vmul.f32 %v1750_v47, %v5853_v0 }
 0xc62   :  { %v1764_v8 = vpack.c.bf16 %v1762_v41, %v1761_v39 }
 0xc64   :  { %4702 = vmatpush3.bf16.msra.mxu1 %v1764_v8 }
 0xc65   :  { %4703 = vmatprep.subr.bf16.mxu1 %v6626_v42 }
 0xc68   :  { %4704 = vmatpush3.bf16.msra.mxu1 %v1763_v31 }
 0xc6b   :  { %4706 = vmatmul.mubr.msk.bf16.vlgmr.msra.gmra.mxu1 %vm163_vm0, %v5618_v9 }
 0xc6c   :  { %4746 = vmatprep.mubr.msk.bf16.mxu1 %vm429_vm5, %v5368_v32 }
 0xd2b   :  { %v1799_v40 = vpop.f32.mrf.mxu1 }
 0xd2c   :  { %4741 = vmatprep.mubr.f32.mxu0 %v1799_v40 }
 0xd2d   :  { %v4707_v17 = vpop.f32.mrf.mxu1 }
 0xd2f   :  { %v1802_v0 = vpop.f32.mrf.mxu1 }
 0xd30   :  { %4742 = vmatmul.mubr.f32.vlgmr.msra.gmra.mxu0 %v1802_v0 }
 0xd31   :  { %v4708_v15 = vpop.f32.mrf.mxu1  ;;  %4783 = vmatpush3.msra.mxu0 %v5442_v55 }
 0xd32   :  { %4784 = vmatprep.subr.mxu0 %v5447_v56 }
 0xd33   :  { %4785 = vmatpush3.msra.mxu0 %v5447_v56 }
 0xd34   :  { %4786 = vmatprep.subr.mxu0 %v5454_v57 }
 0xd35   :  { %4787 = vmatpush3.msra.mxu0 %v5454_v57 }
 0xd36   :  { %4788 = vmatprep.subr.mxu0 %v5461_v58 }
 0xd37   :  { %4789 = vmatpush3.msra.mxu0 %v5461_v58 }
 0xd38   :  { %4790 = vmatprep.subr.mxu0 %v5468_v59 }
 0xd39   :  { %4791 = vmatpush3.msra.mxu0 %v5468_v59 }
 0xd3a   :  { %4792 = vmatprep.subr.mxu0 %v5475_v60 }
 0xd3b   :  { %4793 = vmatpush3.msra.mxu0 %v5475_v60  ;;  %v5965_v60 = vld [vmem:[%s6579_s13 + $0x18] sm:$0xff] }
 0xd3c   :  { %4794 = vmatprep.subr.mxu0 %v5482_v61 }
 0xd3d   :  { %4795 = vmatpush3.msra.mxu0 %v5482_v61  ;;  %v5976_v61 = vld [vmem:[%s6579_s13 + $0x10] sm:$0xff] }
 0xd3e   :  { %4796 = vmatprep.subr.mxu0 %v5489_v62 }
 0xd3f   :  { %4797 = vmatpush3.msra.mxu0 %v5489_v62  ;;  %v5983_v62 = vld [vmem:[%s6579_s13 + $0x8] sm:$0xff] }
 0xd40   :  { %4798 = vmatprep.subr.mxu0 %v5496_v63 }
 0xd41   :  { %4799 = vmatpush3.msra.mxu0 %v5496_v63  ;;  %v5990_v63 = vld [vmem:[%s6579_s13] sm:$0xff] }
 0xd42   :  { %4800 = vmatprep.subr.mxu0 %v5552_v23 }
 0xd43   :  { %4801 = vmatpush3.msra.mxu0 %v5552_v23  ;;  %v5182_v23 = vld [vmem:[%s6580_s6 + $0x18] sm:$0xff] }
 0xd44   :  { %4802 = vmatprep.subr.mxu0 %v5559_v24 }
 0xd45   :  { %4803 = vmatpush3.msra.mxu0 %v5559_v24 }
 0xd46   :  { %4804 = vmatprep.subr.mxu0 %v5566_v25 }
 0xd47   :  { %4805 = vmatpush3.msra.mxu0 %v5566_v25 }
 0xd48   :  { %4806 = vmatprep.subr.mxu0 %v5573_v26 }
 0xd49   :  { %4807 = vmatpush3.msra.mxu0 %v5573_v26 }
 0xd4a   :  { %4808 = vmatprep.subr.mxu0 %v5580_v27 }
 0xd4b   :  { %4809 = vmatpush3.msra.mxu0 %v5580_v27 }
 0xd4c   :  { %4810 = vmatprep.subr.mxu0 %v5587_v28 }
 0xd4d   :  { %4811 = vmatpush3.msra.mxu0 %v5587_v28 }
 0xd4e   :  { %4812 = vmatprep.subr.mxu0 %v5594_v29 }
 0xd4f   :  { %4813 = vmatpush3.msra.mxu0 %v5594_v29 }
 0xd50   :  { %4850 = vmatprep.subr.mxu0 %v5642_v19 }
 0xdf0   :  { %v4743_v55 = vpop.f32.mrf.mxu0 }
 0xdf1   :  { %v5955_v57 = vadd.f32 %v4743_v55, %v5800_v1 }
 0xdf2   :  { %v1872_v56 = vpop.f32.mrf.mxu0 }
 0xdf3   :  { %v5958_v58 = vadd.f32 %v1872_v56, %v5800_v1 }
 0xdf5   :  { %v1881_v59 = vpack.c.bf16 %v5955_v57, %v5958_v58 }
 0xdf7   :  { %4744 = vmatprep.subr.bf16.mxu1 %v1881_v59 }
 0xdf8   :  { %4745 = vmatpush3.bf16.msra.mxu1 %v1881_v59 }
 0xdf9   :  { %4754 = vmatprep.subr.mxu1 %v5965_v60 }
 0xdfb   :  { %4747 = vmatmul.mubr.msk.bf16.vlgmr.msra.gmra.mxu1 %vm429_vm5, %v5365_v30 }
 0xdfc   :  { %4750 = vmatprep.mubr.msk.bf16.mxu1 %vm429_vm5, %v5374_v37  ;;  %4755 = vmatpush3.msra.mxu1 %v5965_v60 }
 0xdfd   :  { %4756 = vmatprep.subr.mxu1 %v5976_v61 }
 0xdfe   :  { %4757 = vmatpush3.msra.mxu1 %v5976_v61 }
 0xdff   :  { %4758 = vmatprep.subr.mxu1 %v5983_v62 }
 0xe00   :  { %4759 = vmatpush3.msra.mxu1 %v5983_v62 }
 0xe01   :  { %4760 = vmatprep.subr.mxu1 %v5990_v63 }
 0xe02   :  { %4761 = vmatpush3.msra.mxu1 %v5990_v63 }
 0xe03   :  { %4751 = vmatmul.mubr.msk.bf16.gmra.mxu1 %vm429_vm5, %v5382_v43  ;;  %4768 = vmatprep.subr.mxu1 %v5182_v23 }
 0xebb   :  { %v4748_v24 = vpop.f32.mrf.mxu1 }
 0xebc   :  { %v1949_v54 = vadd.f32 %v4748_v24, %v5510_v5 }
 0xebd   :  { %v1916_v25 = vpop.f32.mrf.mxu1 }
 0xebe   :  { %v1947_v26 = vadd.f32 %v1916_v25, %v5506_v3 }
 0xebf   :  { %v4749_v27 = vpop.f32.mrf.mxu1 }
 0xec0   :  { %4762 = vmatprep.mubr.msk.f32.mxu1 %vm163_vm0, %v1947_v26  ;;  %v1950_v11 = vadd.f32 %v4749_v27, %v5508_v4 }
 0xec1   :  { %v1919_v28 = vpop.f32.mrf.mxu1 }
 0xec2   :  { %v1948_v29 = vadd.f32 %v5504_v2, %v1919_v28 }
 0xec3   :  { %v4752_v38 = vpop.f32.mrf.mxu1 }
 0xec4   :  { %4763 = vmatmul.mubr.msk.f32.vlgmr.msra.gmra.mxu1 %vm163_vm0, %v1948_v29 }
 0xec5   :  { %v1932_v48 = vpop.f32.mrf.mxu1  ;;  %4765 = vmatprep.mubr.msk.f32.mxu1 %vm163_vm0, %v1949_v54  ;;  %4769 = vmatpush3.msra.mxu1 %v5182_v23 }
 0xec6   :  { %4770 = vmatprep.subr.mxu1 %v5183_v33 }
 0xec7   :  { %v4753_v51 = vpop.f32.mrf.mxu1  ;;  %4771 = vmatpush3.msra.mxu1 %v5183_v33 }
 0xec8   :  { %4766 = vmatmul.mubr.msk.f32.gmra.mxu1 %vm163_vm0, %v1950_v11  ;;  %4772 = vmatprep.subr.mxu1 %v5184_v44 }
 0xec9   :  { %4773 = vmatpush3.msra.mxu1 %v5184_v44  ;;  %4776 = vmatprep.mubr.msk.f32.mxu1 %vm163_vm0, %v1932_v48  ;;  %v1935_v49 = vpop.f32.mrf.mxu1 }
 0xeca   :  { %4774 = vmatprep.subr.mxu1 %v5185_v46 }
 0xecb   :  { %4775 = vmatpush3.msra.mxu1 %v5185_v46 }
 0xecc   :  { %4777 = vmatmul.mubr.msk.f32.vlgmr.msra.gmra.mxu1 %vm163_vm0, %v1935_v49  ;;  %4820 = vmatprep.subr.bf16.mxu1 %v6626_v42 }
 0xecd   :  { %4779 = vmatprep.mubr.msk.f32.mxu1 %vm163_vm0, %v4752_v38 }
 0xed0   :  { %4780 = vmatmul.mubr.msk.f32.gmra.mxu1 %vm163_vm0, %v4753_v51 }
 0xed1   :  { %4824 = vmatprep.mubr.msk.bf16.mxu1 %vm5210_vm10, %v6626_v42 }
 0xf84   :  { %v6023_v21 = vpop.f32.mrf.mxu1 }
 0xf86   :  { %v6025_v53 = vpop.f32.mrf.mxu1 }
 0xf88   :  { %v6027_v7 = vpop.f32.mrf.mxu1 }
 0xf8a   :  { %v6029_v20 = vpop.f32.mrf.mxu1 }
 0xf8c   :  { %v4778_v50 = vpop.f32.mrf.mxu1 }
 0xf8d   :  { %v2146_v52 = vmul.f32 %v4778_v50, %v6023_v21 }
 0xf8e   :  { %v2126_v35 = vpop.f32.mrf.mxu1 }
 0xf8f   :  { %v2145_v45 = vmul.f32 %v2126_v35, %v6025_v53 }
 0xf90   :  { %v4781_v34 = vpop.f32.mrf.mxu1 }
 0xf91   :  { %4814 = vmatprep.mubr.f32.mxu0 %v2145_v45  ;;  %v2148_v39 = vmul.f32 %v4781_v34, %v6027_v7 }
 0xf92   :  { %v2136_v47 = vpop.f32.mrf.mxu1  ;;  %4815 = vmatmul.mubr.f32.vlgmr.msra.gmra.mxu0 %v2146_v52 }
 0xf93   :  { %v2147_v41 = vmul.f32 %v2136_v47, %v6029_v20  ;;  %4851 = vmatpush3.msra.mxu0 %v5642_v19  ;;  %v6627_v19 = vld [vmem:[#allocation2_spill] sm:$0xff] }
 0xf94   :  { %4852 = vmatprep.subr.mxu0 %v5647_v18 }
 0xf95   :  { %4817 = vmatprep.mubr.f32.mxu0 %v2147_v41  ;;  %4853 = vmatpush3.msra.mxu0 %v5647_v18  ;;  %v6628_v18 = vld [vmem:[#allocation3_spill] sm:$0xff] }
 0xf96   :  { %4818 = vmatmul.mubr.f32.gmra.mxu0 %v2148_v39  ;;  %4854 = vmatprep.subr.mxu0 %v5654_v12 }
 0xf97   :  { %4855 = vmatpush3.msra.mxu0 %v5654_v12  ;;  %v6629_v12 = vld [vmem:[#allocation4_spill] sm:$0xff] }
 0xf98   :  { %4856 = vmatprep.subr.mxu0 %v5661_v16 }
 0xf99   :  { %4857 = vmatpush3.msra.mxu0 %v5661_v16  ;;  %v6630_v16 = vld [vmem:[#allocation5_spill] sm:$0xff] }
 0xf9a   :  { %4858 = vmatprep.subr.mxu0 %v5668_v22 }
 0xf9b   :  { %4859 = vmatpush3.msra.mxu0 %v5668_v22  ;;  %v6631_v22 = vld [vmem:[#allocation6_spill] sm:$0xff] }
 0xf9c   :  { %4860 = vmatprep.subr.mxu0 %v5675_v6 }
 0xf9d   :  { %4861 = vmatpush3.msra.mxu0 %v5675_v6  ;;  %v6632_v6 = vld [vmem:[#allocation7_spill] sm:$0xff] }
 0xf9e   :  { %4862 = vmatprep.subr.mxu0 %v5682_v10 }
 0xf9f   :  { %4863 = vmatpush3.msra.mxu0 %v5682_v10  ;;  %v6633_v10 = vld [vmem:[#allocation8_spill] sm:$0xff] }
 0xfa0   :  { %4864 = vmatprep.subr.mxu0 %v5689_v14 }
 0xfa1   :  { %4865 = vmatpush3.msra.mxu0 %v5689_v14  ;;  %v6634_v14 = vld [vmem:[#allocation9_spill] sm:$0xff] }
 0xfa2   :  { %4866 = vmatprep.subr.mxu0 %v6627_v19 }
 0xfa3   :  { %4867 = vmatpush3.msra.mxu0 %v6627_v19 }
 0xfa4   :  { %4868 = vmatprep.subr.mxu0 %v6628_v18 }
 0xfa5   :  { %4869 = vmatpush3.msra.mxu0 %v6628_v18 }
 0xfa6   :  { %4870 = vmatprep.subr.mxu0 %v6629_v12 }
 0xfa7   :  { %4871 = vmatpush3.msra.mxu0 %v6629_v12 }
 0xfa8   :  { %4872 = vmatprep.subr.mxu0 %v6630_v16 }
 0xfa9   :  { %4873 = vmatpush3.msra.mxu0 %v6630_v16 }
 0xfaa   :  { %4874 = vmatprep.subr.mxu0 %v6631_v22 }
 0xfab   :  { %4875 = vmatpush3.msra.mxu0 %v6631_v22 }
 0xfac   :  { %4876 = vmatprep.subr.mxu0 %v6632_v6 }
 0xfad   :  { %4877 = vmatpush3.msra.mxu0 %v6632_v6 }
 0xfae   :  { %4878 = vmatprep.subr.mxu0 %v6633_v10 }
 0xfaf   :  { %4879 = vmatpush3.msra.mxu0 %v6633_v10 }
 0xfb0   :  { %4880 = vmatprep.subr.mxu0 %v6634_v14 }
 0xfb1   :  { %4881 = vmatpush3.msra.mxu0 %v6634_v14 }
 0xfb2   :  { %4934 = vmatprep.subr.mxu0 %v6069_v13 }
0x1052   :  { %v4816_v8 = vpop.f32.mrf.mxu0 }
0x1053   :  { %v2239_v31 = vmul.f32 0.01, %v4816_v8  ;;  %vm2235_vm8 = vcmp.ge.f32.partialorder %v4816_v8, 0.0 }
0x1054   :  { %v2215_v36 = vpop.f32.mrf.mxu0 }
0x1055   :  { %vm2234_vm7 = vcmp.ge.f32.partialorder %v2215_v36, 0.0  ;;  %v2238_v40 = vmul.f32 0.01, %v2215_v36  ;;  %v2243_v56 = vsel %vm2235_vm8, %v4816_v8, %v2239_v31  ;;  %vm3938_vm8 = vcmask 793600  }
0x1056   :  { %v4819_v17 = vpop.f32.mrf.mxu0  ;;  %v2247_v26 = vsel %vm806_vm14, %v2243_v56, -inf }
0x1057   :  { %v2242_v0 = vsel %vm2234_vm7, %v2215_v36, %v2238_v40  ;;  %vm2237_vm9 = vcmp.ge.f32.partialorder %v4819_v17, 0.0  ;;  %v2241_v15 = vmul.f32 0.01, %v4819_v17 }
0x1058   :  { %v2225_v55 = vpop.f32.mrf.mxu0  ;;  %v2246_v24 = vsel %vm806_vm14, %v2242_v0, -inf }
0x1059   :  { %v2245_v59 = vsel %vm2237_vm9, %v4819_v17, %v2241_v15  ;;  %vm2236_vm11 = vcmp.ge.f32.partialorder %v2225_v55, 0.0  ;;  %v2240_v23 = vmul.f32 0.01, %v2225_v55  ;;  %v2250_v29 = vmax.f32 %v2246_v24, %v2247_v26  ;;  %v5187_v15 = vld [vmem:[%s6582_s12] sm:$0xf] }
0x105a   :  { %v2249_v27 = vsel %vm806_vm14, %v2245_v59, -inf  ;;  %vm3941_vm9 = vcmask 801792  }
0x105b   :  { %v2244_v25 = vsel %vm2236_vm11, %v2225_v55, %v2240_v23  ;;  %vm3944_vm11 = vcmask 809984  }
0x105c   :  { %v2248_v28 = vsel %vm806_vm14, %v2244_v25, -inf }
0x105d   :  { %v2251_v54 = vmax.f32 %v2248_v28, %v2249_v27 }
0x105f   :  { %v2252_v38 = vmax.f32 %v2250_v29, %v2251_v54 }
0x1061   :  { %v2253_v48 = vrot.slane %v2252_v38, 4 }
0x1063   :  { %v2254_v11 = vmax.f32 %v2252_v38, %v2253_v48 }
0x1065   :  { %v2255_v33 = vrot.slane %v2254_v11, 2 }
0x1067   :  { %v2256_v51 = vmax.f32 %v2254_v11, %v2255_v33 }
0x1069   :  { %v2257_v44 = vrot.slane %v2256_v51, 1 }
0x106b   :  { %v2258_v46 = vmax.f32 %v2256_v51, %v2257_v44 }
0x106d   :  { %v2259_v49 = vsub.f32 %v2242_v0, %v2258_v46  ;;  %v2260_v50 = vsub.f32 %v2243_v56, %v2258_v46  ;;  %v2261_v35 = vsub.f32 %v2244_v25, %v2258_v46  ;;  %v2262_v45 = vsub.f32 %v2245_v59, %v2258_v46 }
0x106f   :  { %v2263_v52 = vmul.f32 1.442695, %v2259_v49  ;;  %v2267_v34 = vmul.f32 1.442695, %v2261_v35  ;;  %v2265_v47 = vmul.f32 1.442695, %v2260_v50 }
0x1070   :  { %v2269_v41 = vmul.f32 1.442695, %v2262_v45  ;;  %v2592_v49 = vld [vmem:[%s6584_s9 + $0x18] sm:$0xff] }
0x1071   :  { %5136 = vpow2.f32 %v2267_v34  ;;  %v6130_v34 = vld [vmem:[%s6581_s11 + $0x70] sm:$0xff] }
0x1072   :  { %5138 = vpow2.f32 %v2269_v41  ;;  %v6635_v41 = vld [vmem:[#allocation10_spill] sm:$0xff] }
0x1073   :  { %5140 = vpow2.f32 %v2263_v52 }
0x1074   :  { %5142 = vpow2.f32 %v2265_v47 }
0x107e   :  { %v5137_v39 = vpop.eup %5136 }
0x107f   :  { %v5139_v19 = vpop.eup %5138 }
0x1080   :  { %v5141_v18 = vpop.eup %5140  ;;  %v2272_v12 = vpack.c.bf16 %v5139_v19, %v5137_v39 }
0x1081   :  { %v5143_v16 = vpop.eup %5142 }
0x1082   :  { %4821 = vmatpush3.bf16.msra.mxu1 %v2272_v12  ;;  %v2271_v22 = vpack.c.bf16 %v5143_v16, %v5141_v18 }
0x1083   :  { %4822 = vmatprep.subr.bf16.mxu1 %v6626_v42 }
0x1086   :  { %4823 = vmatpush3.bf16.msra.mxu1 %v2271_v22 }
0x1089   :  { %4825 = vmatmul.mubr.msk.bf16.vlgmr.msra.gmra.mxu1 %vm163_vm0, %v5618_v9 }
0x108a   :  { %4830 = vmatprep.mubr.msk.bf16.mxu1 %vm429_vm5, %v5374_v37 }
0x1149   :  { %v2307_v6 = vpop.f32.mrf.mxu1 }
0x114a   :  { %v2308_v10 = vadd.f32 1e-30, %v2307_v6  ;;  %v6638_v6 = vld [vmem:[#allocation12_spill] sm:$0xff] }
0x114b   :  { %v4826_v14 = vpop.f32.mrf.mxu1 }
0x114c   :  { %5144 = vrcp.f32 %v2308_v10  ;;  %v6148_v14 = vld [vmem:[%s6581_s11 + $0x60] sm:$0xff] }
0x114d   :  { %v2310_v8 = vpop.f32.mrf.mxu1 }
0x114e   :  { %v2311_v36 = vadd.f32 1e-30, %v2310_v8 }
0x114f   :  { %v4827_v31 = vpop.f32.mrf.mxu1 }
0x1150   :  { %5146 = vrcp.f32 %v2311_v36  ;;  %v6157_v31 = vld [vmem:[%s6581_s11 + $0x58] sm:$0xff] }
0x1159   :  { %v5145_v40 = vpop.eup %5144 }
0x115d   :  { %v5147_v17 = vpop.eup %5146 }
0x115e   :  { %v2316_v0 = vpack.c.bf16 %v5147_v17, %v5145_v40  ;;  %v6164_v40 = vld [vmem:[%s6581_s11 + $0x50] sm:$0xff]  ;;  %v6171_v17 = vld [vmem:[%s6581_s11 + $0x48] sm:$0xff] }
0x1160   :  { %4828 = vmatprep.subr.bf16.mxu1 %v2316_v0 }
0x1161   :  { %4829 = vmatpush3.bf16.msra.mxu1 %v2316_v0  ;;  %v6178_v0 = vld [vmem:[%s6581_s11 + $0x40] sm:$0xff] }
0x1162   :  { %4834 = vmatprep.subr.msk.mxu1 %vm962_vm1, %v5187_v15 }
0x1164   :  { %4831 = vmatmul.mubr.msk.bf16.vlgmr.msra.gmra.mxu1 %vm429_vm5, %v5382_v43 }
0x1165   :  { %4835 = vmatpush3.msk.msra.mxu1 %vm962_vm1, %v5187_v15  ;;  %v6185_v15 = vld [vmem:[%s6581_s11 + $0x38] sm:$0xff] }
0x1166   :  { %4842 = vmatprep.subr.bf16.mxu1 %v6626_v42 }
0x1224   :  { %v4832_v55 = vpop.f32.mrf.mxu1 }
0x1225   :  { %v2368_v26 = vmul.f32 %v5137_v39, %v4832_v55  ;;  %v6636_v39 = vsub.s32 0, %v6635_v41  ;;  %v6192_v55 = vld [vmem:[%s6581_s11 + $0x30] sm:$0xff] }
0x1226   :  { %v2351_v56 = vpop.f32.mrf.mxu1 }
0x1227   :  { %v2366_v59 = vmul.f32 %v5141_v18, %v2351_v56  ;;  %v6139_v18 = vld [vmem:[%s6581_s11 + $0x68] sm:$0xff] }
0x1228   :  { %v4833_v23 = vpop.f32.mrf.mxu1  ;;  %v6199_v56 = vld [vmem:[%s6581_s11 + $0x28] sm:$0xff] }
0x1229   :  { %4836 = vmatprep.mubr.msk.f32.mxu1 %vm806_vm14, %v2366_v59  ;;  %v2369_v27 = vmul.f32 %v5139_v19, %v4833_v23  ;;  %v6206_v59 = vld [vmem:[%s6581_s11 + $0x20] sm:$0xff]  ;;  %v6213_v23 = vld [vmem:[%s6581_s11 + $0x18] sm:$0xff] }
0x122a   :  { %v2354_v24 = vpop.f32.mrf.mxu1 }
0x122b   :  { %v2367_v25 = vmul.f32 %v5143_v16, %v2354_v24  ;;  %v6637_v16 = vld [vmem:[#allocation11_spill] sm:$0xff]  ;;  %v6220_v24 = vld [vmem:[%s6581_s11 + $0x10] sm:$0xff] }
0x122d   :  { %4837 = vmatmul.mubr.msk.f32.vlgmr.msra.gmra.mxu1 %vm806_vm14, %v2367_v25  ;;  %v6227_v25 = vld [vmem:[%s6581_s11 + $0x8] sm:$0xff] }
0x122e   :  { %4839 = vmatprep.mubr.msk.f32.mxu1 %vm806_vm14, %v2368_v26  ;;  %v6234_v26 = vld [vmem:[%s6581_s11] sm:$0xff] }
0x1231   :  { %4840 = vmatmul.mubr.msk.f32.gmra.mxu1 %vm806_vm14, %v2369_v27  ;;  %v2676_v27 = vld [vmem:[%s6585_s3 + $0x8] sm:$0xff] }
0x1232   :  { %4846 = vmatprep.mubr.msk.bf16.mxu1 %vm5210_vm10, %v6626_v42 }
0x12ed   :  { %v4838_v28 = vpop.f32.mrf.mxu1 }
0x12ee   :  { %v2468_v44 = vmul.f32 %v4838_v28, %v6023_v21  ;;  %v2590_v21 = vld [vmem:[%s6584_s9 + $0x8] sm:$0xff]  ;;  %v2675_v28 = vld [vmem:[%s6585_s3] sm:$0xff]  ;;  %s5211_s3 = smov 32  }
0x12ef   :  { %v2448_v29 = vpop.f32.mrf.mxu1 }
0x12f0   :  { %v2467_v33 = vmul.f32 %v2448_v29, %v6025_v53  ;;  %v2591_v53 = vld [vmem:[%s6584_s9 + $0x10] sm:$0xff]  ;;  %v2678_v29 = vmul.f32 10000.0, %v2676_v27 }
0x12f1   :  { %v4841_v54 = vpop.f32.mrf.mxu1 }
0x12f2   :  { %v2470_v48 = vmul.f32 %v4841_v54, %v6027_v7  ;;  %v2471_v46 = vpack.c.bf16 %v2468_v44, %v2467_v33  ;;  %v2589_v7 = vld [vmem:[%s6584_s9] sm:$0xff]  ;;  %v2677_v54 = vmul.f32 10000.0, %v2675_v28 }
0x12f3   :  { %v2458_v38 = vpop.f32.mrf.mxu1 }
0x12f4   :  { %v2469_v11 = vmul.f32 %v2458_v38, %v6029_v20  ;;  %v5188_v20 = vld [vmem:[%s6578_s4] sm:$0x1] }
0x12f6   :  { %v2472_v51 = vpack.c.bf16 %v2470_v48, %v2469_v11 }
0x12f8   :  { %4843 = vmatpush3.bf16.msra.mxu1 %v2472_v51 }
0x12f9   :  { %4844 = vmatprep.subr.bf16.mxu1 %v6626_v42 }
0x12fc   :  { %4845 = vmatpush3.bf16.msra.mxu1 %v2471_v46 }
0x12fd   :  { %4885 = vmatprep.subr.mxu1 %v6626_v42 }
0x12ff   :  { %4847 = vmatmul.mubr.msk.bf16.vlgmr.msra.gmra.mxu1 %vm163_vm0, %v5618_v9 }
0x1300   :  { %4886 = vmatpush3.msra.mxu1 %v2592_v49  ;;  %4893 = vmatprep.mubr.msk.f32.mxu1 %vm5210_vm10, %v6626_v42 }
0x1301   :  { %4887 = vmatprep.subr.mxu1 %v6626_v42 }
0x1302   :  { %4888 = vmatpush3.msra.mxu1 %v2591_v53 }
0x1303   :  { %4889 = vmatprep.subr.mxu1 %v6626_v42 }
0x1304   :  { %4890 = vmatpush3.msra.mxu1 %v2590_v21 }
0x1305   :  { %4891 = vmatprep.subr.mxu1 %v6626_v42 }
0x1306   :  { %4892 = vmatpush3.msra.mxu1 %v2589_v7 }
0x1307   :  { %4894 = vmatmul.mubr.msk.f32.vlgmr.msra.gmra.mxu1 %vm163_vm0, %v5188_v20 }
0x1308   :  { %4898 = vmatprep.mubr.msk.bf16.mxu1 %vm429_vm5, %v5368_v32 }
0x13bf   :  { %v2507_v50 = vpop.f32.mrf.mxu1 }
0x13c0   :  { %4882 = vmatprep.mubr.f32.mxu0 %v2507_v50 }
0x13c1   :  { %v4848_v35 = vpop.f32.mrf.mxu1 }
0x13c3   :  { %v2510_v45 = vpop.f32.mrf.mxu1 }
0x13c4   :  { %4883 = vmatmul.mubr.f32.vlgmr.msra.gmra.mxu0 %v2510_v45 }
0x13c5   :  { %v4849_v52 = vpop.f32.mrf.mxu1  ;;  %4935 = vmatpush3.msra.mxu0 %v6069_v13 }
0x13c6   :  { %4936 = vmatprep.subr.mxu0 %v6130_v34 }
0x13c7   :  { %v2659_v47 = vpop.f32.mrf.mxu1  ;;  %4937 = vmatpush3.msra.mxu0 %v6130_v34 }
0x13c8   :  { %v2666_v19 = vrot.slane %v2659_v47, %v6636_v39  ;;  %4938 = vmatprep.subr.mxu0 %v6139_v18 }
0x13c9   :  { %v4895_v12 = vpop.f32.mrf.mxu1  ;;  %4939 = vmatpush3.msra.mxu0 %v6139_v18 }
0x13ca   :  { %v2668_v22 = vmul.f32 %v2666_v19, %v6637_v16  ;;  %v2667_v10 = vmul.f32 %v2666_v19, %v6638_v6  ;;  %4940 = vmatprep.subr.mxu0 %v6148_v14 }
0x13cb   :  { %4941 = vmatpush3.msra.mxu0 %v6148_v14 }
0x13cc   :  { %v2672_v8 = vsel %vm163_vm0, %v2668_v22, 0.0  ;;  %v2669_v36 = vsel %vm163_vm0, %v2667_v10, 0.0  ;;  %4942 = vmatprep.subr.mxu0 %v6157_v31 }
0x13cd   :  { %2673 = vadd.xlane.f32.xlu0 %v2672_v8  ;;  %2670 = vadd.xlane.f32.xlu1 %v2669_v36 }
0x13ce   :  { %4943 = vmatpush3.msra.mxu0 %v6157_v31 }
0x13cf   :  { %4944 = vmatprep.subr.mxu0 %v6164_v40 }
0x13d0   :  { %4945 = vmatpush3.msra.mxu0 %v6164_v40 }
0x13d1   :  { %4946 = vmatprep.subr.mxu0 %v6171_v17 }
0x13d2   :  { %4947 = vmatpush3.msra.mxu0 %v6171_v17 }
0x13d3   :  { %4948 = vmatprep.subr.mxu0 %v6178_v0 }
0x13d4   :  { %4949 = vmatpush3.msra.mxu0 %v6178_v0 }
0x13d5   :  { %4950 = vmatprep.subr.mxu0 %v6185_v15 }
0x13d6   :  { %4951 = vmatpush3.msra.mxu0 %v6185_v15 }
0x13d7   :  { %4952 = vmatprep.subr.mxu0 %v6192_v55 }
0x13d8   :  { %4953 = vmatpush3.msra.mxu0 %v6192_v55 }
0x13d9   :  { %4954 = vmatprep.subr.mxu0 %v6199_v56 }
0x13da   :  { %4955 = vmatpush3.msra.mxu0 %v6199_v56 }
0x13db   :  { %4956 = vmatprep.subr.mxu0 %v6206_v59 }
0x13dc   :  { %4957 = vmatpush3.msra.mxu0 %v6206_v59 }
0x13dd   :  { %4958 = vmatprep.subr.mxu0 %v6213_v23 }
0x13de   :  { %4959 = vmatpush3.msra.mxu0 %v6213_v23 }
0x13df   :  { %4960 = vmatprep.subr.mxu0 %v6220_v24 }
0x13e0   :  { %4961 = vmatpush3.msra.mxu0 %v6220_v24 }
0x13e1   :  { %4962 = vmatprep.subr.mxu0 %v6227_v25 }
0x13e2   :  { %4963 = vmatpush3.msra.mxu0 %v6227_v25 }
0x13e3   :  { %4964 = vmatprep.subr.mxu0 %v6234_v26 }
0x13e4   :  { %4965 = vmatpush3.msra.mxu0 %v6234_v26 }
0x1456   :  { %v2674_v38 = vpop.xlane.xlu0 %2673  ;;  %v2671_v48 = vpop.xlane.xlu1 %2670 }
0x1457   :  { %v2680_v11 = vadd.f32 %v2678_v29, %v2674_v38  ;;  %v2679_v33 = vadd.f32 %v2677_v54, %v2671_v48 }
0x1459   :  { %v4050_v51 = vadd.f32 -10000.0, %v2680_v11  ;;  %v4049_v44 = vadd.f32 -10000.0, %v2679_v33 }
0x145b   :  { %v2685_v46 = vsel %vm2683_vm12, %v4050_v51, -inf  ;;  %v2684_v49 = vsel %vm2683_vm12, %v4049_v44, -inf }
0x145c   :  { %v2686_v53 = vmax.f32 %v2684_v49, %v2685_v46 }
0x145e   :  { %v2687_v21 = vrot.slane %v2686_v53, 4 }
0x1460   :  { %v2688_v7 = vmax.f32 %v2686_v53, %v2687_v21 }
0x1462   :  { %v2689_v20 = vrot.slane %v2688_v7, 2 }
0x1464   :  { %v2690_v50 = vmax.f32 %v2688_v7, %v2689_v20 }
0x1466   :  { %v2691_v35 = vrot.slane %v2690_v50, 1 }
0x1468   :  { %v2692_v45 = vmax.f32 %v2690_v50, %v2691_v35  ;;  %v6269_v50 = vld [vmem:[%s6586_s10 + $0x10] sm:$0xff]  ;;  %v6283_v35 = vld [vmem:[%s6586_s10 + $0x8] sm:$0xff] }
0x146a   :  { %v2693_v52 = vsub.f32 %v4049_v44, %v2692_v45  ;;  %v2694_v47 = vsub.f32 %v4050_v51, %v2692_v45  ;;  %v6258_v44 = vld [vmem:[%s6586_s10 + $0x18] sm:$0xff]  ;;  %v6290_v45 = vld [vmem:[%s6586_s10] sm:$0xff]  ;;  %s5212_s10 = smov 96  }
0x146b   :  { %5004 = vmatprep.subr.mxu0 %v6258_v44 }
0x146c   :  { %v2695_v41 = vmul.f32 1.442695, %v2693_v52  ;;  %v2697_v39 = vmul.f32 1.442695, %v2694_v47 }
0x146e   :  { %5148 = vpow2.f32 %v2695_v41 }
0x146f   :  { %5150 = vpow2.f32 %v2697_v39 }
0x147b   :  { %v5149_v19 = vpop.eup %5148 }
0x147c   :  { %v5151_v12 = vpop.eup %5150  ;;  %v2699_v22 = vsel %vm2683_vm12, %v5149_v19, 0.0 }
0x147d   :  { %v2700_v10 = vsel %vm2683_vm12, %v5151_v12, 0.0 }
0x147e   :  { %v2701_v8 = vadd.f32 %v2700_v10, %v2699_v22 }
0x1480   :  { %v2702_v36 = vrot.slane %v2701_v8, 4 }
0x1482   :  { %v2703_v27 = vadd.f32 %v2702_v36, %v2701_v8 }
0x1484   :  { %v2704_v28 = vrot.slane %v2703_v27, 2 }
0x1486   :  { %v2705_v29 = vadd.f32 %v2704_v28, %v2703_v27 }
0x1488   :  { %v2706_v54 = vrot.slane %v2705_v29, 1 }
0x148a   :  { %v2707_v38 = vadd.f32 %v2706_v54, %v2705_v29 }
0x148c   :  { %5152 = vrcp.f32 %v2707_v38 }
0x1499   :  { %v5153_v48 = vpop.eup %5152 }
0x149a   :  { %v6248_v11 = vmul.f32 %v5153_v48, %v5149_v19  ;;  %v6250_v33 = vmul.f32 %v5153_v48, %v5151_v12 }
0x149c   :  { %v5102_v51 = vpack.i.bf16 %v6250_v33, %v6248_v11 }
0x149e   :  { %5103 = vrot.lane.b32.xlu1 %v5102_v51, %s5211_s3 }
0x1510   :  { %v5104_v46 = vpop.permute.xlu1 %5103 }
0x1511   :  { %v5106_v49 = vunpack.i.h.bf16 %v5104_v46  ;;  %v5105_v53 = vunpack.i.l.bf16 %v5104_v46 }
0x1513   :  { %v2719_v21 = vsel %vm163_vm0, %v5958_v58, %v5105_v53  ;;  %v2720_v7 = vsel %vm163_vm0, %v5955_v57, %v5106_v49 }
0x1514   :  { %v2721_v20 = vpack.c.bf16 %v2720_v7, %v2719_v21 }
0x1516   :  { %4896 = vmatprep.subr.bf16.mxu1 %v2721_v20 }
0x1517   :  { %4897 = vmatpush3.bf16.msra.mxu1 %v2721_v20 }
0x1518   :  { %4906 = vmatprep.subr.mxu1 %v6258_v44 }
0x151a   :  { %4899 = vmatmul.mubr.msk.bf16.vlgmr.msra.gmra.mxu1 %vm429_vm5, %v5365_v30 }
0x151b   :  { %4902 = vmatprep.mubr.msk.bf16.mxu1 %vm429_vm5, %v5374_v37  ;;  %4907 = vmatpush3.msra.mxu1 %v6258_v44 }
0x151c   :  { %4908 = vmatprep.subr.mxu1 %v6269_v50 }
0x151d   :  { %4909 = vmatpush3.msra.mxu1 %v6269_v50 }
0x151e   :  { %4910 = vmatprep.subr.mxu1 %v6283_v35 }
0x151f   :  { %4911 = vmatpush3.msra.mxu1 %v6283_v35 }
0x1520   :  { %4912 = vmatprep.subr.mxu1 %v6290_v45 }
0x1521   :  { %4913 = vmatpush3.msra.mxu1 %v6290_v45 }
0x1522   :  { %4903 = vmatmul.mubr.msk.bf16.gmra.mxu1 %vm429_vm5, %v5382_v43  ;;  %4920 = vmatprep.subr.mxu1 %v5965_v60 }
0x15da   :  { %v6295_v52 = vpop.f32.mrf.mxu1 }
0x15db   :  { %v2789_v47 = vmul.f32 %v6295_v52, %v5510_v5 }
0x15dc   :  { %v6299_v41 = vpop.f32.mrf.mxu1 }
0x15dd   :  { %4914 = vmatprep.mubr.msk.f32.mxu1 %vm163_vm0, %v6299_v41  ;;  %v2797_v39 = vsel %vm163_vm0, %v2789_v47, 0.0  ;;  %v2787_v19 = vmul.f32 %v6299_v41, %v5506_v3 }
0x15de   :  { %2798 = vadd.xlane.f32.xlu1 %v2797_v39  ;;  %v6306_v12 = vpop.f32.mrf.mxu1 }
0x15df   :  { %v2791_v22 = vsel %vm163_vm0, %v2787_v19, 0.0  ;;  %v2790_v28 = vmul.f32 %v6306_v12, %v5508_v4 }
0x15e0   :  { %2792 = vadd.xlane.f32.xlu0 %v2791_v22  ;;  %v6309_v10 = vpop.f32.mrf.mxu1  ;;  %v6347_v22 = vpop.f32.mrf.mxu0 }
0x15e1   :  { %4915 = vmatmul.mubr.msk.f32.vlgmr.msra.gmra.mxu1 %vm163_vm0, %v6309_v10  ;;  %v2788_v8 = vmul.f32 %v5504_v2, %v6309_v10  ;;  %v2800_v38 = vsel %vm163_vm0, %v2790_v28, 0.0 }
0x15e2   :  { %v4904_v36 = vpop.f32.mrf.mxu1  ;;  %4917 = vmatprep.mubr.msk.f32.mxu1 %vm163_vm0, %v6295_v52  ;;  %4921 = vmatpush3.msra.mxu1 %v5965_v60 }
0x15e3   :  { %4922 = vmatprep.subr.mxu1 %v5976_v61  ;;  %v2794_v27 = vsel %vm163_vm0, %v2788_v8, 0.0 }
0x15e4   :  { %4923 = vmatpush3.msra.mxu1 %v5976_v61  ;;  %2795 = vadd.xlane.f32.xlu0 %v2794_v27  ;;  %v2772_v29 = vpop.f32.mrf.mxu1 }
0x15e5   :  { %4918 = vmatmul.mubr.msk.f32.gmra.mxu1 %vm163_vm0, %v6306_v12  ;;  %4924 = vmatprep.subr.mxu1 %v5983_v62 }
0x15e6   :  { %v4905_v54 = vpop.f32.mrf.mxu1  ;;  %4925 = vmatpush3.msra.mxu1 %v5983_v62  ;;  %4928 = vmatprep.mubr.msk.f32.mxu1 %vm163_vm0, %v2772_v29 }
0x15e7   :  { %4926 = vmatprep.subr.mxu1 %v5990_v63 }
0x15e8   :  { %4927 = vmatpush3.msra.mxu1 %v5990_v63  ;;  %2801 = vadd.xlane.f32.xlu0 %v2800_v38  ;;  %v2775_v61 = vpop.f32.mrf.mxu1 }
0x15e9   :  { %4929 = vmatmul.mubr.msk.f32.vlgmr.msra.gmra.mxu1 %vm163_vm0, %v2775_v61  ;;  %4972 = vmatprep.subr.bf16.mxu1 %v6626_v42 }
0x15ea   :  { %4931 = vmatprep.mubr.msk.f32.mxu1 %vm163_vm0, %v4904_v36 }
0x15ed   :  { %4932 = vmatmul.mubr.msk.f32.gmra.mxu1 %vm163_vm0, %v4905_v54 }
0x15ee   :  { %4976 = vmatprep.mubr.msk.bf16.mxu1 %vm5210_vm10, %v6626_v42 }
0x1615   :  { %3125 = vxpose.xlu0.c.b16.start [1/2] (short) (narrow) %v5368_v32, 16 }
0x1619   :  { %3126 = vxpose.xlu0.c.b16.end [2/2] (short) (narrow) %v5365_v30, 16 }
0x1669   :  { %v2793_v19 = vpop.xlane.xlu0 %2792 }
0x166d   :  { %v2796_v8 = vpop.xlane.xlu0 %2795 }
0x1671   :  { %v2802_v29 = vpop.xlane.xlu0 %2801 }
0x16a1   :  { %v4916_v62 = vpop.f32.mrf.mxu1 }
0x16a3   :  { %v2881_v48 = vpop.f32.mrf.mxu1 }
0x16a5   :  { %v4919_v63 = vpop.f32.mrf.mxu1 }
0x16a7   :  { %v2891_v51 = vpop.f32.mrf.mxu1 }
0x16a9   :  { %v4930_v46 = vpop.f32.mrf.mxu1 }
0x16aa   :  { %v2998_v21 = vmul.f32 %v4930_v46, %v4916_v62  ;;  %v2799_v62 = vpop.xlane.xlu1 %2798 }
0x16ab   :  { %v2978_v49 = vpop.f32.mrf.mxu1 }
0x16ac   :  { %v2997_v53 = vmul.f32 %v2978_v49, %v2881_v48 }
0x16ad   :  { %v4933_v7 = vpop.f32.mrf.mxu1 }
0x16ae   :  { %4966 = vmatprep.mubr.f32.mxu0 %v2997_v53  ;;  %v3000_v39 = vmul.f32 %v4933_v7, %v4919_v63 }
0x16af   :  { %v2988_v20 = vpop.f32.mrf.mxu1  ;;  %4967 = vmatmul.mubr.f32.vlgmr.msra.gmra.mxu0 %v2998_v21 }
0x16b0   :  { %v2999_v47 = vmul.f32 %v2988_v20, %v2891_v51  ;;  %5005 = vmatpush3.msra.mxu0 %v6258_v44  ;;  %v6349_v44 = vpop.f32.mrf.mxu0 }
0x16b1   :  { %5006 = vmatprep.subr.mxu0 %v6269_v50 }
0x16b2   :  { %4969 = vmatprep.mubr.f32.mxu0 %v2999_v47  ;;  %5007 = vmatpush3.msra.mxu0 %v6269_v50 }
0x16b3   :  { %4970 = vmatmul.mubr.f32.gmra.mxu0 %v3000_v39  ;;  %5008 = vmatprep.subr.mxu0 %v6283_v35 }
0x16b4   :  { %5009 = vmatpush3.msra.mxu0 %v6283_v35 }
0x16b5   :  { %5010 = vmatprep.subr.mxu0 %v6290_v45 }
0x16b6   :  { %5011 = vmatpush3.msra.mxu0 %v6290_v45 }
0x16b7   :  { %5018 = vmatprep.subr.mxu0 %v5965_v60 }
0x176f   :  { %v4968_v36 = vpop.f32.mrf.mxu0 }
0x1770   :  { %v3073_v27 = vadd.f32 %v4968_v36, %v2796_v8 }
0x1771   :  { %v3067_v50 = vpop.f32.mrf.mxu0 }
0x1772   :  { %v3068_v28 = vadd.f32 %v3067_v50, %v2793_v19  ;;  %v3091_v38 = vmul.f32 0.01, %v3073_v27  ;;  %vm3087_vm15 = vcmp.ge.f32.partialorder %v3073_v27, 0.0 }
0x1773   :  { %v4971_v54 = vpop.f32.mrf.mxu0 }
0x1774   :  { %vm3086_vm13 = vcmp.ge.f32.partialorder %v3068_v28, 0.0  ;;  %v3090_v35 = vmul.f32 0.01, %v3068_v28  ;;  %v3083_v61 = vadd.f32 %v4971_v54, %v2802_v29  ;;  %v3095_v51 = vsel %vm3087_vm15, %v3073_v27, %v3091_v38 }
0x1775   :  { %v3077_v45 = vpop.f32.mrf.mxu0  ;;  %v3099_v7 = vsel %vm806_vm14, %v3095_v51, -inf }
0x1776   :  { %v3094_v60 = vsel %vm3086_vm13, %v3068_v28, %v3090_v35  ;;  %vm3089_vm1 = vcmp.ge.f32.partialorder %v3083_v61, 0.0  ;;  %v3093_v48 = vmul.f32 0.01, %v3083_v61  ;;  %v3078_v63 = vadd.f32 %v3077_v45, %v2799_v62 }
0x1777   :  { %v3098_v53 = vsel %vm806_vm14, %v3094_v60, -inf }
0x1778   :  { %v3097_v46 = vsel %vm3089_vm1, %v3083_v61, %v3093_v48  ;;  %vm3088_vm2 = vcmp.ge.f32.partialorder %v3078_v63, 0.0  ;;  %v3092_v49 = vmul.f32 0.01, %v3078_v63  ;;  %v3102_v39 = vmax.f32 %v3098_v53, %v3099_v7 }
0x1779   :  { %v3101_v20 = vsel %vm806_vm14, %v3097_v46, -inf }
0x177a   :  { %v3096_v21 = vsel %vm3088_vm2, %v3078_v63, %v3092_v49 }
0x177b   :  { %v3100_v47 = vsel %vm806_vm14, %v3096_v21, -inf }
0x177c   :  { %v3103_v19 = vmax.f32 %v3100_v47, %v3101_v20 }
0x177e   :  { %v3104_v8 = vmax.f32 %v3102_v39, %v3103_v19 }
0x1780   :  { %v3105_v36 = vrot.slane %v3104_v8, 4 }
0x1782   :  { %v3106_v50 = vmax.f32 %v3104_v8, %v3105_v36 }
0x1784   :  { %v3107_v28 = vrot.slane %v3106_v50, 2 }
0x1786   :  { %v3108_v29 = vmax.f32 %v3106_v50, %v3107_v28 }
0x1788   :  { %v3109_v27 = vrot.slane %v3108_v29, 1 }
0x178a   :  { %v3110_v54 = vmax.f32 %v3108_v29, %v3109_v27 }
0x178c   :  { %v3111_v38 = vsub.f32 %v3094_v60, %v3110_v54  ;;  %v3112_v35 = vsub.f32 %v3095_v51, %v3110_v54  ;;  %v3113_v61 = vsub.f32 %v3096_v21, %v3110_v54  ;;  %v3114_v62 = vsub.f32 %v3097_v46, %v3110_v54  ;;  %v6356_v51 = vpop.trf.xlu0 }
0x178e   :  { %v3119_v45 = vmul.f32 1.442695, %v3113_v61  ;;  %v3121_v48 = vmul.f32 1.442695, %v3114_v62  ;;  %v3115_v63 = vmul.f32 1.442695, %v3111_v38 }
0x178f   :  { %v3117_v49 = vmul.f32 1.442695, %v3112_v35 }
0x1790   :  { %5154 = vpow2.f32 %v3119_v45 }
0x1791   :  { %5156 = vpow2.f32 %v3121_v48 }
0x1792   :  { %5158 = vpow2.f32 %v3115_v63 }
0x1793   :  { %5160 = vpow2.f32 %v3117_v49 }
0x179d   :  { %v5155_v53 = vpop.eup %5154 }
0x179e   :  { %v5157_v7 = vpop.eup %5156 }
0x179f   :  { %v5159_v20 = vpop.eup %5158  ;;  %v3124_v47 = vpack.c.bf16 %v5157_v7, %v5155_v53 }
0x17a0   :  { %v5161_v39 = vpop.eup %5160 }
0x17a1   :  { %4973 = vmatpush3.bf16.msra.mxu1 %v3124_v47  ;;  %v3123_v60 = vpack.c.bf16 %v5161_v39, %v5159_v20 }
0x17a2   :  { %4974 = vmatprep.subr.bf16.mxu1 %v6626_v42 }
0x17a5   :  { %4975 = vmatpush3.bf16.msra.mxu1 %v3123_v60 }
0x17a8   :  { %4977 = vmatmul.mubr.msk.bf16.vlgmr.msra.gmra.mxu1 %vm163_vm0, %v6356_v51 }
0x17a9   :  { %4982 = vmatprep.mubr.msk.bf16.mxu1 %vm429_vm5, %v5368_v32 }
0x1868   :  { %v3178_v46 = vpop.f32.mrf.mxu1 }
0x1869   :  { %v3179_v21 = vadd.f32 1e-30, %v3178_v46 }
0x186a   :  { %v4978_v19 = vpop.f32.mrf.mxu1 }
0x186b   :  { %5162 = vrcp.f32 %v3179_v21 }
0x186c   :  { %v3181_v8 = vpop.f32.mrf.mxu1 }
0x186d   :  { %v3182_v36 = vadd.f32 1e-30, %v3181_v8 }
0x186e   :  { %v4979_v50 = vpop.f32.mrf.mxu1 }
0x186f   :  { %5164 = vrcp.f32 %v3182_v36 }
0x1878   :  { %v5163_v28 = vpop.eup %5162 }
0x187c   :  { %v5165_v29 = vpop.eup %5164 }
0x187d   :  { %v3187_v27 = vpack.c.bf16 %v5165_v29, %v5163_v28 }
0x187f   :  { %4980 = vmatprep.subr.bf16.mxu1 %v3187_v27 }
0x1880   :  { %4981 = vmatpush3.bf16.msra.mxu1 %v3187_v27 }
0x1881   :  { %4986 = vmatprep.subr.bf16.mxu1 %v6626_v42 }
0x1883   :  { %4983 = vmatmul.mubr.msk.bf16.vlgmr.msra.gmra.mxu1 %vm429_vm5, %v5365_v30 }
0x1884   :  { %4990 = vmatprep.mubr.msk.bf16.mxu1 %vm5210_vm10, %v6626_v42 }
0x1943   :  { %v4984_v54 = vpop.f32.mrf.mxu1 }
0x1944   :  { %v3239_v38 = vmul.f32 %v5155_v53, %v4984_v54 }
0x1945   :  { %v3222_v35 = vpop.f32.mrf.mxu1 }
0x1946   :  { %v3237_v61 = vmul.f32 %v5159_v20, %v3222_v35  ;;  %v3247_v62 = vsel %vm806_vm14, %v3239_v38, 0.0 }
0x1947   :  { %3248 = vadd.xlane.f32.xlu1 %v3247_v62  ;;  %v4985_v45 = vpop.f32.mrf.mxu1 }
0x1948   :  { %v3240_v48 = vmul.f32 %v5157_v7, %v4985_v45  ;;  %v3241_v63 = vsel %vm806_vm14, %v3237_v61, 0.0 }
0x1949   :  { %v3225_v49 = vpop.f32.mrf.mxu1 }
0x194a   :  { %v3238_v47 = vmul.f32 %v5161_v39, %v3225_v49  ;;  %v3250_v60 = vsel %vm806_vm14, %v3240_v48, 0.0  ;;  %v6403_v48 = vadd.f32 %v6347_v22, %v5800_v1 }
0x194b   :  { %3242 = vadd.xlane.f32.xlu1 %v3241_v63  ;;  %v6407_v63 = vadd.f32 %v6349_v44, %v5800_v1 }
0x194c   :  { %v3244_v46 = vsel %vm806_vm14, %v3238_v47, 0.0 }
0x194f   :  { %3251 = vadd.xlane.f32.xlu1 %v3250_v60 }
0x1953   :  { %3245 = vadd.xlane.f32.xlu1 %v3244_v46 }
0x19d0   :  { %v3249_v21 = vpop.xlane.xlu1 %3248 }
0x19d1   :  { %v6371_v19 = vmul.f32 0.25, %v3249_v21 }
0x19d3   :  { %v3259_v7 = vmul.f32 %v6295_v52, %v6371_v19 }
0x19d4   :  { %v3243_v53 = vpop.xlane.xlu1 %3242 }
0x19d5   :  { %v6377_v36 = vmul.f32 0.25, %v3243_v53 }
0x19d7   :  { %v3257_v27 = vmul.f32 %v6377_v36, %v6299_v41 }
0x19d8   :  { %v3252_v20 = vpop.xlane.xlu1 %3251 }
0x19d9   :  { %v6373_v8 = vmul.f32 0.25, %v3252_v20 }
0x19db   :  { %v3260_v39 = vmul.f32 %v6306_v12, %v6373_v8 }
0x19dc   :  { %v3246_v50 = vpop.xlane.xlu1 %3245 }
0x19dd   :  { %v6381_v28 = vmul.f32 0.25, %v3246_v50  ;;  %v3262_v29 = vpack.c.bf16 %v3260_v39, %v3259_v7 }
0x19df   :  { %v3258_v54 = vmul.f32 %v6381_v28, %v6309_v10  ;;  %3267 = vrot.lane.b32.xlu1 %v3262_v29, %s5212_s10 }
0x19e1   :  { %v3261_v38 = vpack.c.bf16 %v3258_v54, %v3257_v27 }
0x19e3   :  { %3265 = vrot.lane.b32.xlu0 %v3261_v38, %s5212_s10 }
0x1a51   :  { %v3268_v52 = vpop.permute.xlu1 %3267 }
0x1a52   :  { %4987 = vmatpush3.bf16.msra.mxu1 %v3268_v52 }
0x1a53   :  { %4988 = vmatprep.subr.bf16.mxu1 %v6626_v42 }
0x1a55   :  { %v3266_v12 = vpop.permute.xlu0 %3265 }
0x1a56   :  { %4989 = vmatpush3.bf16.msra.mxu1 %v3266_v12 }
0x1a59   :  { %4991 = vmatmul.mubr.msk.bf16.vlgmr.msra.gmra.mxu1 %vm163_vm0, %v5618_v9 }
0x1a5a   :  { %4996 = vmatprep.mubr.msk.bf16.mxu1 %vm429_vm5, %v5368_v32 }
0x1b19   :  { %v6394_v41 = vpop.f32.mrf.mxu1 }
0x1b1b   :  { %v4992_v10 = vpop.f32.mrf.mxu1 }
0x1b1d   :  { %v6396_v35 = vpop.f32.mrf.mxu1 }
0x1b1e   :  { %v5107_v61 = vpack.i.bf16 %v6396_v35, %v6394_v41 }
0x1b1f   :  { %v4993_v62 = vpop.f32.mrf.mxu1 }
0x1b20   :  { %5108 = vrot.lane.b32.xlu0 %v5107_v61, %s5211_s3 }
0x1b92   :  { %v5109_v45 = vpop.permute.xlu0 %5108 }
0x1b93   :  { %v5111_v49 = vunpack.i.h.bf16 %v5109_v45  ;;  %v5110_v47 = vunpack.i.l.bf16 %v5109_v45 }
0x1b95   :  { %v3320_v60 = vsel %vm163_vm0, %v6407_v63, %v5110_v47  ;;  %v3321_v46 = vsel %vm163_vm0, %v6403_v48, %v5111_v49 }
0x1b96   :  { %v3322_v21 = vpack.c.bf16 %v3321_v46, %v3320_v60 }
0x1b98   :  { %4994 = vmatprep.subr.bf16.mxu1 %v3322_v21 }
0x1b99   :  { %4995 = vmatpush3.bf16.msra.mxu1 %v3322_v21 }
0x1b9a   :  { %5032 = vmatprep.subr.mxu1 %v6069_v13 }
0x1b9c   :  { %4997 = vmatmul.mubr.msk.bf16.vlgmr.msra.gmra.mxu1 %vm429_vm5, %v5365_v30 }
0x1b9d   :  { %5000 = vmatprep.mubr.msk.bf16.mxu1 %vm429_vm5, %v5374_v37  ;;  %5033 = vmatpush3.msra.mxu1 %v6069_v13 }
0x1b9e   :  { %5034 = vmatprep.subr.mxu1 %v6130_v34 }
0x1b9f   :  { %5035 = vmatpush3.msra.mxu1 %v6130_v34 }
0x1ba0   :  { %5036 = vmatprep.subr.mxu1 %v6139_v18 }
0x1ba1   :  { %5037 = vmatpush3.msra.mxu1 %v6139_v18 }
0x1ba2   :  { %5038 = vmatprep.subr.mxu1 %v6148_v14 }
0x1ba3   :  { %5039 = vmatpush3.msra.mxu1 %v6148_v14 }
0x1ba4   :  { %5001 = vmatmul.mubr.msk.bf16.gmra.mxu1 %vm429_vm5, %v5382_v43  ;;  %5040 = vmatprep.subr.mxu1 %v6157_v31 }
0x1ba5   :  { %5041 = vmatpush3.msra.mxu1 %v6157_v31 }
0x1ba6   :  { %5042 = vmatprep.subr.mxu1 %v6164_v40 }
0x1ba7   :  { %5043 = vmatpush3.msra.mxu1 %v6164_v40 }
0x1ba8   :  { %5044 = vmatprep.subr.mxu1 %v6171_v17 }
0x1ba9   :  { %5045 = vmatpush3.msra.mxu1 %v6171_v17 }
0x1baa   :  { %5046 = vmatprep.subr.mxu1 %v6178_v0 }
0x1bab   :  { %5047 = vmatpush3.msra.mxu1 %v6178_v0 }
0x1bac   :  { %5048 = vmatprep.subr.mxu1 %v6185_v15 }
0x1bad   :  { %5049 = vmatpush3.msra.mxu1 %v6185_v15 }
0x1bae   :  { %5050 = vmatprep.subr.mxu1 %v6192_v55 }
0x1baf   :  { %5051 = vmatpush3.msra.mxu1 %v6192_v55  ;;  %v5206_v55 = vld [vmem:[%s6579_s13 + $0x8] sm:$0xff] }
0x1bb0   :  { %5052 = vmatprep.subr.mxu1 %v6199_v56 }
0x1bb1   :  { %5053 = vmatpush3.msra.mxu1 %v6199_v56 }
0x1bb2   :  { %5054 = vmatprep.subr.mxu1 %v6206_v59 }
0x1bb3   :  { %5055 = vmatpush3.msra.mxu1 %v6206_v59 }
0x1bb4   :  { %5056 = vmatprep.subr.mxu1 %v6213_v23 }
0x1bb5   :  { %5057 = vmatpush3.msra.mxu1 %v6213_v23 }
0x1bb6   :  { %5058 = vmatprep.subr.mxu1 %v6220_v24 }
0x1bb7   :  { %5059 = vmatpush3.msra.mxu1 %v6220_v24 }
0x1bb8   :  { %5060 = vmatprep.subr.mxu1 %v6227_v25 }
0x1bb9   :  { %5061 = vmatpush3.msra.mxu1 %v6227_v25 }
0x1bba   :  { %5062 = vmatprep.subr.mxu1 %v6234_v26 }
0x1bbb   :  { %5063 = vmatpush3.msra.mxu1 %v6234_v26 }
0x1c5c   :  { %v6451_v37 = vpop.f32.mrf.mxu1 }
0x1c5d   :  { %v3390_v18 = vmul.f32 %v6451_v37, %v5510_v5  ;;  %v5205_v5 = vld [vmem:[%s6579_s13 + $0x10] sm:$0xff] }
0x1c5e   :  { %v6453_v43 = vpop.f32.mrf.mxu1 }
0x1c5f   :  { %5012 = vmatprep.mubr.msk.f32.mxu0 %vm163_vm0, %v6453_v43  ;;  %v3388_v1 = vmul.f32 %v6453_v43, %v5506_v3  ;;  %v5204_v3 = vld [vmem:[%s6579_s13 + $0x18] sm:$0xff]  ;;  %v3398_v17 = vsel %vm163_vm0, %v3390_v18, 0.0 }
0x1c60   :  { %v6459_v13 = vpop.f32.mrf.mxu1 }
0x1c61   :  { %v3392_v34 = vsel %vm163_vm0, %v3388_v1, 0.0 }
0x1c62   :  { %3393 = vadd.xlane.f32.xlu0 %v3392_v34  ;;  %v6464_v14 = vpop.f32.mrf.mxu1 }
0x1c63   :  { %5013 = vmatmul.mubr.msk.f32.vlgmr.msra.gmra.mxu0 %vm163_vm0, %v6464_v14  ;;  %v3389_v31 = vmul.f32 %v5504_v2, %v6464_v14  ;;  %v3391_v2 = vmul.f32 %v6459_v13, %v5508_v4  ;;  %v5207_v4 = vld [vmem:[%s6579_s13] sm:$0xff] }
0x1c64   :  { %v5002_v40 = vpop.f32.mrf.mxu1  ;;  %5015 = vmatprep.mubr.msk.f32.mxu0 %vm163_vm0, %v6451_v37  ;;  %5019 = vmatpush3.msra.mxu0 %v5204_v3 }
0x1c65   :  { %5020 = vmatprep.subr.mxu0 %v5205_v5  ;;  %v3395_v0 = vsel %vm163_vm0, %v3389_v31, 0.0  ;;  %v3401_v59 = vsel %vm163_vm0, %v3391_v2, 0.0 }
0x1c66   :  { %3399 = vadd.xlane.f32.xlu0 %v3398_v17  ;;  %5021 = vmatpush3.msra.mxu0 %v5205_v5  ;;  %v3373_v15 = vpop.f32.mrf.mxu1 }
0x1c67   :  { %3396 = vadd.xlane.f32.xlu1 %v3395_v0  ;;  %5016 = vmatmul.mubr.msk.f32.gmra.mxu0 %vm163_vm0, %v6459_v13 }
0x1c68   :  { %5022 = vmatprep.subr.mxu0 %v5206_v55  ;;  %v5003_v56 = vpop.f32.mrf.mxu1  ;;  %5026 = vmatprep.mubr.msk.f32.mxu0 %vm163_vm0, %v3373_v15 }
0x1c69   :  { %5023 = vmatpush3.msra.mxu0 %v5206_v55 }
0x1c6a   :  { %5024 = vmatprep.subr.mxu0 %v5207_v4  ;;  %3402 = vadd.xlane.f32.xlu0 %v3401_v59  ;;  %v3376_v23 = vpop.f32.mrf.mxu1 }
0x1c6b   :  { %5025 = vmatpush3.msra.mxu0 %v5207_v4 }
0x1c6c   :  { %5027 = vmatmul.mubr.msk.f32.vlgmr.msra.gmra.mxu0 %vm163_vm0, %v3376_v23  ;;  %5070 = vmatprep.subr.bf16.mxu0 %v6626_v42 }
0x1c6d   :  { %5029 = vmatprep.mubr.msk.f32.mxu0 %vm163_vm0, %v5002_v40 }
0x1c70   :  { %5030 = vmatmul.mubr.msk.f32.gmra.mxu0 %vm163_vm0, %v5003_v56 }
0x1c71   :  { %5074 = vmatprep.mubr.msk.bf16.mxu0 %vm5210_vm10, %v6626_v42 }
0x1ceb   :  { %v3394_v54 = vpop.xlane.xlu0 %3393 }
0x1cef   :  { %v3400_v38 = vpop.xlane.xlu0 %3399 }
0x1cf0   :  { %v3397_v52 = vpop.xlane.xlu1 %3396 }
0x1cf3   :  { %v3403_v45 = vpop.xlane.xlu0 %3402 }
0x1d23   :  { %v5014_v24 = vpop.f32.mrf.mxu0 }
0x1d25   :  { %v3482_v25 = vpop.f32.mrf.mxu0 }
0x1d27   :  { %v5017_v26 = vpop.f32.mrf.mxu0 }
0x1d29   :  { %v3492_v22 = vpop.f32.mrf.mxu0 }
0x1d2c   :  { %v5028_v44 = vpop.f32.mrf.mxu0 }
0x1d2d   :  { %v3599_v7 = vmul.f32 %v5028_v44, %v5014_v24 }
0x1d2e   :  { %v3579_v53 = vpop.f32.mrf.mxu0 }
0x1d2f   :  { %v3598_v20 = vmul.f32 %v3579_v53, %v3482_v25 }
0x1d30   :  { %v5031_v39 = vpop.f32.mrf.mxu0 }
0x1d31   :  { %5064 = vmatprep.mubr.f32.mxu1 %v3598_v20  ;;  %v3601_v27 = vmul.f32 %v5031_v39, %v5017_v26 }
0x1d32   :  { %v3589_v50 = vpop.f32.mrf.mxu0  ;;  %5065 = vmatmul.mubr.f32.vlgmr.msra.gmra.mxu1 %v3599_v7 }
0x1d33   :  { %v3600_v29 = vmul.f32 %v3589_v50, %v3492_v22 }
0x1d35   :  { %5067 = vmatprep.mubr.f32.mxu1 %v3600_v29 }
0x1d36   :  { %5068 = vmatmul.mubr.f32.gmra.mxu1 %v3601_v27 }
0x1df2   :  { %v5066_v12 = vpop.f32.mrf.mxu1 }
0x1df3   :  { %v3674_v10 = vadd.f32 %v5066_v12, %v3397_v52 }
0x1df4   :  { %v3668_v61 = vpop.f32.mrf.mxu1 }
0x1df5   :  { %v3669_v62 = vadd.f32 %v3668_v61, %v3394_v54  ;;  %v3692_v47 = vmul.f32 0.01, %v3674_v10  ;;  %vm3688_vm4 = vcmp.ge.f32.partialorder %v3674_v10, 0.0 }
0x1df6   :  { %v5069_v49 = vpop.f32.mrf.mxu1 }
0x1df7   :  { %vm3687_vm3 = vcmp.ge.f32.partialorder %v3669_v62, 0.0  ;;  %v3691_v60 = vmul.f32 0.01, %v3669_v62  ;;  %v3684_v46 = vadd.f32 %v5069_v49, %v3403_v45  ;;  %v3696_v31 = vsel %vm3688_vm4, %v3674_v10, %v3692_v47 }
0x1df8   :  { %v3678_v21 = vpop.f32.mrf.mxu1  ;;  %v3700_v0 = vsel %vm806_vm14, %v3696_v31, -inf }
0x1df9   :  { %v3695_v1 = vsel %vm3687_vm3, %v3669_v62, %v3691_v60  ;;  %vm3690_vm6 = vcmp.ge.f32.partialorder %v3684_v46, 0.0  ;;  %v3694_v34 = vmul.f32 0.01, %v3684_v46  ;;  %v3679_v18 = vadd.f32 %v3678_v21, %v3400_v38 }
0x1dfa   :  { %v3699_v5 = vsel %vm806_vm14, %v3695_v1, -inf }
0x1dfb   :  { %v3698_v40 = vsel %vm3690_vm6, %v3684_v46, %v3694_v34  ;;  %vm3689_vm7 = vcmp.ge.f32.partialorder %v3679_v18, 0.0  ;;  %v3693_v3 = vmul.f32 0.01, %v3679_v18  ;;  %v3703_v55 = vmax.f32 %v3699_v5, %v3700_v0 }
0x1dfc   :  { %v3702_v2 = vsel %vm806_vm14, %v3698_v40, -inf }
0x1dfd   :  { %v3697_v17 = vsel %vm3689_vm7, %v3679_v18, %v3693_v3 }
0x1dfe   :  { %v3701_v15 = vsel %vm806_vm14, %v3697_v17, -inf }
0x1dff   :  { %v3704_v56 = vmax.f32 %v3701_v15, %v3702_v2 }
0x1e01   :  { %v3705_v59 = vmax.f32 %v3703_v55, %v3704_v56 }
0x1e03   :  { %v3706_v4 = vrot.slane %v3705_v59, 4 }
0x1e05   :  { %v3707_v23 = vmax.f32 %v3705_v59, %v3706_v4 }
0x1e07   :  { %v3708_v24 = vrot.slane %v3707_v23, 2 }
0x1e09   :  { %v3709_v25 = vmax.f32 %v3707_v23, %v3708_v24 }
0x1e0b   :  { %v3710_v26 = vrot.slane %v3709_v25, 1 }
0x1e0d   :  { %v3711_v22 = vmax.f32 %v3709_v25, %v3710_v26 }
0x1e0f   :  { %v3712_v44 = vsub.f32 %v3695_v1, %v3711_v22  ;;  %v3713_v53 = vsub.f32 %v3696_v31, %v3711_v22  ;;  %v3714_v20 = vsub.f32 %v3697_v17, %v3711_v22  ;;  %v3715_v7 = vsub.f32 %v3698_v40, %v3711_v22 }
0x1e11   :  { %v3720_v39 = vmul.f32 1.442695, %v3714_v20  ;;  %v3722_v50 = vmul.f32 1.442695, %v3715_v7  ;;  %v3716_v29 = vmul.f32 1.442695, %v3712_v44 }
0x1e12   :  { %v3718_v27 = vmul.f32 1.442695, %v3713_v53 }
0x1e13   :  { %5166 = vpow2.f32 %v3720_v39 }
0x1e14   :  { %5168 = vpow2.f32 %v3722_v50 }
0x1e15   :  { %5170 = vpow2.f32 %v3716_v29 }
0x1e16   :  { %5172 = vpow2.f32 %v3718_v27 }
0x1e20   :  { %v5167_v54 = vpop.eup %5166 }
0x1e21   :  { %v5169_v38 = vpop.eup %5168 }
0x1e22   :  { %v5171_v52 = vpop.eup %5170  ;;  %v3725_v12 = vpack.c.bf16 %v5169_v38, %v5167_v54 }
0x1e23   :  { %v5173_v10 = vpop.eup %5172 }
0x1e24   :  { %5071 = vmatpush3.bf16.msra.mxu0 %v3725_v12  ;;  %v3724_v61 = vpack.c.bf16 %v5173_v10, %v5171_v52 }
0x1e25   :  { %5072 = vmatprep.subr.bf16.mxu0 %v6626_v42 }
0x1e28   :  { %5073 = vmatpush3.bf16.msra.mxu0 %v3724_v61 }
0x1e2b   :  { %5075 = vmatmul.mubr.msk.bf16.vlgmr.msra.gmra.mxu0 %vm163_vm0, %v6356_v51 }
0x1e2c   :  { %5080 = vmatprep.mubr.msk.bf16.mxu0 %vm429_vm5, %v5368_v32 }
0x1eeb   :  { %v3760_v62 = vpop.f32.mrf.mxu0 }
0x1eec   :  { %v3761_v45 = vadd.f32 1e-30, %v3760_v62 }
0x1eed   :  { %v5076_v49 = vpop.f32.mrf.mxu0 }
0x1eee   :  { %5174 = vrcp.f32 %v3761_v45 }
0x1eef   :  { %v3763_v47 = vpop.f32.mrf.mxu0 }
0x1ef0   :  { %v3764_v60 = vadd.f32 1e-30, %v3763_v47 }
0x1ef1   :  { %v5077_v46 = vpop.f32.mrf.mxu0 }
0x1ef2   :  { %5176 = vrcp.f32 %v3764_v60 }
0x1efb   :  { %v5175_v21 = vpop.eup %5174 }
0x1eff   :  { %v5177_v1 = vpop.eup %5176 }
0x1f00   :  { %v3769_v34 = vpack.c.bf16 %v5177_v1, %v5175_v21 }
0x1f02   :  { %5078 = vmatprep.subr.bf16.mxu0 %v3769_v34 }
0x1f03   :  { %5079 = vmatpush3.bf16.msra.mxu0 %v3769_v34 }
0x1f04   :  { %5084 = vmatprep.subr.bf16.mxu0 %v6626_v42 }
0x1f06   :  { %5081 = vmatmul.mubr.msk.bf16.vlgmr.msra.gmra.mxu0 %vm429_vm5, %v5365_v30  ;;  %vm3953_vm5 = vcmask 15360  }
0x1f07   :  { %5088 = vmatprep.mubr.msk.bf16.mxu0 %vm5210_vm10, %v6626_v42  ;;  %vm3932_vm10 = vcmask 523264  }
0x1fc6   :  { %v5082_v32 = vpop.f32.mrf.mxu0 }
0x1fc7   :  { %v3821_v51 = vmul.f32 %v5167_v54, %v5082_v32 }
0x1fc8   :  { %v3804_v18 = vpop.f32.mrf.mxu0 }
0x1fc9   :  { %v3819_v31 = vmul.f32 %v5171_v52, %v3804_v18  ;;  %v3829_v40 = vsel %vm806_vm14, %v3821_v51, 0.0 }
0x1fca   :  { %3830 = vadd.xlane.f32.xlu1 %v3829_v40  ;;  %v5083_v3 = vpop.f32.mrf.mxu0 }
0x1fcb   :  { %v3822_v5 = vmul.f32 %v5169_v38, %v5083_v3  ;;  %v3823_v2 = vsel %vm806_vm14, %v3819_v31, 0.0 }
0x1fcc   :  { %v3807_v17 = vpop.f32.mrf.mxu0 }
0x1fcd   :  { %v3820_v0 = vmul.f32 %v5173_v10, %v3807_v17  ;;  %v3832_v15 = vsel %vm806_vm14, %v3822_v5, 0.0 }
0x1fce   :  { %3824 = vadd.xlane.f32.xlu1 %v3823_v2  ;;  %3833 = vadd.xlane.f32.xlu0 %v3832_v15 }
0x1fcf   :  { %v3826_v30 = vsel %vm806_vm14, %v3820_v0, 0.0  ;;  %vm3935_vm14 = vcmask 785408  }
0x1fd2   :  { %3827 = vadd.xlane.f32.xlu0 %v3826_v30 }
0x2053   :  { %v3831_v55 = vpop.xlane.xlu1 %3830 }
0x2054   :  { %v3837_v56 = vmul.f32 0.25, %v3831_v55 }
0x2056   :  { %v3951_v59 = vsel %vm2683_vm12, %v6371_v19, %v3837_v56  ;;  %v3841_v22 = vmul.f32 %v6451_v37, %v3837_v56 }
0x2057   :  { %v3956_v4 = vsel %vm3953_vm5, %v3951_v59, 0.0  ;;  %v3825_v23 = vpop.xlane.xlu1 %3824  ;;  %v3834_v24 = vpop.xlane.xlu0 %3833 }
0x2058   :  { %3960 = vst [vmem:[%s6587_s15 + $0x10] sm:$0xff] %v3956_v4  ;;  %v3835_v25 = vmul.f32 0.25, %v3825_v23  ;;  %v3838_v26 = vmul.f32 0.25, %v3834_v24 }
0x205a   :  { %v3949_v44 = vsel %vm2683_vm12, %v6377_v36, %v3835_v25  ;;  %v3842_v53 = vmul.f32 %v6459_v13, %v3838_v26  ;;  %v3952_v19 = vsel %vm2683_vm12, %v6373_v8, %v3838_v26  ;;  %v3839_v13 = vmul.f32 %v3835_v25, %v6453_v43 }
0x205b   :  { %v3954_v20 = vsel %vm3953_vm5, %v3949_v44, 0.0  ;;  %v3957_v7 = vsel %vm3953_vm5, %v3952_v19, 0.0  ;;  %v3828_v39 = vpop.xlane.xlu0 %3827 }
0x205c   :  { %3958 = vst [vmem:[%s6587_s15] sm:$0xff] %v3954_v20  ;;  %3961 = vst [vmem:[%s6587_s15 + $0x18] sm:$0xff] %v3957_v7  ;;  %v3836_v37 = vmul.f32 0.25, %v3828_v39  ;;  %v3844_v36 = vpack.c.bf16 %v3842_v53, %v3841_v22 }
0x205e   :  { %v3840_v50 = vmul.f32 %v3836_v37, %v6464_v14  ;;  %v3950_v8 = vsel %vm2683_vm12, %v6381_v28, %v3836_v37  ;;  %3849 = vrot.lane.b32.xlu1 %v3844_v36, %s5212_s10 }
0x205f   :  { %v3955_v29 = vsel %vm3953_vm5, %v3950_v8, 0.0 }
0x2060   :  { %3959 = vst [vmem:[%s6587_s15 + $0x8] sm:$0xff] %v3955_v29  ;;  %v3843_v27 = vpack.c.bf16 %v3840_v50, %v3839_v13  ;;  %s5214_s15 = smov 97  }
0x2062   :  { %3896 = vrot.lane.b32.xlu1 %v5958_v58, %s5211_s3  ;;  %3847 = vrot.lane.b32.xlu0 %v3843_v27, %s5212_s10 }
0x2066   :  { %3898 = vrot.lane.b32.xlu1 %v5955_v57, %s5211_s3  ;;  %3904 = vrot.lane.b32.xlu0 %v6407_v63, %s5213_s2 }
0x206a   :  { %3906 = vrot.lane.b32.xlu1 %v6403_v48, %s5213_s2  ;;  %3910 = vrot.lane.b32.xlu0 %v6248_v11, %s5212_s10 }
0x206e   :  { %3912 = vrot.lane.b32.xlu1 %v6250_v33, %s5212_s10  ;;  %3916 = vrot.lane.b32.xlu0 %v6394_v41, %s5214_s15 }
0x2072   :  { %3918 = vrot.lane.b32.xlu1 %v6396_v35, %s5214_s15 }
0x20d0   :  { %v3850_v58 = vpop.permute.xlu1 %3849 }
0x20d1   :  { %5085 = vmatpush3.bf16.msra.mxu0 %v3850_v58 }
0x20d2   :  { %5086 = vmatprep.subr.bf16.mxu0 %v6626_v42 }
0x20d4   :  { %v3848_v57 = vpop.permute.xlu0 %3847  ;;  %v3897_v63 = vpop.permute.xlu1 %3896 }
0x20d5   :  { %5087 = vmatpush3.bf16.msra.mxu0 %v3848_v57  ;;  %v3930_v38 = vsel %vm163_vm0, %v6638_v6, %v3897_v63 }
0x20d8   :  { %5089 = vmatmul.mubr.msk.bf16.vlgmr.msra.gmra.mxu0 %vm163_vm0, %v5618_v9  ;;  %v3899_v41 = vpop.permute.xlu1 %3898  ;;  %v3905_v43 = vpop.permute.xlu0 %3904 }
0x20d9   :  { %v3933_v9 = vsel %vm3932_vm10, %v3930_v38, %v3905_v43  ;;  %v3931_v62 = vsel %vm163_vm0, %v6637_v16, %v3899_v41 }
0x20dc   :  { %v3907_v35 = vpop.permute.xlu1 %3906  ;;  %v3911_v14 = vpop.permute.xlu0 %3910 }
0x20dd   :  { %v3936_v52 = vsel %vm3935_vm14, %v3933_v9, %v3911_v14  ;;  %v3934_v49 = vsel %vm3932_vm10, %v3931_v62, %v3907_v35 }
0x20e0   :  { %v3913_v54 = vpop.permute.xlu1 %3912  ;;  %v3917_v42 = vpop.permute.xlu0 %3916 }
0x20e1   :  { %v3939_v12 = vsel %vm3938_vm8, %v3936_v52, %v3917_v42  ;;  %v3937_v60 = vsel %vm3935_vm14, %v3934_v49, %v3913_v54 }
0x20e4   :  { %v3919_v10 = vpop.permute.xlu1 %3918 }
0x20e5   :  { %v3940_v6 = vsel %vm3938_vm8, %v3937_v60, %v3919_v10 }
0x2198   :  { %v3887_v28 = vpop.f32.mrf.mxu0 }
0x2199   :  { %3924 = vrot.lane.b32.xlu0 %v3887_v28, %s5215_s5 }
0x219a   :  { %v5090_v11 = vpop.f32.mrf.mxu0 }
0x219c   :  { %v3890_v48 = vpop.f32.mrf.mxu0 }
0x219d   :  { %3926 = vrot.lane.b32.xlu1 %v3890_v48, %s5215_s5 }
0x219e   :  { %v5091_v33 = vpop.f32.mrf.mxu0 }
0x220b   :  { %v3925_v61 = vpop.permute.xlu0 %3924 }
0x220c   :  { %v3942_v45 = vsel %vm3941_vm9, %v3939_v12, %v3925_v61 }
0x220d   :  { %v3945_v47 = vsel %vm3944_vm11, %v3942_v45, 0.0 }
0x220e   :  { %3947 = vst [vmem:[%s6588_s14] sm:$0xff] %v3945_v47 }
0x220f   :  { %v3927_v46 = vpop.permute.xlu1 %3926 }
0x2210   :  { %v3943_v21 = vsel %vm3941_vm9, %v3940_v6, %v3927_v46 }
0x2211   :  { %v3946_v1 = vsel %vm3944_vm11, %v3943_v21, 0.0 }
0x2212   :  { %3948 = vst [vmem:[%s6588_s14 + $0x8] sm:$0xff] %v3946_v1 }

</bundles_post_ra>
